<compile_context>
chip_gen: v5e
topology: v5e:2x2
jax: 0.10.0
libtpu: 0.0.40
codegen_flags: <defaults>
</compile_context>

<pallas_src>
import functools

import jax
import jax.numpy as jnp
from jax import lax
from jax.experimental import pallas as pl
from jax.experimental.pallas import tpu as pltpu

EPS = 1e-5
_LANE = 128


def _round_up(v, m):
    return (v + m - 1) // m * m


def _pick_tile(m, cap=512):
    """Largest divisor of m that is a multiple of 8 and <= cap (else the full m).

    TODO(synk): for awkward m with no 8-multiple divisor <= cap this falls back to a
    single full-m tile; a cdiv grid + masked last tile would be more robust.
    """
    t = min(m, cap) // 8 * 8
    while t >= 8:
        if m % t == 0:
            return t
        t -= 8
    return m


# --------------------------------------------------------------------------
# Pallas kernels
# --------------------------------------------------------------------------
def _expand_kernel(x_ref, w_ref, y_ref, st_ref):
    """1x1 expand (+ fused shortcut pre-conv) matmul with BN-stats epilogue.

    Column sums / sums-of-squares ride the MXU (ones-row matmul) instead of the XLU.
    """
    y = jnp.dot(x_ref[...], w_ref[...], preferred_element_type=jnp.float32)
    y_ref[...] = y.astype(y_ref.dtype)
    ones = jnp.ones((1, y.shape[0]), jnp.float32)
    st_ref[0, 0:1, :] = jnp.dot(ones, y, preferred_element_type=jnp.float32)
    st_ref[0, 1:2, :] = jnp.dot(ones, y * y, preferred_element_type=jnp.float32)


def _dw_kernel(y1_ref, s1_ref, t1_ref, w_ref, y2_ref, st_ref, zp_ref, *, stride):
    """BN1(scale/shift)+relu6 -> depthwise 3x3 (stride in-kernel) -> BN2 stats.

    Grid is (batch, 128-channel slab): depthwise conv has no cross-channel coupling,
    so each step touches a bounded VMEM footprint and pipelines/shards cleanly.
    """
    _, H, W, C = y1_ref.shape
    _, Ho, Wo, _ = y2_ref.shape
    Wp = W + 2
    f32 = jnp.float32

    # normalize + relu6 (BN folded to a single FMA), f32 regardless of storage dtype
    z = jnp.clip(y1_ref[0] * s1_ref[...] + t1_ref[...], 0.0, 6.0).astype(f32)

    # Zero only the 1-wide halo (2 rows + 2 columns), not the whole buffer, then
    # write the interior once.
    zp_ref[0, :, :] = jnp.zeros((Wp, C), f32)
    zp_ref[H + 1, :, :] = jnp.zeros((Wp, C), f32)
    zp_ref[1:H + 1, 0:1, :] = jnp.zeros((H, 1, C), f32)
    zp_ref[1:H + 1, W + 1:W + 2, :] = jnp.zeros((H, 1, C), f32)
    zp_ref[1:H + 1, 1:W + 1, :] = z

    wv = w_ref[...]                                  # (9, C) -- read once
    w_taps = [wv[k:k + 1, :] for k in range(9)]      # hoisted out of all tap loops

    if stride == 1:
        acc = jnp.zeros((Ho, Wo, C), f32)
        for kh in range(3):
            for kw in range(3):
                acc = acc + zp_ref[kh:kh + Ho, kw:kw + Wo, :] * w_taps[3 * kh + kw]
        y2_ref[0] = acc.astype(y2_ref.dtype)
        # BN2 stats straight from the live accumulator (no output re-read)
        st_ref[0, 0:1, :] = jnp.sum(jnp.sum(acc, axis=0), axis=0, keepdims=True)
        st_ref[0, 1:2, :] = jnp.sum(jnp.sum(acc * acc, axis=0), axis=0, keepdims=True)
    else:
        # Strided output computed directly (no stride-1 compute-and-discard); per-row
        # sums accumulated in the loop carry.
        # TODO(synk): even/odd column deinterleave per input row would cut the strided
        #             sublane reads ~3x; not applied here (path not exercised by test).
        def row_body(ho, carry):
            s_acc, q_acc = carry
            acc = jnp.zeros((Wo, C), f32)
            for kh in range(3):
                for kw in range(3):
                    row = zp_ref[stride * ho + kh, pl.ds(kw, Wo, stride=stride), :]
                    acc = acc + row * w_taps[3 * kh + kw]
            y2_ref[0, ho, :, :] = acc.astype(y2_ref.dtype)
            return (s_acc + jnp.sum(acc, axis=0, keepdims=True),
                    q_acc + jnp.sum(acc * acc, axis=0, keepdims=True))

        zero = jnp.zeros((1, C), f32)
        s, q = lax.fori_loop(0, Ho, row_body, (zero, zero), unroll=(Ho <= 16))
        st_ref[0, 0:1, :] = s
        st_ref[0, 1:2, :] = q


def _project_kernel(y2_ref, s2_ref, t2_ref, w_ref, y3_ref, st_ref):
    """BN2(scale/shift)+relu6 -> 1x1 project matmul -> BN3 stats epilogue."""
    z = jnp.clip(y2_ref[...] * s2_ref[...] + t2_ref[...], 0.0, 6.0)
    y = jnp.dot(z, w_ref[...], preferred_element_type=jnp.float32)
    y3_ref[...] = y.astype(y3_ref.dtype)
    ones = jnp.ones((1, z.shape[0]), jnp.float32)
    st_ref[0, 0:1, :] = jnp.dot(ones, y, preferred_element_type=jnp.float32)
    st_ref[0, 1:2, :] = jnp.dot(ones, y * y, preferred_element_type=jnp.float32)


def _finalize_res_kernel(y3_ref, s3_ref, t3_ref, yc_ref, ss_ref, ts_ref, o_ref):
    """BN3 + (shortcut BN or identity) + residual add; stores only real Cout lanes."""
    co = o_ref.shape[-1]
    full = (y3_ref[...] * s3_ref[...] + t3_ref[...]
            + yc_ref[...] * ss_ref[...] + ts_ref[...])
    o_ref[...] = full[:, :co].astype(o_ref.dtype)


def _finalize_kernel(y3_ref, s3_ref, t3_ref, o_ref):
    co = o_ref.shape[-1]
    o_ref[...] = (y3_ref[...] * s3_ref[...] + t3_ref[...])[:, :co].astype(o_ref.dtype)


# --------------------------------------------------------------------------
# Small helpers (tiny O(C) glue between the fused calls)
# --------------------------------------------------------------------------
def _finalize_stats(st_partial, count):
    s = jnp.sum(st_partial[:, 0, :], axis=0, keepdims=True)       # (1, C)
    sq = jnp.sum(st_partial[:, 1, :], axis=0, keepdims=True)      # (1, C)
    mean = s / count
    var = jnp.maximum(sq / count - mean * mean, 0.0)              # biased variance
    return mean, var


def _cost(flops, bytes_accessed):
    return pl.CostEstimate(flops=int(flops), transcendentals=0,
                           bytes_accessed=int(bytes_accessed))


# --------------------------------------------------------------------------
# Block forward (NCHW in / NCHW out, like the PyTorch module)
# --------------------------------------------------------------------------
@functools.partial(jax.jit, static_argnums=(2, 3))
def block_forward(x_nchw, params, stride, act_dtype=jnp.float32):
    N, Cin, H, W = x_nchw.shape
    P = params["w1"].shape[1]
    Cout = params["w3"].shape[1]
    Ho = (H - 1) // stride + 1
    Wo = (W - 1) // stride + 1
    M, M2 = N * H * W, N * Ho * Wo

    has_res = (stride == 1)
    off1 = Cout if has_res else 0            # column offset of the expand channels
    C1 = _round_up(off1 + P, _LANE)          # lane-padded width of the expand stage
    C3 = _round_up(Cout, _LANE)              # lane-padded width of the project stage
    n_cb = C1 // _LANE

    f32 = jnp.float32
    adt = act_dtype                          # storage dtype of the intermediates
    asz = jnp.dtype(adt).itemsize
    x2d = jnp.transpose(x_nchw, (0, 2, 3, 1)).reshape(M, Cin).astype(f32)

    # ---- lane-pad / place weights and BN affine params once (tiny, one-time) --------
    wcat = jnp.zeros((Cin, C1), f32).at[:, off1:off1 + P].set(params["w1"].astype(f32))
    if has_res:
        if Cin == Cout:
            wcat = wcat.at[:, :Cout].set(jnp.eye(Cin, dtype=f32))      # identity: copy x
        else:
            wcat = wcat.at[:, :Cout].set(params["w_sc"].astype(f32))   # shortcut conv
    g1p = jnp.zeros((1, C1), f32).at[:, off1:off1 + P].set(params["g1"].astype(f32))
    b1p = jnp.zeros((1, C1), f32).at[:, off1:off1 + P].set(params["b1"].astype(f32))
    g2p = jnp.zeros((1, C1), f32).at[:, off1:off1 + P].set(params["g2"].astype(f32))
    b2p = jnp.zeros((1, C1), f32).at[:, off1:off1 + P].set(params["b2"].astype(f32))
    wdwp = jnp.zeros((9, C1), f32).at[:, off1:off1 + P].set(
        params["w_dw"].reshape(9, P).astype(f32))
    w3p = jnp.zeros((C1, C3), f32).at[off1:off1 + P, :Cout].set(params["w3"].astype(f32))
    g3p = jnp.zeros((1, C3), f32).at[:, :Cout].set(params["g3"].astype(f32))
    b3p = jnp.zeros((1, C3), f32).at[:, :Cout].set(params["b3"].astype(f32))

    par1 = pltpu.CompilerParams(dimension_semantics=("parallel",))
    par2 = pltpu.CompilerParams(dimension_semantics=("parallel", "parallel"))

    # ---- K1: 1x1 expand (+ fused shortcut pre-conv), BN1 stats epilogue -------------
    tm1 = _pick_tile(M)
    G1 = M // tm1
    y1, st1 = pl.pallas_call(
        _expand_kernel,
        grid=(G1,),
        in_specs=[pl.BlockSpec((tm1, Cin), lambda i: (i, 0)),
                  pl.BlockSpec((Cin, C1), lambda i: (0, 0))],
        out_specs=(pl.BlockSpec((tm1, C1), lambda i: (i, 0)),
                   pl.BlockSpec((1, 2, C1), lambda i: (i, 0, 0))),
        out_shape=(jax.ShapeDtypeStruct((M, C1), adt),
                   jax.ShapeDtypeStruct((G1, 2, C1), f32)),
        compiler_params=par1,
        cost_estimate=_cost(2 * M * Cin * C1 + 6 * M * C1,
                            4 * (M * Cin + Cin * C1) + asz * M * C1),
    )(x2d, wcat)

    mean1, var1 = _finalize_stats(st1, M)
    scale1 = g1p * lax.rsqrt(var1 + EPS)
    shift1 = b1p - mean1 * scale1

    # ---- K2: BN1+relu6 -> depthwise 3x3 (stride in-kernel), BN2 stats ---------------
    # TODO(synk): for very large H*W a further row-tiling (with 1-row halo) or an
    #             explicit vmem_limit_bytes may be needed; unnecessary at these shapes.
    y1_4d = y1.reshape(N, H, W, C1)
    y2, st2 = pl.pallas_call(
        functools.partial(_dw_kernel, stride=stride),
        grid=(N, n_cb),
        in_specs=[pl.BlockSpec((1, H, W, _LANE), lambda n, c: (n, 0, 0, c)),
                  pl.BlockSpec((1, _LANE), lambda n, c: (0, c)),
                  pl.BlockSpec((1, _LANE), lambda n, c: (0, c)),
                  pl.BlockSpec((9, _LANE), lambda n, c: (0, c))],
        out_specs=(pl.BlockSpec((1, Ho, Wo, _LANE), lambda n, c: (n, 0, 0, c)),
                   pl.BlockSpec((1, 2, _LANE), lambda n, c: (n, 0, c))),
        out_shape=(jax.ShapeDtypeStruct((N, Ho, Wo, C1), adt),
                   jax.ShapeDtypeStruct((N, 2, C1), f32)),
        scratch_shapes=[pltpu.VMEM((H + 2, W + 2, _LANE), f32)],
        compiler_params=par2,
        cost_estimate=_cost(3 * M * C1 + 20 * M2 * C1,
                            asz * (M * C1 + M2 * C1) + 4 * 9 * C1),
    )(y1_4d, scale1, shift1, wdwp)

    mean2, var2 = _finalize_stats(st2, M2)
    scale2 = g2p * lax.rsqrt(var2 + EPS)
    shift2 = b2p - mean2 * scale2

    # ---- K3: BN2+relu6 -> 1x1 project, BN3 stats -------------------------------------
    y2_2d = y2.reshape(M2, C1)
    tm2 = _pick_tile(M2)
    G2 = M2 // tm2
    y3, st3 = pl.pallas_call(
        _project_kernel,
        grid=(G2,),
        in_specs=[pl.BlockSpec((tm2, C1), lambda i: (i, 0)),
                  pl.BlockSpec((1, C1), lambda i: (0, 0)),
                  pl.BlockSpec((1, C1), lambda i: (0, 0)),
                  pl.BlockSpec((C1, C3), lambda i: (0, 0))],
        out_specs=(pl.BlockSpec((tm2, C3), lambda i: (i, 0)),
                   pl.BlockSpec((1, 2, C3), lambda i: (i, 0, 0))),
        out_shape=(jax.ShapeDtypeStruct((M2, C3), adt),
                   jax.ShapeDtypeStruct((G2, 2, C3), f32)),
        compiler_params=par1,
        cost_estimate=_cost(2 * M2 * C1 * C3 + 3 * M2 * C1 + 6 * M2 * C3,
                            asz * (M2 * C1 + M2 * C3) + 4 * C1 * C3),
    )(y2_2d, scale2, shift2, w3p)

    mean3, var3 = _finalize_stats(st3, M2)
    scale3 = g3p * lax.rsqrt(var3 + EPS)
    shift3 = b3p - mean3 * scale3

    # ---- K4: BN3 (+ shortcut BN / identity + residual add), stores Cout lanes only ---
    if has_res:
        if Cin == Cout:
            sc_scale = jnp.zeros((1, C3), f32).at[:, :Cout].set(1.0)
            sc_shift = jnp.zeros((1, C3), f32)
        else:
            g_scp = jnp.zeros((1, C3), f32).at[:, :Cout].set(params["g_sc"].astype(f32))
            b_scp = jnp.zeros((1, C3), f32).at[:, :Cout].set(params["b_sc"].astype(f32))
            sc_scale = g_scp * lax.rsqrt(var1[:, :C3] + EPS)
            sc_shift = b_scp - mean1[:, :C3] * sc_scale
        out2d = pl.pallas_call(
            _finalize_res_kernel,
            grid=(G2,),
            in_specs=[pl.BlockSpec((tm2, C3), lambda i: (i, 0)),
                      pl.BlockSpec((1, C3), lambda i: (0, 0)),
                      pl.BlockSpec((1, C3), lambda i: (0, 0)),
                      pl.BlockSpec((tm2, C3), lambda i: (i, 0)),   # shortcut pre-acts
                      pl.BlockSpec((1, C3), lambda i: (0, 0)),
                      pl.BlockSpec((1, C3), lambda i: (0, 0))],
            out_specs=pl.BlockSpec((tm2, Cout), lambda i: (i, 0)),
            out_shape=jax.ShapeDtypeStruct((M2, Cout), f32),
            compiler_params=par1,
            cost_estimate=_cost(4 * M2 * C3, asz * 2 * M2 * C3 + 4 * M2 * Cout),
        )(y3, scale3, shift3, y1, sc_scale, sc_shift)
    else:
        out2d = pl.pallas_call(
            _finalize_kernel,
            grid=(G2,),
            in_specs=[pl.BlockSpec((tm2, C3), lambda i: (i, 0)),
                      pl.BlockSpec((1, C3), lambda i: (0, 0)),
                      pl.BlockSpec((1, C3), lambda i: (0, 0))],
            out_specs=pl.BlockSpec((tm2, Cout), lambda i: (i, 0)),
            out_shape=jax.ShapeDtypeStruct((M2, Cout), f32),
            compiler_params=par1,
            cost_estimate=_cost(2 * M2 * C3, asz * M2 * C3 + 4 * M2 * Cout),
        )(y3, scale3, shift3)

    # NCHW output to match the PyTorch module.
    # TODO(synk): when composing blocks into a full network, keep activations NHWC
    #             end-to-end and drop this transpose.
    out = out2d.reshape(N, Ho, Wo, Cout)
    return jnp.transpose(out, (0, 3, 1, 2))


# --------------------------------------------------------------------------
# Pure-JAX reference (for correctness check)
# --------------------------------------------------------------------------
def _bn_ref(y, g, b, relu6):
    m = jnp.mean(y, axis=(0, 1, 2), keepdims=True)
    v = jnp.mean((y - m) ** 2, axis=(0, 1, 2), keepdims=True)
    z = (y - m) / jnp.sqrt(v + EPS) * g + b
    return jnp.clip(z, 0.0, 6.0) if relu6 else z


def block_ref(x_nchw, params, stride):
    x = jnp.transpose(x_nchw, (0, 2, 3, 1)).astype(jnp.float32)
    Cin = x.shape[-1]
    planes = params["w1"].shape[1]
    Cout = params["w3"].shape[1]
    dn = ("NHWC", "HWIO", "NHWC")

    y = lax.conv_general_dilated(x, params["w1"].reshape(1, 1, Cin, planes),
                                 (1, 1), "VALID", dimension_numbers=dn)
    y = _bn_ref(y, params["g1"], params["b1"], True)
    y = lax.conv_general_dilated(y, params["w_dw"].reshape(3, 3, 1, planes),
                                 (stride, stride), ((1, 1), (1, 1)),
                                 dimension_numbers=dn,
                                 feature_group_count=planes)
    y = _bn_ref(y, params["g2"], params["b2"], True)
    y = lax.conv_general_dilated(y, params["w3"].reshape(1, 1, planes, Cout),
                                 (1, 1), "VALID", dimension_numbers=dn)
    y = _bn_ref(y, params["g3"], params["b3"], False)
    if stride == 1:
        if Cin == Cout:
            sc = x
        else:
            sc = lax.conv_general_dilated(x, params["w_sc"].reshape(1, 1, Cin, Cout),
                                          (1, 1), "VALID", dimension_numbers=dn)
            sc = _bn_ref(sc, params["g_sc"], params["b_sc"], False)
        y = y + sc
    return jnp.transpose(y, (0, 3, 1, 2))


# --------------------------------------------------------------------------
# Deterministic parameter construction
# --------------------------------------------------------------------------
def make_params(key, in_planes, out_planes, expansion):
    planes = expansion * in_planes
    ks = jax.random.split(key, 12)

    def bn_params(kg, kb, c):
        g = (1.0 + 0.1 * jax.random.normal(kg, (1, c))).astype(jnp.float32)
        b = (0.1 * jax.random.normal(kb, (1, c))).astype(jnp.float32)
        return g, b

    g1, b1 = bn_params(ks[3], ks[4], planes)
    g2, b2 = bn_params(ks[5], ks[6], planes)
    g3, b3 = bn_params(ks[7], ks[8], out_planes)
    g_sc, b_sc = bn_params(ks[10], ks[11], out_planes)
    return {
        "w1": (0.1 * jax.random.normal(ks[0], (in_planes, planes))).astype(jnp.float32),
        "w_dw": (0.1 * jax.random.normal(ks[1], (3, 3, planes))).astype(jnp.float32),
        "w3": (0.1 * jax.random.normal(ks[2], (planes, out_planes))).astype(jnp.float32),
        "w_sc": (0.1 * jax.random.normal(ks[9], (in_planes, out_planes))).astype(jnp.float32),
        "g1": g1, "b1": b1, "g2": g2, "b2": b2, "g3": g3, "b3": b3,
        "g_sc": g_sc, "b_sc": b_sc,
    }


# --------------------------------------------------------------------------
if __name__ == "__main__":
    key = jax.random.PRNGKey(0)
    k_x, k_p = jax.random.split(key)

    # Block(in_planes=4, out_planes=8, expansion=3, stride=1)
    N, Cin, H, W = 2, 4, 16, 16
    Cout, expansion, stride = 8, 3, 1

    x = jax.random.normal(k_x, (N, Cin, H, W), jnp.float32)
    params = make_params(k_p, Cin, Cout, expansion)

    ref = jax.block_until_ready(block_ref(x, params, stride))

    # f32 intermediates: tight check
    out = jax.block_until_ready(block_forward(x, params, stride, jnp.float32))
    assert out.shape == ref.shape, (out.shape, ref.shape)
    if not jnp.allclose(out, ref, rtol=1e-3, atol=1e-3):
        err = float(jnp.max(jnp.abs(out - ref)))
        raise AssertionError(f"Pallas block output mismatch, f32 (max abs err {err:.3e})")

    # bf16 intermediates (bandwidth-saving mode recommended on v6e/v7x): loose check
    out_bf16 = jax.block_until_ready(block_forward(x, params, stride, jnp.bfloat16))
    if not jnp.allclose(out_bf16, ref, rtol=5e-2, atol=1e-1):
        err = float(jnp.max(jnp.abs(out_bf16 - ref)))
        raise AssertionError(f"Pallas block output mismatch, bf16 (max abs err {err:.3e})")

    print("KERNEL_OK")
</pallas_src>

<mosaic_0001>
module attributes {stable_mosaic.version = 11 : i64} {
  func.func @_expand_kernel(%arg0: i32, %arg1: memref<512x4xf32, #tpu.memory_space<vmem>>, %arg2: memref<4x128xf32, #tpu.memory_space<vmem>>, %arg3: memref<512x128xf32, #tpu.memory_space<vmem>>, %arg4: memref<1x2x128xf32, #tpu.memory_space<vmem>>) attributes {dimension_semantics = [#tpu.dimension_semantics<parallel>], iteration_bounds = array<i64: 1>, scalar_prefetch = 0 : i64, scratch_operands = 0 : i64, tpu.core_type = #tpu.core_type<tc>, window_params = [{transform_indices = @transform_0, window_bounds = array<i64: 512, 4>}, {pipeline_mode = #tpu.pipeline_mode<synchronous>, transform_indices = @transform_1, window_bounds = array<i64: 4, 128>}, {transform_indices = @transform_2, window_bounds = array<i64: 512, 128>}, {transform_indices = @transform_3, window_bounds = array<i64: 1, 2, 128>}]} {
    %c0 = arith.constant 0 : index
    %c0_0 = arith.constant 0 : index
    %0 = vector.load %arg1[%c0, %c0_0] : memref<512x4xf32, #tpu.memory_space<vmem>>, vector<512x4xf32>
    %c0_1 = arith.constant 0 : index
    %c0_2 = arith.constant 0 : index
    %1 = vector.load %arg2[%c0_1, %c0_2] : memref<4x128xf32, #tpu.memory_space<vmem>>, vector<4x128xf32>
    %cst = arith.constant dense<0.000000e+00> : vector<512x128xf32>
    %2 = tpu.matmul %0, %1, %cst {dimension_numbers = #tpu.dot_dimension_numbers<[1], [0], [0], [1], [0, 0, 1, 1], [], []>} : vector<512x4xf32>, vector<4x128xf32>, vector<512x128xf32> -> vector<512x128xf32>
    %c0_3 = arith.constant 0 : index
    %c0_4 = arith.constant 0 : index
    %3 = vector.load %arg3[%c0_3, %c0_4] : memref<512x128xf32, #tpu.memory_space<vmem>>, vector<512x128xf32>
    tpu.vector_store %arg3[%c0_3, %c0_4], %2 {strides = array<i32>} : memref<512x128xf32, #tpu.memory_space<vmem>>, vector<512x128xf32>,
    %cst_5 = arith.constant 1.000000e+00 : f32
    %4 = vector.broadcast %cst_5 : f32 to vector<1x512xf32>
    %cst_6 = arith.constant dense<0.000000e+00> : vector<1x128xf32>
    %5 = tpu.matmul %4, %2, %cst_6 {dimension_numbers = #tpu.dot_dimension_numbers<[1], [0], [0], [1], [0, 0, 1, 1], [], []>} : vector<1x512xf32>, vector<512x128xf32>, vector<1x128xf32> -> vector<1x128xf32>
    %c0_7 = arith.constant 0 : index
    %c0_8 = arith.constant 0 : index
    %c0_9 = arith.constant 0 : index
    %6 = vector.load %arg4[%c0_7, %c0_8, %c0_9] : memref<1x2x128xf32, #tpu.memory_space<vmem>>, vector<1x1x128xf32>
    %7 = vector.shape_cast %6 : vector<1x1x128xf32> to vector<1x128xf32>
    %8 = vector.shape_cast %5 : vector<1x128xf32> to vector<1x1x128xf32>
    tpu.vector_store %arg4[%c0_7, %c0_8, %c0_9], %8 {strides = array<i32>} : memref<1x2x128xf32, #tpu.memory_space<vmem>>, vector<1x1x128xf32>,
    %9 = arith.mulf %2, %2 : vector<512x128xf32>
    %cst_10 = arith.constant dense<0.000000e+00> : vector<1x128xf32>
    %10 = tpu.matmul %4, %9, %cst_10 {dimension_numbers = #tpu.dot_dimension_numbers<[1], [0], [0], [1], [0, 0, 1, 1], [], []>} : vector<1x512xf32>, vector<512x128xf32>, vector<1x128xf32> -> vector<1x128xf32>
    %c0_11 = arith.constant 0 : index
    %c1 = arith.constant 1 : index
    %c0_12 = arith.constant 0 : index
    %11 = vector.load %arg4[%c0_11, %c1, %c0_12] : memref<1x2x128xf32, #tpu.memory_space<vmem>>, vector<1x1x128xf32>
    %12 = vector.shape_cast %11 : vector<1x1x128xf32> to vector<1x128xf32>
    %13 = vector.shape_cast %10 : vector<1x128xf32> to vector<1x1x128xf32>
    tpu.vector_store %arg4[%c0_11, %c1, %c0_12], %13 {strides = array<i32>} : memref<1x2x128xf32, #tpu.memory_space<vmem>>, vector<1x1x128xf32>,
    return
  }
  func.func @transform_0(%arg0: i32) -> (i32, i32) {
    %c0_i32 = arith.constant 0 : i32
    %c0_i32_0 = arith.constant 0 : i32
    return %arg0, %c0_i32 : i32, i32
  }
  func.func @transform_1(%arg0: i32) -> (i32, i32) {
    %c0_i32 = arith.constant 0 : i32
    %c0_i32_0 = arith.constant 0 : i32
    %c0_i32_1 = arith.constant 0 : i32
    return %c0_i32, %c0_i32_0 : i32, i32
  }
  func.func @transform_2(%arg0: i32) -> (i32, i32) {
    %c0_i32 = arith.constant 0 : i32
    %c0_i32_0 = arith.constant 0 : i32
    return %arg0, %c0_i32 : i32, i32
  }
  func.func @transform_3(%arg0: i32) -> (i32, i32, i32) {
    %c0_i32 = arith.constant 0 : i32
    %c0_i32_0 = arith.constant 0 : i32
    %c0_i32_1 = arith.constant 0 : i32
    return %arg0, %c0_i32, %c0_i32_0 : i32, i32, i32
  }
}

module attributes {stable_mosaic.version = 11 : i64} {
  func.func @_dw_kernel(%arg0: i32, %arg1: i32, %arg2: memref<1x16x16x128xf32, #tpu.memory_space<vmem>>, %arg3: memref<1x128xf32, #tpu.memory_space<vmem>>, %arg4: memref<1x128xf32, #tpu.memory_space<vmem>>, %arg5: memref<9x128xf32, #tpu.memory_space<vmem>>, %arg6: memref<1x16x16x128xf32, #tpu.memory_space<vmem>>, %arg7: memref<1x2x128xf32, #tpu.memory_space<vmem>>, %arg8: memref<18x18x128xf32, #tpu.memory_space<vmem>>) attributes {dimension_semantics = [#tpu.dimension_semantics<parallel>, #tpu.dimension_semantics<parallel>], iteration_bounds = array<i64: 2, 1>, scalar_prefetch = 0 : i64, scratch_operands = 1 : i64, tpu.core_type = #tpu.core_type<tc>, window_params = [{transform_indices = @transform_0, window_bounds = array<i64: 1, 16, 16, 128>}, {transform_indices = @transform_1, window_bounds = array<i64: 1, 128>}, {transform_indices = @transform_2, window_bounds = array<i64: 1, 128>}, {transform_indices = @transform_3, window_bounds = array<i64: 9, 128>}, {transform_indices = @transform_4, window_bounds = array<i64: 1, 16, 16, 128>}, {transform_indices = @transform_5, window_bounds = array<i64: 1, 2, 128>}]} {
    %c0 = arith.constant 0 : index
    %c0_0 = arith.constant 0 : index
    %c0_1 = arith.constant 0 : index
    %c0_2 = arith.constant 0 : index
    %0 = vector.load %arg2[%c0, %c0_0, %c0_1, %c0_2] : memref<1x16x16x128xf32, #tpu.memory_space<vmem>>, vector<1x16x16x128xf32>
    %1 = vector.shape_cast %0 : vector<1x16x16x128xf32> to vector<16x16x128xf32>
    %c0_3 = arith.constant 0 : index
    %c0_4 = arith.constant 0 : index
    %2 = vector.load %arg3[%c0_3, %c0_4] : memref<1x128xf32, #tpu.memory_space<vmem>>, vector<1x128xf32>
    %3 = vector.shape_cast %2 : vector<1x128xf32> to vector<1x1x128xf32>
    %4 = vector.broadcast %3 : vector<1x1x128xf32> to vector<16x16x128xf32>
    %5 = arith.mulf %1, %4 : vector<16x16x128xf32>
    %c0_5 = arith.constant 0 : index
    %c0_6 = arith.constant 0 : index
    %6 = vector.load %arg4[%c0_5, %c0_6] : memref<1x128xf32, #tpu.memory_space<vmem>>, vector<1x128xf32>
    %7 = vector.shape_cast %6 : vector<1x128xf32> to vector<1x1x128xf32>
    %8 = vector.broadcast %7 : vector<1x1x128xf32> to vector<16x16x128xf32>
    %9 = arith.addf %5, %8 : vector<16x16x128xf32>
    %cst = arith.constant 0.000000e+00 : f32
    %cst_7 = arith.constant 6.000000e+00 : f32
    %10 = vector.broadcast %cst : f32 to vector<16x16x128xf32>
    %11 = arith.maximumf %10, %9 : vector<16x16x128xf32>
    %12 = vector.broadcast %cst_7 : f32 to vector<16x16x128xf32>
    %13 = arith.minimumf %12, %11 : vector<16x16x128xf32>
    %cst_8 = arith.constant 0.000000e+00 : f32
    %14 = vector.broadcast %cst_8 : f32 to vector<18x128xf32>
    %c0_9 = arith.constant 0 : index
    %c0_10 = arith.constant 0 : index
    %c0_11 = arith.constant 0 : index
    %15 = vector.load %arg8[%c0_9, %c0_10, %c0_11] : memref<18x18x128xf32, #tpu.memory_space<vmem>>, vector<1x18x128xf32>
    %16 = vector.shape_cast %15 : vector<1x18x128xf32> to vector<18x128xf32>
    %17 = vector.shape_cast %14 : vector<18x128xf32> to vector<1x18x128xf32>
    tpu.vector_store %arg8[%c0_9, %c0_10, %c0_11], %17 {strides = array<i32>} : memref<18x18x128xf32, #tpu.memory_space<vmem>>, vector<1x18x128xf32>,
    %cst_12 = arith.constant 0.000000e+00 : f32
    %18 = vector.broadcast %cst_12 : f32 to vector<18x128xf32>
    %c17 = arith.constant 17 : index
    %c0_13 = arith.constant 0 : index
    %c0_14 = arith.constant 0 : index
    %19 = vector.load %arg8[%c17, %c0_13, %c0_14] : memref<18x18x128xf32, #tpu.memory_space<vmem>>, vector<1x18x128xf32>
    %20 = vector.shape_cast %19 : vector<1x18x128xf32> to vector<18x128xf32>
    %21 = vector.shape_cast %18 : vector<18x128xf32> to vector<1x18x128xf32>
    tpu.vector_store %arg8[%c17, %c0_13, %c0_14], %21 {strides = array<i32>} : memref<18x18x128xf32, #tpu.memory_space<vmem>>, vector<1x18x128xf32>,
    %cst_15 = arith.constant 0.000000e+00 : f32
    %22 = vector.broadcast %cst_15 : f32 to vector<16x1x128xf32>
    %c1 = arith.constant 1 : index
    %c0_16 = arith.constant 0 : index
    %c0_17 = arith.constant 0 : index
    %23 = vector.load %arg8[%c1, %c0_16, %c0_17] : memref<18x18x128xf32, #tpu.memory_space<vmem>>, vector<16x1x128xf32>
    tpu.vector_store %arg8[%c1, %c0_16, %c0_17], %22 {strides = array<i32>} : memref<18x18x128xf32, #tpu.memory_space<vmem>>, vector<16x1x128xf32>,
    %cst_18 = arith.constant 0.000000e+00 : f32
    %24 = vector.broadcast %cst_18 : f32 to vector<16x1x128xf32>
    %c1_19 = arith.constant 1 : index
    %c17_20 = arith.constant 17 : index
    %c0_21 = arith.constant 0 : index
    %25 = vector.load %arg8[%c1_19, %c17_20, %c0_21] : memref<18x18x128xf32, #tpu.memory_space<vmem>>, vector<16x1x128xf32>
    tpu.vector_store %arg8[%c1_19, %c17_20, %c0_21], %24 {strides = array<i32>} : memref<18x18x128xf32, #tpu.memory_space<vmem>>, vector<16x1x128xf32>,
    %c1_22 = arith.constant 1 : index
    %c1_23 = arith.constant 1 : index
    %c0_24 = arith.constant 0 : index
    %26 = vector.load %arg8[%c1_22, %c1_23, %c0_24] : memref<18x18x128xf32, #tpu.memory_space<vmem>>, vector<16x16x128xf32>
    tpu.vector_store %arg8[%c1_22, %c1_23, %c0_24], %13 {strides = array<i32>} : memref<18x18x128xf32, #tpu.memory_space<vmem>>, vector<16x16x128xf32>,
    %c0_25 = arith.constant 0 : index
    %c0_26 = arith.constant 0 : index
    %27 = vector.load %arg5[%c0_25, %c0_26] : memref<9x128xf32, #tpu.memory_space<vmem>>, vector<9x128xf32>
    %28 = vector.extract_strided_slice %27 {offsets = [0, 0], sizes = [1, 128], strides = [1, 1]} : vector<9x128xf32> to vector<1x128xf32>
    %29 = vector.extract_strided_slice %27 {offsets = [1, 0], sizes = [1, 128], strides = [1, 1]} : vector<9x128xf32> to vector<1x128xf32>
    %30 = vector.extract_strided_slice %27 {offsets = [2, 0], sizes = [1, 128], strides = [1, 1]} : vector<9x128xf32> to vector<1x128xf32>
    %31 = vector.extract_strided_slice %27 {offsets = [3, 0], sizes = [1, 128], strides = [1, 1]} : vector<9x128xf32> to vector<1x128xf32>
    %32 = vector.extract_strided_slice %27 {offsets = [4, 0], sizes = [1, 128], strides = [1, 1]} : vector<9x128xf32> to vector<1x128xf32>
    %33 = vector.extract_strided_slice %27 {offsets = [5, 0], sizes = [1, 128], strides = [1, 1]} : vector<9x128xf32> to vector<1x128xf32>
    %34 = vector.extract_strided_slice %27 {offsets = [6, 0], sizes = [1, 128], strides = [1, 1]} : vector<9x128xf32> to vector<1x128xf32>
    %35 = vector.extract_strided_slice %27 {offsets = [7, 0], sizes = [1, 128], strides = [1, 1]} : vector<9x128xf32> to vector<1x128xf32>
    %36 = vector.extract_strided_slice %27 {offsets = [8, 0], sizes = [1, 128], strides = [1, 1]} : vector<9x128xf32> to vector<1x128xf32>
    %cst_27 = arith.constant 0.000000e+00 : f32
    %37 = vector.broadcast %cst_27 : f32 to vector<16x16x128xf32>
    %c0_28 = arith.constant 0 : index
    %c0_29 = arith.constant 0 : index
    %c0_30 = arith.constant 0 : index
    %38 = vector.load %arg8[%c0_28, %c0_29, %c0_30] : memref<18x18x128xf32, #tpu.memory_space<vmem>>, vector<16x16x128xf32>
    %39 = vector.shape_cast %28 : vector<1x128xf32> to vector<1x1x128xf32>
    %40 = vector.broadcast %39 : vector<1x1x128xf32> to vector<16x16x128xf32>
    %41 = arith.mulf %38, %40 : vector<16x16x128xf32>
    %42 = arith.addf %37, %41 : vector<16x16x128xf32>
    %c0_31 = arith.constant 0 : index
    %c1_32 = arith.constant 1 : index
    %c0_33 = arith.constant 0 : index
    %43 = vector.load %arg8[%c0_31, %c1_32, %c0_33] : memref<18x18x128xf32, #tpu.memory_space<vmem>>, vector<16x16x128xf32>
    %44 = vector.shape_cast %29 : vector<1x128xf32> to vector<1x1x128xf32>
    %45 = vector.broadcast %44 : vector<1x1x128xf32> to vector<16x16x128xf32>
    %46 = arith.mulf %43, %45 : vector<16x16x128xf32>
    %47 = arith.addf %42, %46 : vector<16x16x128xf32>
    %c0_34 = arith.constant 0 : index
    %c2 = arith.constant 2 : index
    %c0_35 = arith.constant 0 : index
    %48 = vector.load %arg8[%c0_34, %c2, %c0_35] : memref<18x18x128xf32, #tpu.memory_space<vmem>>, vector<16x16x128xf32>
    %49 = vector.shape_cast %30 : vector<1x128xf32> to vector<1x1x128xf32>
    %50 = vector.broadcast %49 : vector<1x1x128xf32> to vector<16x16x128xf32>
    %51 = arith.mulf %48, %50 : vector<16x16x128xf32>
    %52 = arith.addf %47, %51 : vector<16x16x128xf32>
    %c1_36 = arith.constant 1 : index
    %c0_37 = arith.constant 0 : index
    %c0_38 = arith.constant 0 : index
    %53 = vector.load %arg8[%c1_36, %c0_37, %c0_38] : memref<18x18x128xf32, #tpu.memory_space<vmem>>, vector<16x16x128xf32>
    %54 = vector.shape_cast %31 : vector<1x128xf32> to vector<1x1x128xf32>
    %55 = vector.broadcast %54 : vector<1x1x128xf32> to vector<16x16x128xf32>
    %56 = arith.mulf %53, %55 : vector<16x16x128xf32>
    %57 = arith.addf %52, %56 : vector<16x16x128xf32>
    %c1_39 = arith.constant 1 : index
    %c1_40 = arith.constant 1 : index
    %c0_41 = arith.constant 0 : index
    %58 = vector.load %arg8[%c1_39, %c1_40, %c0_41] : memref<18x18x128xf32, #tpu.memory_space<vmem>>, vector<16x16x128xf32>
    %59 = vector.shape_cast %32 : vector<1x128xf32> to vector<1x1x128xf32>
    %60 = vector.broadcast %59 : vector<1x1x128xf32> to vector<16x16x128xf32>
    %61 = arith.mulf %58, %60 : vector<16x16x128xf32>
    %62 = arith.addf %57, %61 : vector<16x16x128xf32>
    %c1_42 = arith.constant 1 : index
    %c2_43 = arith.constant 2 : index
    %c0_44 = arith.constant 0 : index
    %63 = vector.load %arg8[%c1_42, %c2_43, %c0_44] : memref<18x18x128xf32, #tpu.memory_space<vmem>>, vector<16x16x128xf32>
    %64 = vector.shape_cast %33 : vector<1x128xf32> to vector<1x1x128xf32>
    %65 = vector.broadcast %64 : vector<1x1x128xf32> to vector<16x16x128xf32>
    %66 = arith.mulf %63, %65 : vector<16x16x128xf32>
    %67 = arith.addf %62, %66 : vector<16x16x128xf32>
    %c2_45 = arith.constant 2 : index
    %c0_46 = arith.constant 0 : index
    %c0_47 = arith.constant 0 : index
    %68 = vector.load %arg8[%c2_45, %c0_46, %c0_47] : memref<18x18x128xf32, #tpu.memory_space<vmem>>, vector<16x16x128xf32>
    %69 = vector.shape_cast %34 : vector<1x128xf32> to vector<1x1x128xf32>
    %70 = vector.broadcast %69 : vector<1x1x128xf32> to vector<16x16x128xf32>
    %71 = arith.mulf %68, %70 : vector<16x16x128xf32>
    %72 = arith.addf %67, %71 : vector<16x16x128xf32>
    %c2_48 = arith.constant 2 : index
    %c1_49 = arith.constant 1 : index
    %c0_50 = arith.constant 0 : index
    %73 = vector.load %arg8[%c2_48, %c1_49, %c0_50] : memref<18x18x128xf32, #tpu.memory_space<vmem>>, vector<16x16x128xf32>
    %74 = vector.shape_cast %35 : vector<1x128xf32> to vector<1x1x128xf32>
    %75 = vector.broadcast %74 : vector<1x1x128xf32> to vector<16x16x128xf32>
    %76 = arith.mulf %73, %75 : vector<16x16x128xf32>
    %77 = arith.addf %72, %76 : vector<16x16x128xf32>
    %c2_51 = arith.constant 2 : index
    %c2_52 = arith.constant 2 : index
    %c0_53 = arith.constant 0 : index
    %78 = vector.load %arg8[%c2_51, %c2_52, %c0_53] : memref<18x18x128xf32, #tpu.memory_space<vmem>>, vector<16x16x128xf32>
    %79 = vector.shape_cast %36 : vector<1x128xf32> to vector<1x1x128xf32>
    %80 = vector.broadcast %79 : vector<1x1x128xf32> to vector<16x16x128xf32>
    %81 = arith.mulf %78, %80 : vector<16x16x128xf32>
    %82 = arith.addf %77, %81 : vector<16x16x128xf32>
    %c0_54 = arith.constant 0 : index
    %c0_55 = arith.constant 0 : index
    %c0_56 = arith.constant 0 : index
    %c0_57 = arith.constant 0 : index
    %83 = vector.load %arg6[%c0_54, %c0_55, %c0_56, %c0_57] : memref<1x16x16x128xf32, #tpu.memory_space<vmem>>, vector<1x16x16x128xf32>
    %84 = vector.shape_cast %83 : vector<1x16x16x128xf32> to vector<16x16x128xf32>
    %85 = vector.shape_cast %82 : vector<16x16x128xf32> to vector<1x16x16x128xf32>
    tpu.vector_store %arg6[%c0_54, %c0_55, %c0_56, %c0_57], %85 {strides = array<i32>} : memref<1x16x16x128xf32, #tpu.memory_space<vmem>>, vector<1x16x16x128xf32>,
    %cst_58 = arith.constant dense<0.000000e+00> : vector<16x128xf32>
    %86 = vector.multi_reduction <add>, %82, %cst_58 [0] : vector<16x16x128xf32> to vector<16x128xf32>
    %cst_59 = arith.constant dense<0.000000e+00> : vector<128xf32>
    %87 = vector.multi_reduction <add>, %86, %cst_59 [0] : vector<16x128xf32> to vector<128xf32>
    %88 = vector.shape_cast %87 : vector<128xf32> to vector<1x128xf32>
    %c0_60 = arith.constant 0 : index
    %c0_61 = arith.constant 0 : index
    %c0_62 = arith.constant 0 : index
    %89 = vector.load %arg7[%c0_60, %c0_61, %c0_62] : memref<1x2x128xf32, #tpu.memory_space<vmem>>, vector<1x1x128xf32>
    %90 = vector.shape_cast %89 : vector<1x1x128xf32> to vector<1x128xf32>
    %91 = vector.shape_cast %88 : vector<1x128xf32> to vector<1x1x128xf32>
    tpu.vector_store %arg7[%c0_60, %c0_61, %c0_62], %91 {strides = array<i32>} : memref<1x2x128xf32, #tpu.memory_space<vmem>>, vector<1x1x128xf32>,
    %92 = arith.mulf %82, %82 : vector<16x16x128xf32>
    %cst_63 = arith.constant dense<0.000000e+00> : vector<16x128xf32>
    %93 = vector.multi_reduction <add>, %92, %cst_63 [0] : vector<16x16x128xf32> to vector<16x128xf32>
    %cst_64 = arith.constant dense<0.000000e+00> : vector<128xf32>
    %94 = vector.multi_reduction <add>, %93, %cst_64 [0] : vector<16x128xf32> to vector<128xf32>
    %95 = vector.shape_cast %94 : vector<128xf32> to vector<1x128xf32>
    %c0_65 = arith.constant 0 : index
    %c1_66 = arith.constant 1 : index
    %c0_67 = arith.constant 0 : index
    %96 = vector.load %arg7[%c0_65, %c1_66, %c0_67] : memref<1x2x128xf32, #tpu.memory_space<vmem>>, vector<1x1x128xf32>
    %97 = vector.shape_cast %96 : vector<1x1x128xf32> to vector<1x128xf32>
    %98 = vector.shape_cast %95 : vector<1x128xf32> to vector<1x1x128xf32>
    tpu.vector_store %arg7[%c0_65, %c1_66, %c0_67], %98 {strides = array<i32>} : memref<1x2x128xf32, #tpu.memory_space<vmem>>, vector<1x1x128xf32>,
    return
  }
  func.func @transform_0(%arg0: i32, %arg1: i32) -> (i32, i32, i32, i32) {
    %c0_i32 = arith.constant 0 : i32
    %c0_i32_0 = arith.constant 0 : i32
    %c0_i32_1 = arith.constant 0 : i32
    return %arg0, %c0_i32, %c0_i32_0, %arg1 : i32, i32, i32, i32
  }
  func.func @transform_1(%arg0: i32, %arg1: i32) -> (i32, i32) {
    %c0_i32 = arith.constant 0 : i32
    %c0_i32_0 = arith.constant 0 : i32
    return %c0_i32, %arg1 : i32, i32
  }
  func.func @transform_2(%arg0: i32, %arg1: i32) -> (i32, i32) {
    %c0_i32 = arith.constant 0 : i32
    %c0_i32_0 = arith.constant 0 : i32
    return %c0_i32, %arg1 : i32, i32
  }
  func.func @transform_3(%arg0: i32, %arg1: i32) -> (i32, i32) {
    %c0_i32 = arith.constant 0 : i32
    %c0_i32_0 = arith.constant 0 : i32
    return %c0_i32, %arg1 : i32, i32
  }
  func.func @transform_4(%arg0: i32, %arg1: i32) -> (i32, i32, i32, i32) {
    %c0_i32 = arith.constant 0 : i32
    %c0_i32_0 = arith.constant 0 : i32
    %c0_i32_1 = arith.constant 0 : i32
    return %arg0, %c0_i32, %c0_i32_0, %arg1 : i32, i32, i32, i32
  }
  func.func @transform_5(%arg0: i32, %arg1: i32) -> (i32, i32, i32) {
    %c0_i32 = arith.constant 0 : i32
    %c0_i32_0 = arith.constant 0 : i32
    return %arg0, %c0_i32, %arg1 : i32, i32, i32
  }
}

module attributes {stable_mosaic.version = 11 : i64} {
  func.func @_project_kernel(%arg0: i32, %arg1: memref<512x128xf32, #tpu.memory_space<vmem>>, %arg2: memref<1x128xf32, #tpu.memory_space<vmem>>, %arg3: memref<1x128xf32, #tpu.memory_space<vmem>>, %arg4: memref<128x128xf32, #tpu.memory_space<vmem>>, %arg5: memref<512x128xf32, #tpu.memory_space<vmem>>, %arg6: memref<1x2x128xf32, #tpu.memory_space<vmem>>) attributes {dimension_semantics = [#tpu.dimension_semantics<parallel>], iteration_bounds = array<i64: 1>, scalar_prefetch = 0 : i64, scratch_operands = 0 : i64, tpu.core_type = #tpu.core_type<tc>, window_params = [{transform_indices = @transform_0, window_bounds = array<i64: 512, 128>}, {pipeline_mode = #tpu.pipeline_mode<synchronous>, transform_indices = @transform_1, window_bounds = array<i64: 1, 128>}, {pipeline_mode = #tpu.pipeline_mode<synchronous>, transform_indices = @transform_2, window_bounds = array<i64: 1, 128>}, {pipeline_mode = #tpu.pipeline_mode<synchronous>, transform_indices = @transform_3, window_bounds = array<i64: 128, 128>}, {transform_indices = @transform_4, window_bounds = array<i64: 512, 128>}, {transform_indices = @transform_5, window_bounds = array<i64: 1, 2, 128>}]} {
    %c0 = arith.constant 0 : index
    %c0_0 = arith.constant 0 : index
    %0 = vector.load %arg1[%c0, %c0_0] : memref<512x128xf32, #tpu.memory_space<vmem>>, vector<512x128xf32>
    %c0_1 = arith.constant 0 : index
    %c0_2 = arith.constant 0 : index
    %1 = vector.load %arg2[%c0_1, %c0_2] : memref<1x128xf32, #tpu.memory_space<vmem>>, vector<1x128xf32>
    %2 = vector.broadcast %1 : vector<1x128xf32> to vector<512x128xf32>
    %3 = arith.mulf %0, %2 : vector<512x128xf32>
    %c0_3 = arith.constant 0 : index
    %c0_4 = arith.constant 0 : index
    %4 = vector.load %arg3[%c0_3, %c0_4] : memref<1x128xf32, #tpu.memory_space<vmem>>, vector<1x128xf32>
    %5 = vector.broadcast %4 : vector<1x128xf32> to vector<512x128xf32>
    %6 = arith.addf %3, %5 : vector<512x128xf32>
    %cst = arith.constant 0.000000e+00 : f32
    %cst_5 = arith.constant 6.000000e+00 : f32
    %7 = vector.broadcast %cst : f32 to vector<512x128xf32>
    %8 = arith.maximumf %7, %6 : vector<512x128xf32>
    %9 = vector.broadcast %cst_5 : f32 to vector<512x128xf32>
    %10 = arith.minimumf %9, %8 : vector<512x128xf32>
    %c0_6 = arith.constant 0 : index
    %c0_7 = arith.constant 0 : index
    %11 = vector.load %arg4[%c0_6, %c0_7] : memref<128x128xf32, #tpu.memory_space<vmem>>, vector<128x128xf32>
    %cst_8 = arith.constant dense<0.000000e+00> : vector<512x128xf32>
    %12 = tpu.matmul %10, %11, %cst_8 {dimension_numbers = #tpu.dot_dimension_numbers<[1], [0], [0], [1], [0, 0, 1, 1], [], []>} : vector<512x128xf32>, vector<128x128xf32>, vector<512x128xf32> -> vector<512x128xf32>
    %c0_9 = arith.constant 0 : index
    %c0_10 = arith.constant 0 : index
    %13 = vector.load %arg5[%c0_9, %c0_10] : memref<512x128xf32, #tpu.memory_space<vmem>>, vector<512x128xf32>
    tpu.vector_store %arg5[%c0_9, %c0_10], %12 {strides = array<i32>} : memref<512x128xf32, #tpu.memory_space<vmem>>, vector<512x128xf32>,
    %cst_11 = arith.constant 1.000000e+00 : f32
    %14 = vector.broadcast %cst_11 : f32 to vector<1x512xf32>
    %cst_12 = arith.constant dense<0.000000e+00> : vector<1x128xf32>
    %15 = tpu.matmul %14, %12, %cst_12 {dimension_numbers = #tpu.dot_dimension_numbers<[1], [0], [0], [1], [0, 0, 1, 1], [], []>} : vector<1x512xf32>, vector<512x128xf32>, vector<1x128xf32> -> vector<1x128xf32>
    %c0_13 = arith.constant 0 : index
    %c0_14 = arith.constant 0 : index
    %c0_15 = arith.constant 0 : index
    %16 = vector.load %arg6[%c0_13, %c0_14, %c0_15] : memref<1x2x128xf32, #tpu.memory_space<vmem>>, vector<1x1x128xf32>
    %17 = vector.shape_cast %16 : vector<1x1x128xf32> to vector<1x128xf32>
    %18 = vector.shape_cast %15 : vector<1x128xf32> to vector<1x1x128xf32>
    tpu.vector_store %arg6[%c0_13, %c0_14, %c0_15], %18 {strides = array<i32>} : memref<1x2x128xf32, #tpu.memory_space<vmem>>, vector<1x1x128xf32>,
    %19 = arith.mulf %12, %12 : vector<512x128xf32>
    %cst_16 = arith.constant dense<0.000000e+00> : vector<1x128xf32>
    %20 = tpu.matmul %14, %19, %cst_16 {dimension_numbers = #tpu.dot_dimension_numbers<[1], [0], [0], [1], [0, 0, 1, 1], [], []>} : vector<1x512xf32>, vector<512x128xf32>, vector<1x128xf32> -> vector<1x128xf32>
    %c0_17 = arith.constant 0 : index
    %c1 = arith.constant 1 : index
    %c0_18 = arith.constant 0 : index
    %21 = vector.load %arg6[%c0_17, %c1, %c0_18] : memref<1x2x128xf32, #tpu.memory_space<vmem>>, vector<1x1x128xf32>
    %22 = vector.shape_cast %21 : vector<1x1x128xf32> to vector<1x128xf32>
    %23 = vector.shape_cast %20 : vector<1x128xf32> to vector<1x1x128xf32>
    tpu.vector_store %arg6[%c0_17, %c1, %c0_18], %23 {strides = array<i32>} : memref<1x2x128xf32, #tpu.memory_space<vmem>>, vector<1x1x128xf32>,
    return
  }
  func.func @transform_0(%arg0: i32) -> (i32, i32) {
    %c0_i32 = arith.constant 0 : i32
    %c0_i32_0 = arith.constant 0 : i32
    return %arg0, %c0_i32 : i32, i32
  }
  func.func @transform_1(%arg0: i32) -> (i32, i32) {
    %c0_i32 = arith.constant 0 : i32
    %c0_i32_0 = arith.constant 0 : i32
    %c0_i32_1 = arith.constant 0 : i32
    return %c0_i32, %c0_i32_0 : i32, i32
  }
  func.func @transform_2(%arg0: i32) -> (i32, i32) {
    %c0_i32 = arith.constant 0 : i32
    %c0_i32_0 = arith.constant 0 : i32
    %c0_i32_1 = arith.constant 0 : i32
    return %c0_i32, %c0_i32_0 : i32, i32
  }
  func.func @transform_3(%arg0: i32) -> (i32, i32) {
    %c0_i32 = arith.constant 0 : i32
    %c0_i32_0 = arith.constant 0 : i32
    %c0_i32_1 = arith.constant 0 : i32
    return %c0_i32, %c0_i32_0 : i32, i32
  }
  func.func @transform_4(%arg0: i32) -> (i32, i32) {
    %c0_i32 = arith.constant 0 : i32
    %c0_i32_0 = arith.constant 0 : i32
    return %arg0, %c0_i32 : i32, i32
  }
  func.func @transform_5(%arg0: i32) -> (i32, i32, i32) {
    %c0_i32 = arith.constant 0 : i32
    %c0_i32_0 = arith.constant 0 : i32
    %c0_i32_1 = arith.constant 0 : i32
    return %arg0, %c0_i32, %c0_i32_0 : i32, i32, i32
  }
}

module attributes {stable_mosaic.version = 11 : i64} {
  func.func @_finalize_res_kernel(%arg0: i32, %arg1: memref<512x128xf32, #tpu.memory_space<vmem>>, %arg2: memref<1x128xf32, #tpu.memory_space<vmem>>, %arg3: memref<1x128xf32, #tpu.memory_space<vmem>>, %arg4: memref<512x128xf32, #tpu.memory_space<vmem>>, %arg5: memref<1x128xf32, #tpu.memory_space<vmem>>, %arg6: memref<1x128xf32, #tpu.memory_space<vmem>>, %arg7: memref<512x8xf32, #tpu.memory_space<vmem>>) attributes {dimension_semantics = [#tpu.dimension_semantics<parallel>], iteration_bounds = array<i64: 1>, scalar_prefetch = 0 : i64, scratch_operands = 0 : i64, tpu.core_type = #tpu.core_type<tc>, window_params = [{transform_indices = @transform_0, window_bounds = array<i64: 512, 128>}, {pipeline_mode = #tpu.pipeline_mode<synchronous>, transform_indices = @transform_1, window_bounds = array<i64: 1, 128>}, {pipeline_mode = #tpu.pipeline_mode<synchronous>, transform_indices = @transform_2, window_bounds = array<i64: 1, 128>}, {transform_indices = @transform_3, window_bounds = array<i64: 512, 128>}, {pipeline_mode = #tpu.pipeline_mode<synchronous>, transform_indices = @transform_4, window_bounds = array<i64: 1, 128>}, {pipeline_mode = #tpu.pipeline_mode<synchronous>, transform_indices = @transform_5, window_bounds = array<i64: 1, 128>}, {transform_indices = @transform_6, window_bounds = array<i64: 512, 8>}]} {
    %c0 = arith.constant 0 : index
    %c0_0 = arith.constant 0 : index
    %0 = vector.load %arg1[%c0, %c0_0] : memref<512x128xf32, #tpu.memory_space<vmem>>, vector<512x128xf32>
    %c0_1 = arith.constant 0 : index
    %c0_2 = arith.constant 0 : index
    %1 = vector.load %arg2[%c0_1, %c0_2] : memref<1x128xf32, #tpu.memory_space<vmem>>, vector<1x128xf32>
    %2 = vector.broadcast %1 : vector<1x128xf32> to vector<512x128xf32>
    %3 = arith.mulf %0, %2 : vector<512x128xf32>
    %c0_3 = arith.constant 0 : index
    %c0_4 = arith.constant 0 : index
    %4 = vector.load %arg3[%c0_3, %c0_4] : memref<1x128xf32, #tpu.memory_space<vmem>>, vector<1x128xf32>
    %5 = vector.broadcast %4 : vector<1x128xf32> to vector<512x128xf32>
    %6 = arith.addf %3, %5 : vector<512x128xf32>
    %c0_5 = arith.constant 0 : index
    %c0_6 = arith.constant 0 : index
    %7 = vector.load %arg4[%c0_5, %c0_6] : memref<512x128xf32, #tpu.memory_space<vmem>>, vector<512x128xf32>
    %c0_7 = arith.constant 0 : index
    %c0_8 = arith.constant 0 : index
    %8 = vector.load %arg5[%c0_7, %c0_8] : memref<1x128xf32, #tpu.memory_space<vmem>>, vector<1x128xf32>
    %9 = vector.broadcast %8 : vector<1x128xf32> to vector<512x128xf32>
    %10 = arith.mulf %7, %9 : vector<512x128xf32>
    %11 = arith.addf %6, %10 : vector<512x128xf32>
    %c0_9 = arith.constant 0 : index
    %c0_10 = arith.constant 0 : index
    %12 = vector.load %arg6[%c0_9, %c0_10] : memref<1x128xf32, #tpu.memory_space<vmem>>, vector<1x128xf32>
    %13 = vector.broadcast %12 : vector<1x128xf32> to vector<512x128xf32>
    %14 = arith.addf %11, %13 : vector<512x128xf32>
    %15 = vector.extract_strided_slice %14 {offsets = [0, 0], sizes = [512, 8], strides = [1, 1]} : vector<512x128xf32> to vector<512x8xf32>
    %c0_11 = arith.constant 0 : index
    %c0_12 = arith.constant 0 : index
    %16 = vector.load %arg7[%c0_11, %c0_12] : memref<512x8xf32, #tpu.memory_space<vmem>>, vector<512x8xf32>
    tpu.vector_store %arg7[%c0_11, %c0_12], %15 {strides = array<i32>} : memref<512x8xf32, #tpu.memory_space<vmem>>, vector<512x8xf32>,
    return
  }
  func.func @transform_0(%arg0: i32) -> (i32, i32) {
    %c0_i32 = arith.constant 0 : i32
    %c0_i32_0 = arith.constant 0 : i32
    return %arg0, %c0_i32 : i32, i32
  }
  func.func @transform_1(%arg0: i32) -> (i32, i32) {
    %c0_i32 = arith.constant 0 : i32
    %c0_i32_0 = arith.constant 0 : i32
    %c0_i32_1 = arith.constant 0 : i32
    return %c0_i32, %c0_i32_0 : i32, i32
  }
  func.func @transform_2(%arg0: i32) -> (i32, i32) {
    %c0_i32 = arith.constant 0 : i32
    %c0_i32_0 = arith.constant 0 : i32
    %c0_i32_1 = arith.constant 0 : i32
    return %c0_i32, %c0_i32_0 : i32, i32
  }
  func.func @transform_3(%arg0: i32) -> (i32, i32) {
    %c0_i32 = arith.constant 0 : i32
    %c0_i32_0 = arith.constant 0 : i32
    return %arg0, %c0_i32 : i32, i32
  }
  func.func @transform_4(%arg0: i32) -> (i32, i32) {
    %c0_i32 = arith.constant 0 : i32
    %c0_i32_0 = arith.constant 0 : i32
    %c0_i32_1 = arith.constant 0 : i32
    return %c0_i32, %c0_i32_0 : i32, i32
  }
  func.func @transform_5(%arg0: i32) -> (i32, i32) {
    %c0_i32 = arith.constant 0 : i32
    %c0_i32_0 = arith.constant 0 : i32
    %c0_i32_1 = arith.constant 0 : i32
    return %c0_i32, %c0_i32_0 : i32, i32
  }
  func.func @transform_6(%arg0: i32) -> (i32, i32) {
    %c0_i32 = arith.constant 0 : i32
    %c0_i32_0 = arith.constant 0 : i32
    return %arg0, %c0_i32 : i32, i32
  }
}

</mosaic_0001>

<bundles_post_ra>
// kernel: block_forward.4
= control target key start
LH: loop header
LB: loop body
LE: loop exit
PB: predicated region body
PF: predicated region fallthrough
CT: control target
= control target key end

     0   :  { %vm271_vm0 = vcmask 1043456   ;;  %vm78_vm1 = vcmask 31744   ;;  %s1685_s1 = inlined_call_operand.vmem [shape: f32[4,128], index: 1, kind: input, shape index: {}]   ;;  %s1686_s0 = inlined_call_operand.vmem [shape: f32[512,4], index: 0, kind: input, shape index: {}]   ;;  %s1687_s2 = inlined_call_operand.vmem [shape: f32[512,128], index: 2, kind: output, shape index: {0}]   ;;  %s1688_s3 = inlined_call_operand.vmem [shape: f32[1,2,128], index: 3, kind: output, shape index: {1}]  }
   0x1   :  { %v77_v0 = vld [vmem:[%s1685_s1] sm:$0xf]  ;;  %v50_v3 = vld [vmem:[%s1686_s0 + $0x128] sm:$0xff]  ;;  %v59_v4 = vld [vmem:[%s1686_s0 + $0x170] sm:$0xff] }
   0x2   :  { %v13_v1 = vld [vmem:[%s1686_s0] sm:$0xff]  ;;  %782 = vmatpush.msk.msra.mxu0 %vm271_vm0, %v77_v0  ;;  %847 = vmatpush.msk.msra.mxu1 %vm271_vm0, %v77_v0  ;;  %v14_v5 = vld [vmem:[%s1686_s0 + $0x8] sm:$0xff]  ;;  %v51_v7 = vld [vmem:[%s1686_s0 + $0x130] sm:$0xff] }
   0x3   :  { %v37_v2 = vld [vmem:[%s1686_s0 + $0xc0] sm:$0xff]  ;;  %848 = vmatpush.msk.msra.mxu2 %vm271_vm0, %v77_v0  ;;  %783 = vmatmul.msk.f32.vlgmr.msra.gmra.mxu0 %vm78_vm1, %v13_v1  ;;  %v38_v6 = vld [vmem:[%s1686_s0 + $0xc8] sm:$0xff]  ;;  %v60_v8 = vld [vmem:[%s1686_s0 + $0x178] sm:$0xff] }
   0x4   :  { %807 = vmatmul.msk.f32.vlgmr.msra.gmra.mxu1 %vm78_vm1, %v37_v2  ;;  %820 = vmatmul.msk.f32.vlgmr.msra.gmra.mxu2 %vm78_vm1, %v50_v3  ;;  %v15_v9 = vld [vmem:[%s1686_s0 + $0x10] sm:$0xff]  ;;  %v52_v11 = vld [vmem:[%s1686_s0 + $0x138] sm:$0xff]  ;;  %v61_v12 = vld [vmem:[%s1686_s0 + $0x180] sm:$0xff] }
   0x5   :  { %849 = vmatpush.msk.msra.mxu3 %vm271_vm0, %v77_v0  ;;  %v39_v10 = vld [vmem:[%s1686_s0 + $0xd0] sm:$0xff]  ;;  %v16_v13 = vld [vmem:[%s1686_s0 + $0x18] sm:$0xff]  ;;  %v53_v15 = vld [vmem:[%s1686_s0 + $0x140] sm:$0xff] }
   0x6   :  { %829 = vmatmul.msk.f32.vlgmr.msra.gmra.mxu3 %vm78_vm1, %v59_v4  ;;  %v40_v14 = vld [vmem:[%s1686_s0 + $0xd8] sm:$0xff]  ;;  %v62_v16 = vld [vmem:[%s1686_s0 + $0x188] sm:$0xff]  ;;  %v17_v17 = vld [vmem:[%s1686_s0 + $0x20] sm:$0xff] }
   0x7   :  { %v41_v18 = vld [vmem:[%s1686_s0 + $0xe0] sm:$0xff]  ;;  %v54_v19 = vld [vmem:[%s1686_s0 + $0x148] sm:$0xff]  ;;  %v63_v20 = vld [vmem:[%s1686_s0 + $0x190] sm:$0xff] }
   0x8   :  { %v18_v21 = vld [vmem:[%s1686_s0 + $0x28] sm:$0xff]  ;;  %v55_v23 = vld [vmem:[%s1686_s0 + $0x150] sm:$0xff]  ;;  %v64_v24 = vld [vmem:[%s1686_s0 + $0x198] sm:$0xff] }
   0x9   :  { %v42_v22 = vld [vmem:[%s1686_s0 + $0xe8] sm:$0xff]  ;;  %v19_v25 = vld [vmem:[%s1686_s0 + $0x30] sm:$0xff]  ;;  %v56_v27 = vld [vmem:[%s1686_s0 + $0x158] sm:$0xff] }
   0xa   :  { %v43_v26 = vld [vmem:[%s1686_s0 + $0xf0] sm:$0xff]  ;;  %v65_v28 = vld [vmem:[%s1686_s0 + $0x1a0] sm:$0xff]  ;;  %v20_v29 = vld [vmem:[%s1686_s0 + $0x38] sm:$0xff] }
   0xb   :  { %784 = vmatmul.msk.f32.gmra.mxu0 %vm78_vm1, %v14_v5  ;;  %v44_v30 = vld [vmem:[%s1686_s0 + $0xf8] sm:$0xff]  ;;  %v57_v31 = vld [vmem:[%s1686_s0 + $0x160] sm:$0xff]  ;;  %v66_v32 = vld [vmem:[%s1686_s0 + $0x1a8] sm:$0xff] }
   0xc   :  { %808 = vmatmul.msk.f32.gmra.mxu1 %vm78_vm1, %v38_v6  ;;  %821 = vmatmul.msk.f32.gmra.mxu2 %vm78_vm1, %v51_v7  ;;  %v21_v33 = vld [vmem:[%s1686_s0 + $0x40] sm:$0xff]  ;;  %v58_v35 = vld [vmem:[%s1686_s0 + $0x168] sm:$0xff]  ;;  %v67_v36 = vld [vmem:[%s1686_s0 + $0x1b0] sm:$0xff] }
   0xd   :  { %v45_v34 = vld [vmem:[%s1686_s0 + $0x100] sm:$0xff]  ;;  %v22_v37 = vld [vmem:[%s1686_s0 + $0x48] sm:$0xff]  ;;  %v68_v39 = vld [vmem:[%s1686_s0 + $0x1b8] sm:$0xff] }
   0xe   :  { %830 = vmatmul.msk.f32.gmra.mxu3 %vm78_vm1, %v60_v8  ;;  %v46_v38 = vld [vmem:[%s1686_s0 + $0x108] sm:$0xff]  ;;  %v23_v40 = vld [vmem:[%s1686_s0 + $0x50] sm:$0xff]  ;;  %v69_v42 = vld [vmem:[%s1686_s0 + $0x1c0] sm:$0xff] }
   0xf   :  { %v47_v41 = vld [vmem:[%s1686_s0 + $0x110] sm:$0xff]  ;;  %v24_v43 = vld [vmem:[%s1686_s0 + $0x58] sm:$0xff]  ;;  %v70_v45 = vld [vmem:[%s1686_s0 + $0x1c8] sm:$0xff] }
  0x10   :  { %v48_v44 = vld [vmem:[%s1686_s0 + $0x118] sm:$0xff]  ;;  %v25_v46 = vld [vmem:[%s1686_s0 + $0x60] sm:$0xff]  ;;  %v71_v48 = vld [vmem:[%s1686_s0 + $0x1d0] sm:$0xff] }
  0x11   :  { %v49_v47 = vld [vmem:[%s1686_s0 + $0x120] sm:$0xff]  ;;  %v26_v49 = vld [vmem:[%s1686_s0 + $0x68] sm:$0xff]  ;;  %v72_v50 = vld [vmem:[%s1686_s0 + $0x1d8] sm:$0xff] }
  0x12   :  { %v27_v51 = vld [vmem:[%s1686_s0 + $0x70] sm:$0xff]  ;;  %v73_v52 = vld [vmem:[%s1686_s0 + $0x1e0] sm:$0xff]  ;;  %v28_v53 = vld [vmem:[%s1686_s0 + $0x78] sm:$0xff] }
  0x13   :  { %785 = vmatmul.msk.f32.gmra.mxu0 %vm78_vm1, %v15_v9  ;;  %v74_v54 = vld [vmem:[%s1686_s0 + $0x1e8] sm:$0xff]  ;;  %v29_v56 = vld [vmem:[%s1686_s0 + $0x80] sm:$0xff]  ;;  %v75_v58 = vld [vmem:[%s1686_s0 + $0x1f0] sm:$0xff] }
  0x14   :  { %809 = vmatmul.msk.f32.gmra.mxu1 %vm78_vm1, %v39_v10  ;;  %822 = vmatmul.msk.f32.gmra.mxu2 %vm78_vm1, %v52_v11  ;;  %v30_v61 = vld [vmem:[%s1686_s0 + $0x88] sm:$0xff]  ;;  %v76_v0 = vld [vmem:[%s1686_s0 + $0x1f8] sm:$0xff]  ;;  %v31_v3 = vld [vmem:[%s1686_s0 + $0x90] sm:$0xff] }
  0x15   :  { %v32_v8 = vld [vmem:[%s1686_s0 + $0x98] sm:$0xff] }
  0x16   :  { %831 = vmatmul.msk.f32.gmra.mxu3 %vm78_vm1, %v61_v12 }
  0x1b   :  { %786 = vmatmul.msk.f32.gmra.mxu0 %vm78_vm1, %v16_v13  ;;  %v33_v13 = vld [vmem:[%s1686_s0 + $0xa0] sm:$0xff] }
  0x1c   :  { %810 = vmatmul.msk.f32.gmra.mxu1 %vm78_vm1, %v40_v14  ;;  %823 = vmatmul.msk.f32.gmra.mxu2 %vm78_vm1, %v53_v15 }
  0x1e   :  { %832 = vmatmul.msk.f32.gmra.mxu3 %vm78_vm1, %v62_v16 }
  0x23   :  { %787 = vmatmul.msk.f32.gmra.mxu0 %vm78_vm1, %v17_v17 }
  0x24   :  { %811 = vmatmul.msk.f32.gmra.mxu1 %vm78_vm1, %v41_v18  ;;  %824 = vmatmul.msk.f32.gmra.mxu2 %vm78_vm1, %v54_v19  ;;  %v34_v18 = vld [vmem:[%s1686_s0 + $0xa8] sm:$0xff] }
  0x26   :  { %833 = vmatmul.msk.f32.gmra.mxu3 %vm78_vm1, %v63_v20 }
  0x2b   :  { %788 = vmatmul.msk.f32.gmra.mxu0 %vm78_vm1, %v18_v21 }
  0x2c   :  { %812 = vmatmul.msk.f32.gmra.mxu1 %vm78_vm1, %v42_v22  ;;  %825 = vmatmul.msk.f32.gmra.mxu2 %vm78_vm1, %v55_v23  ;;  %v35_v23 = vld [vmem:[%s1686_s0 + $0xb0] sm:$0xff] }
  0x2e   :  { %834 = vmatmul.msk.f32.gmra.mxu3 %vm78_vm1, %v64_v24 }
  0x33   :  { %789 = vmatmul.msk.f32.gmra.mxu0 %vm78_vm1, %v19_v25 }
  0x34   :  { %813 = vmatmul.msk.f32.gmra.mxu1 %vm78_vm1, %v43_v26  ;;  %826 = vmatmul.msk.f32.gmra.mxu2 %vm78_vm1, %v56_v27 }
  0x36   :  { %835 = vmatmul.msk.f32.gmra.mxu3 %vm78_vm1, %v65_v28  ;;  %v36_v28 = vld [vmem:[%s1686_s0 + $0xb8] sm:$0xff] }
  0x3b   :  { %790 = vmatmul.msk.f32.gmra.mxu0 %vm78_vm1, %v20_v29 }
  0x3c   :  { %814 = vmatmul.msk.f32.gmra.mxu1 %vm78_vm1, %v44_v30  ;;  %827 = vmatmul.msk.f32.gmra.mxu2 %vm78_vm1, %v57_v31 }
  0x3e   :  { %836 = vmatmul.msk.f32.gmra.mxu3 %vm78_vm1, %v66_v32 }
  0x43   :  { %791 = vmatmul.msk.f32.gmra.mxu0 %vm78_vm1, %v21_v33 }
  0x44   :  { %815 = vmatmul.msk.f32.gmra.mxu1 %vm78_vm1, %v45_v34  ;;  %828 = vmatmul.msk.f32.gmra.mxu2 %vm78_vm1, %v58_v35 }
  0x46   :  { %837 = vmatmul.msk.f32.gmra.mxu3 %vm78_vm1, %v67_v36 }
  0x4b   :  { %792 = vmatmul.msk.f32.gmra.mxu0 %vm78_vm1, %v22_v37 }
  0x4c   :  { %816 = vmatmul.msk.f32.gmra.mxu1 %vm78_vm1, %v46_v38 }
  0x4e   :  { %838 = vmatmul.msk.f32.gmra.mxu3 %vm78_vm1, %v68_v39 }
  0x53   :  { %793 = vmatmul.msk.f32.gmra.mxu0 %vm78_vm1, %v23_v40 }
  0x54   :  { %817 = vmatmul.msk.f32.gmra.mxu1 %vm78_vm1, %v47_v41 }
  0x56   :  { %839 = vmatmul.msk.f32.gmra.mxu3 %vm78_vm1, %v69_v42 }
  0x5b   :  { %794 = vmatmul.msk.f32.gmra.mxu0 %vm78_vm1, %v24_v43 }
  0x5c   :  { %818 = vmatmul.msk.f32.gmra.mxu1 %vm78_vm1, %v48_v44 }
  0x5e   :  { %840 = vmatmul.msk.f32.gmra.mxu3 %vm78_vm1, %v70_v45 }
  0x63   :  { %795 = vmatmul.msk.f32.gmra.mxu0 %vm78_vm1, %v25_v46 }
  0x64   :  { %819 = vmatmul.msk.f32.gmra.mxu1 %vm78_vm1, %v49_v47 }
  0x66   :  { %841 = vmatmul.msk.f32.gmra.mxu3 %vm78_vm1, %v71_v48 }
  0x6b   :  { %796 = vmatmul.msk.f32.gmra.mxu0 %vm78_vm1, %v26_v49 }
  0x6e   :  { %842 = vmatmul.msk.f32.gmra.mxu3 %vm78_vm1, %v72_v50 }
  0x73   :  { %797 = vmatmul.msk.f32.gmra.mxu0 %vm78_vm1, %v27_v51 }
  0x76   :  { %843 = vmatmul.msk.f32.gmra.mxu3 %vm78_vm1, %v73_v52 }
  0x7b   :  { %798 = vmatmul.msk.f32.gmra.mxu0 %vm78_vm1, %v28_v53 }
  0x7e   :  { %844 = vmatmul.msk.f32.gmra.mxu3 %vm78_vm1, %v74_v54 }
  0x80   :  { %v1091_v55 = vpop.f32.mrf.mxu0 }
  0x81   :  { %484 = vst [vmem:[%s1687_s2] sm:$0xff] %v1091_v55  ;;  %v1100_v57 = vpop.f32.mrf.mxu1 }
  0x82   :  { %508 = vst [vmem:[%s1687_s2 + $0xc0] sm:$0xff] %v1100_v57 }
  0x83   :  { %799 = vmatmul.msk.f32.gmra.mxu0 %vm78_vm1, %v29_v56 }
  0x86   :  { %845 = vmatmul.msk.f32.gmra.mxu3 %vm78_vm1, %v75_v58 }
  0x87   :  { %v1111_v59 = vpop.f32.mrf.mxu2 }
  0x88   :  { %521 = vst [vmem:[%s1687_s2 + $0x128] sm:$0xff] %v1111_v59  ;;  %v1117_v60 = vpop.f32.mrf.mxu0 }
  0x89   :  { %485 = vst [vmem:[%s1687_s2 + $0x8] sm:$0xff] %v1117_v60  ;;  %v1126_v62 = vpop.f32.mrf.mxu1  ;;  %v1128_v63 = vpop.f32.mrf.mxu3 }
  0x8a   :  { %509 = vst [vmem:[%s1687_s2 + $0xc8] sm:$0xff] %v1126_v62 }
  0x8b   :  { %800 = vmatmul.msk.f32.gmra.mxu0 %vm78_vm1, %v30_v61  ;;  %530 = vst [vmem:[%s1687_s2 + $0x170] sm:$0xff] %v1128_v63 }
  0x8e   :  { %846 = vmatmul.msk.f32.gmra.mxu3 %vm78_vm1, %v76_v0  ;;  %v654_v0 = vmul.f32 %v1126_v62, %v1126_v62 }
  0x8f   :  { %v1143_v1 = vpop.f32.mrf.mxu2 }
  0x90   :  { %522 = vst [vmem:[%s1687_s2 + $0x130] sm:$0xff] %v1143_v1  ;;  %v1149_v2 = vpop.f32.mrf.mxu0 }
  0x91   :  { %486 = vst [vmem:[%s1687_s2 + $0x10] sm:$0xff] %v1149_v2  ;;  %v1158_v4 = vpop.f32.mrf.mxu1  ;;  %v1160_v5 = vpop.f32.mrf.mxu3 }
  0x92   :  { %510 = vst [vmem:[%s1687_s2 + $0xd0] sm:$0xff] %v1158_v4  ;;  %588 = vmatpush.msrb.mxu3 %v1160_v5  ;;  %v655_v58 = vmul.f32 %v1158_v4, %v1158_v4 }
  0x93   :  { %801 = vmatmul.msk.f32.gmra.mxu0 %vm78_vm1, %v31_v3  ;;  %531 = vst [vmem:[%s1687_s2 + $0x178] sm:$0xff] %v1160_v5  ;;  %v653_v3 = vmul.f32 %v1100_v57, %v1100_v57 }
  0x94   :  { %589 = vmatpush.msrb.mxu3 %v1128_v63 }
  0x97   :  { %v1173_v6 = vpop.f32.mrf.mxu2 }
  0x98   :  { %523 = vst [vmem:[%s1687_s2 + $0x138] sm:$0xff] %v1173_v6  ;;  %v1179_v7 = vpop.f32.mrf.mxu0 }
  0x99   :  { %487 = vst [vmem:[%s1687_s2 + $0x18] sm:$0xff] %v1179_v7  ;;  %v1188_v9 = vpop.f32.mrf.mxu1  ;;  %v1190_v10 = vpop.f32.mrf.mxu3 }
  0x9a   :  { %511 = vst [vmem:[%s1687_s2 + $0xd8] sm:$0xff] %v1188_v9  ;;  %v656_v54 = vmul.f32 %v1188_v9, %v1188_v9 }
  0x9b   :  { %802 = vmatmul.msk.f32.gmra.mxu0 %vm78_vm1, %v32_v8  ;;  %532 = vst [vmem:[%s1687_s2 + $0x180] sm:$0xff] %v1190_v10 }
  0x9f   :  { %v1201_v11 = vpop.f32.mrf.mxu2 }
  0xa0   :  { %524 = vst [vmem:[%s1687_s2 + $0x140] sm:$0xff] %v1201_v11  ;;  %v1207_v12 = vpop.f32.mrf.mxu0 }
  0xa1   :  { %488 = vst [vmem:[%s1687_s2 + $0x20] sm:$0xff] %v1207_v12  ;;  %v1216_v14 = vpop.f32.mrf.mxu1  ;;  %v1218_v15 = vpop.f32.mrf.mxu3 }
  0xa2   :  { %512 = vst [vmem:[%s1687_s2 + $0xe0] sm:$0xff] %v1216_v14  ;;  %v657_v53 = vmul.f32 %v1216_v14, %v1216_v14 }
  0xa3   :  { %803 = vmatmul.msk.f32.gmra.mxu0 %vm78_vm1, %v33_v13  ;;  %533 = vst [vmem:[%s1687_s2 + $0x188] sm:$0xff] %v1218_v15 }
  0xa7   :  { %v1229_v16 = vpop.f32.mrf.mxu2 }
  0xa8   :  { %525 = vst [vmem:[%s1687_s2 + $0x148] sm:$0xff] %v1229_v16  ;;  %v1235_v17 = vpop.f32.mrf.mxu0 }
  0xa9   :  { %489 = vst [vmem:[%s1687_s2 + $0x28] sm:$0xff] %v1235_v17  ;;  %v1244_v19 = vpop.f32.mrf.mxu1  ;;  %v1246_v20 = vpop.f32.mrf.mxu3 }
  0xaa   :  { %513 = vst [vmem:[%s1687_s2 + $0xe8] sm:$0xff] %v1244_v19  ;;  %v658_v52 = vmul.f32 %v1244_v19, %v1244_v19 }
  0xab   :  { %804 = vmatmul.msk.f32.gmra.mxu0 %vm78_vm1, %v34_v18  ;;  %534 = vst [vmem:[%s1687_s2 + $0x190] sm:$0xff] %v1246_v20 }
  0xaf   :  { %v1257_v21 = vpop.f32.mrf.mxu2 }
  0xb0   :  { %526 = vst [vmem:[%s1687_s2 + $0x150] sm:$0xff] %v1257_v21  ;;  %v1263_v22 = vpop.f32.mrf.mxu0 }
  0xb1   :  { %490 = vst [vmem:[%s1687_s2 + $0x30] sm:$0xff] %v1263_v22  ;;  %v1272_v24 = vpop.f32.mrf.mxu1  ;;  %v1274_v25 = vpop.f32.mrf.mxu3 }
  0xb2   :  { %514 = vst [vmem:[%s1687_s2 + $0xf0] sm:$0xff] %v1272_v24  ;;  %v659_v50 = vmul.f32 %v1272_v24, %v1272_v24 }
  0xb3   :  { %805 = vmatmul.msk.f32.gmra.mxu0 %vm78_vm1, %v35_v23  ;;  %535 = vst [vmem:[%s1687_s2 + $0x198] sm:$0xff] %v1274_v25 }
  0xb7   :  { %v1285_v26 = vpop.f32.mrf.mxu2 }
  0xb8   :  { %527 = vst [vmem:[%s1687_s2 + $0x158] sm:$0xff] %v1285_v26  ;;  %v1291_v27 = vpop.f32.mrf.mxu0 }
  0xb9   :  { %491 = vst [vmem:[%s1687_s2 + $0x38] sm:$0xff] %v1291_v27  ;;  %v385_v29 = vpop.f32.mrf.mxu1  ;;  %v1300_v30 = vpop.f32.mrf.mxu3 }
  0xba   :  { %515 = vst [vmem:[%s1687_s2 + $0xf8] sm:$0xff] %v385_v29  ;;  %568 = vmatpush.msrb.mxu2 %v385_v29  ;;  %v660_v48 = vmul.f32 %v385_v29, %v385_v29 }
  0xbb   :  { %806 = vmatmul.msk.f32.gmra.mxu0 %vm78_vm1, %v36_v28  ;;  %536 = vst [vmem:[%s1687_s2 + $0x1a0] sm:$0xff] %v1300_v30 }
  0xbc   :  { %569 = vmatpush.msrb.mxu2 %v1272_v24 }
  0xbe   :  { %570 = vmatpush.msrb.mxu2 %v1244_v19  ;;  %v851_v19 = vmov 1.0  }
  0xbf   :  { %v1312_v31 = vpop.f32.mrf.mxu2 }
  0xc0   :  { %528 = vst [vmem:[%s1687_s2 + $0x160] sm:$0xff] %v1312_v31  ;;  %v1318_v32 = vpop.f32.mrf.mxu0  ;;  %571 = vmatpush.msrb.mxu2 %v1216_v14 }
  0xc1   :  { %492 = vst [vmem:[%s1687_s2 + $0x40] sm:$0xff] %v1318_v32  ;;  %v1325_v33 = vpop.f32.mrf.mxu1  ;;  %v1327_v34 = vpop.f32.mrf.mxu3 }
  0xc2   :  { %516 = vst [vmem:[%s1687_s2 + $0x100] sm:$0xff] %v1325_v33  ;;  %572 = vmatpush.msrb.mxu2 %v1188_v9 }
  0xc3   :  { %537 = vst [vmem:[%s1687_s2 + $0x1a8] sm:$0xff] %v1327_v34 }
  0xc4   :  { %573 = vmatpush.msrb.mxu2 %v1158_v4 }
  0xc6   :  { %574 = vmatpush.msrb.mxu2 %v1126_v62 }
  0xc7   :  { %v1340_v35 = vpop.f32.mrf.mxu2 }
  0xc8   :  { %529 = vst [vmem:[%s1687_s2 + $0x168] sm:$0xff] %v1340_v35  ;;  %590 = vmatpush.msrb.mxu3 %v1340_v35  ;;  %v1347_v36 = vpop.f32.mrf.mxu0  ;;  %575 = vmatpush.msrb.mxu2 %v1100_v57 }
  0xc9   :  { %493 = vst [vmem:[%s1687_s2 + $0x48] sm:$0xff] %v1347_v36  ;;  %v1354_v37 = vpop.f32.mrf.mxu1  ;;  %v1356_v38 = vpop.f32.mrf.mxu3 }
  0xca   :  { %517 = vst [vmem:[%s1687_s2 + $0x108] sm:$0xff] %v1354_v37  ;;  %591 = vmatpush.msrb.mxu3 %v1312_v31 }
  0xcb   :  { %538 = vst [vmem:[%s1687_s2 + $0x1b0] sm:$0xff] %v1356_v38 }
  0xcc   :  { %592 = vmatpush.msrb.mxu3 %v1285_v26 }
  0xce   :  { %593 = vmatpush.msrb.mxu3 %v1257_v21 }
  0xd0   :  { %594 = vmatpush.msrb.mxu3 %v1229_v16  ;;  %v1370_v39 = vpop.f32.mrf.mxu0 }
  0xd1   :  { %494 = vst [vmem:[%s1687_s2 + $0x50] sm:$0xff] %v1370_v39  ;;  %v1376_v40 = vpop.f32.mrf.mxu1  ;;  %v1378_v41 = vpop.f32.mrf.mxu3 }
  0xd2   :  { %518 = vst [vmem:[%s1687_s2 + $0x110] sm:$0xff] %v1376_v40  ;;  %595 = vmatpush.msrb.mxu3 %v1201_v11 }
  0xd3   :  { %539 = vst [vmem:[%s1687_s2 + $0x1b8] sm:$0xff] %v1378_v41 }
  0xd4   :  { %596 = vmatpush.msrb.mxu3 %v1173_v6 }
  0xd6   :  { %597 = vmatpush.msrb.mxu3 %v1143_v1 }
  0xd8   :  { %598 = vmatpush.msrb.mxu3 %v1111_v59  ;;  %v1392_v42 = vpop.f32.mrf.mxu0 }
  0xd9   :  { %495 = vst [vmem:[%s1687_s2 + $0x58] sm:$0xff] %v1392_v42  ;;  %v1398_v43 = vpop.f32.mrf.mxu1  ;;  %v1400_v44 = vpop.f32.mrf.mxu3 }
  0xda   :  { %519 = vst [vmem:[%s1687_s2 + $0x118] sm:$0xff] %v1398_v43 }
  0xdb   :  { %540 = vst [vmem:[%s1687_s2 + $0x1c0] sm:$0xff] %v1400_v44 }
  0xe0   :  { %v1410_v45 = vpop.f32.mrf.mxu0 }
  0xe1   :  { %496 = vst [vmem:[%s1687_s2 + $0x60] sm:$0xff] %v1410_v45  ;;  %v1416_v46 = vpop.f32.mrf.mxu1  ;;  %v1418_v47 = vpop.f32.mrf.mxu3 }
  0xe2   :  { %520 = vst [vmem:[%s1687_s2 + $0x120] sm:$0xff] %v1416_v46  ;;  %599 = vmatpush.msrb.mxu3 %v1416_v46 }
  0xe3   :  { %541 = vst [vmem:[%s1687_s2 + $0x1c8] sm:$0xff] %v1418_v47 }
  0xe4   :  { %600 = vmatpush.msrb.mxu3 %v1398_v43 }
  0xe6   :  { %601 = vmatpush.msrb.mxu3 %v1376_v40 }
  0xe8   :  { %602 = vmatpush.msrb.mxu3 %v1354_v37  ;;  %v1432_v49 = vpop.f32.mrf.mxu0 }
  0xe9   :  { %497 = vst [vmem:[%s1687_s2 + $0x68] sm:$0xff] %v1432_v49  ;;  %v1440_v51 = vpop.f32.mrf.mxu3 }
  0xea   :  { %603 = vmatpush.msrb.mxu3 %v1325_v33  ;;  %542 = vst [vmem:[%s1687_s2 + $0x1d0] sm:$0xff] %v1440_v51 }
  0xeb   :  { %604 = vmatmul.f32.vlgmr.msrb.gmra.mxu3 %v851_v19 }
  0xec   :  { %713 = vmatpush.msra.mxu3 %v660_v48  ;;  %v676_v48 = vmul.f32 %v1160_v5, %v1160_v5  ;;  %v673_v5 = vmul.f32 %v1312_v31, %v1312_v31  ;;  %v670_v31 = vmul.f32 %v1229_v16, %v1229_v16  ;;  %v668_v16 = vmul.f32 %v1173_v6, %v1173_v6 }
  0xed   :  { %v666_v6 = vmul.f32 %v1111_v59, %v1111_v59  ;;  %v640_v59 = vmul.f32 %v1392_v42, %v1392_v42 }
  0xee   :  { %714 = vmatpush.msra.mxu3 %v659_v50  ;;  %v675_v50 = vmul.f32 %v1128_v63, %v1128_v63 }
  0xf0   :  { %715 = vmatpush.msra.mxu3 %v658_v52  ;;  %v1453_v56 = vpop.f32.mrf.mxu0  ;;  %v674_v52 = vmul.f32 %v1340_v35, %v1340_v35  ;;  %v672_v35 = vmul.f32 %v1285_v26, %v1285_v26  ;;  %v669_v26 = vmul.f32 %v1201_v11, %v1201_v11  ;;  %v667_v11 = vmul.f32 %v1143_v1, %v1143_v1 }
  0xf1   :  { %498 = vst [vmem:[%s1687_s2 + $0x70] sm:$0xff] %v1453_v56  ;;  %v1461_v61 = vpop.f32.mrf.mxu3  ;;  %v664_v1 = vmul.f32 %v1398_v43, %v1398_v43  ;;  %v638_v43 = vmul.f32 %v1347_v36, %v1347_v36 }
  0xf2   :  { %716 = vmatpush.msra.mxu3 %v657_v53  ;;  %543 = vst [vmem:[%s1687_s2 + $0x1d8] sm:$0xff] %v1461_v61 }
  0xf4   :  { %717 = vmatpush.msra.mxu3 %v656_v54 }
  0xf6   :  { %718 = vmatpush.msra.mxu3 %v655_v58 }
  0xf8   :  { %719 = vmatpush.msra.mxu3 %v654_v0  ;;  %v1471_v4 = vpop.f32.mrf.mxu0 }
  0xf9   :  { %499 = vst [vmem:[%s1687_s2 + $0x78] sm:$0xff] %v1471_v4  ;;  %548 = vmatpush.msrb.mxu1 %v1471_v4  ;;  %v1478_v8 = vpop.f32.mrf.mxu3 }
  0xfa   :  { %720 = vmatpush.msra.mxu3 %v653_v3  ;;  %544 = vst [vmem:[%s1687_s2 + $0x1e0] sm:$0xff] %v1478_v8  ;;  %v671_v3 = vmul.f32 %v1257_v21, %v1257_v21 }
  0xfb   :  { %549 = vmatpush.msrb.mxu1 %v1453_v56 }
  0xfd   :  { %550 = vmatpush.msrb.mxu1 %v1432_v49 }
  0xff   :  { %551 = vmatpush.msrb.mxu1 %v1410_v45 }
 0x100   :  { %v1487_v57 = vpop.f32.mrf.mxu0 }
 0x101   :  { %500 = vst [vmem:[%s1687_s2 + $0x80] sm:$0xff] %v1487_v57  ;;  %552 = vmatpush.msrb.mxu1 %v1392_v42  ;;  %v1494_v62 = vpop.f32.mrf.mxu3  ;;  %v637_v42 = vmul.f32 %v1318_v32, %v1318_v32 }
 0x102   :  { %545 = vst [vmem:[%s1687_s2 + $0x1e8] sm:$0xff] %v1494_v62 }
 0x103   :  { %553 = vmatpush.msrb.mxu1 %v1370_v39 }
 0x105   :  { %554 = vmatpush.msrb.mxu1 %v1347_v36  ;;  %v635_v36 = vmul.f32 %v1263_v22, %v1263_v22 }
 0x107   :  { %555 = vmatpush.msrb.mxu1 %v1318_v32  ;;  %v633_v32 = vmul.f32 %v1207_v12, %v1207_v12 }
 0x108   :  { %v1503_v9 = vpop.f32.mrf.mxu0 }
 0x109   :  { %501 = vst [vmem:[%s1687_s2 + $0x88] sm:$0xff] %v1503_v9  ;;  %556 = vmatpush.msrb.mxu1 %v1291_v27  ;;  %v1510_v13 = vpop.f32.mrf.mxu3  ;;  %v646_v21 = vmul.f32 %v1503_v9, %v1503_v9 }
 0x10a   :  { %546 = vst [vmem:[%s1687_s2 + $0x1f0] sm:$0xff] %v1510_v13 }
 0x10b   :  { %557 = vmatpush.msrb.mxu1 %v1263_v22  ;;  %v630_v22 = vmul.f32 %v1117_v60, %v1117_v60 }
 0x10d   :  { %558 = vmatpush.msrb.mxu1 %v1235_v17 }
 0x10f   :  { %559 = vmatpush.msrb.mxu1 %v1207_v12 }
 0x110   :  { %v1519_v14 = vpop.f32.mrf.mxu0 }
 0x111   :  { %502 = vst [vmem:[%s1687_s2 + $0x90] sm:$0xff] %v1519_v14  ;;  %560 = vmatpush.msrb.mxu1 %v1179_v7  ;;  %v1526_v18 = vpop.f32.mrf.mxu3 }
 0x112   :  { %547 = vst [vmem:[%s1687_s2 + $0x1f8] sm:$0xff] %v1526_v18  ;;  %v692_v12 = vmul.f32 %v1526_v18, %v1526_v18 }
 0x113   :  { %561 = vmatpush.msrb.mxu1 %v1149_v2 }
 0x115   :  { %562 = vmatpush.msrb.mxu1 %v1117_v60  ;;  %v689_v60 = vmul.f32 %v1478_v8, %v1478_v8 }
 0x117   :  { %563 = vmatpush.msrb.mxu1 %v1091_v55 }
 0x118   :  { %v349_v23 = vpop.f32.mrf.mxu0  ;;  %564 = vmatmul.f32.vlgmr.msrb.gmra.mxu1 %v851_v19 }
 0x119   :  { %608 = vmatpush.msra.mxu1 %v1526_v18  ;;  %503 = vst [vmem:[%s1687_s2 + $0x98] sm:$0xff] %v349_v23 }
 0x11b   :  { %609 = vmatpush.msra.mxu1 %v1510_v13 }
 0x11d   :  { %610 = vmatpush.msra.mxu1 %v1494_v62 }
 0x11f   :  { %611 = vmatpush.msra.mxu1 %v1478_v8  ;;  %v684_v8 = vmul.f32 %v1378_v41, %v1378_v41 }
 0x120   :  { %v352_v24 = vpop.f32.mrf.mxu0 }
 0x121   :  { %612 = vmatpush.msra.mxu1 %v1461_v61  ;;  %504 = vst [vmem:[%s1687_s2 + $0xa0] sm:$0xff] %v352_v24  ;;  %v649_v0 = vmul.f32 %v352_v24, %v352_v24 }
 0x123   :  { %613 = vmatpush.msra.mxu1 %v1440_v51 }
 0x125   :  { %614 = vmatpush.msra.mxu1 %v1418_v47 }
 0x127   :  { %615 = vmatpush.msra.mxu1 %v1400_v44 }
 0x128   :  { %v355_v28 = vpop.f32.mrf.mxu0 }
 0x129   :  { %616 = vmatpush.msra.mxu1 %v1378_v41  ;;  %505 = vst [vmem:[%s1687_s2 + $0xa8] sm:$0xff] %v355_v28  ;;  %v650_v63 = vmul.f32 %v355_v28, %v355_v28  ;;  %v679_v41 = vmul.f32 %v1246_v20, %v1246_v20 }
 0x12b   :  { %617 = vmatpush.msra.mxu1 %v1356_v38 }
 0x12d   :  { %618 = vmatpush.msra.mxu1 %v1327_v34 }
 0x12f   :  { %619 = vmatpush.msra.mxu1 %v1300_v30 }
 0x130   :  { %v358_v29 = vpop.f32.mrf.mxu0 }
 0x131   :  { %620 = vmatpush.msra.mxu1 %v1274_v25  ;;  %506 = vst [vmem:[%s1687_s2 + $0xb0] sm:$0xff] %v358_v29  ;;  %v651_v58 = vmul.f32 %v358_v29, %v358_v29 }
 0x133   :  { %621 = vmatpush.msra.mxu1 %v1246_v20 }
 0x135   :  { %622 = vmatpush.msra.mxu1 %v1218_v15 }
 0x137   :  { %623 = vmatpush.msra.mxu1 %v1190_v10 }
 0x138   :  { %v361_v53 = vpop.f32.mrf.mxu0  ;;  %624 = vmatmul.f32.vlgmr.msra.gmra.mxu1 %v851_v19 }
 0x139   :  { %733 = vmatpush.msrb.mxu1 %v676_v48  ;;  %507 = vst [vmem:[%s1687_s2 + $0xb8] sm:$0xff] %v361_v53  ;;  %v652_v54 = vmul.f32 %v361_v53, %v361_v53  ;;  %576 = vmatpush.msrb.mxu2 %v361_v53  ;;  %v648_v48 = vmul.f32 %v349_v23, %v349_v23 }
 0x13b   :  { %734 = vmatpush.msrb.mxu1 %v675_v50  ;;  %577 = vmatpush.msrb.mxu2 %v358_v29 }
 0x13c   :  { %721 = vmatpush.msra.mxu3 %v652_v54 }
 0x13d   :  { %735 = vmatpush.msrb.mxu1 %v674_v52  ;;  %578 = vmatpush.msrb.mxu2 %v355_v28  ;;  %v647_v28 = vmul.f32 %v1519_v14, %v1519_v14 }
 0x13e   :  { %722 = vmatpush.msra.mxu3 %v651_v58 }
 0x13f   :  { %736 = vmatpush.msrb.mxu1 %v673_v5  ;;  %579 = vmatpush.msrb.mxu2 %v352_v24  ;;  %v661_v24 = vmul.f32 %v1325_v33, %v1325_v33  ;;  %v632_v33 = vmul.f32 %v1179_v7, %v1179_v7  ;;  %v691_v7 = vmul.f32 %v1510_v13, %v1510_v13 }
 0x140   :  { %723 = vmatpush.msra.mxu3 %v650_v63  ;;  %v686_v13 = vmul.f32 %v1418_v47, %v1418_v47  ;;  %v681_v47 = vmul.f32 %v1300_v30, %v1300_v30 }
 0x141   :  { %737 = vmatpush.msrb.mxu1 %v672_v35  ;;  %580 = vmatpush.msrb.mxu2 %v349_v23  ;;  %v644_v23 = vmul.f32 %v1471_v4, %v1471_v4  ;;  %v665_v4 = vmul.f32 %v1416_v46, %v1416_v46  ;;  %v639_v46 = vmul.f32 %v1370_v39, %v1370_v39 }
 0x142   :  { %724 = vmatpush.msra.mxu3 %v649_v0  ;;  %v636_v39 = vmul.f32 %v1291_v27, %v1291_v27  ;;  %v631_v27 = vmul.f32 %v1149_v2, %v1149_v2  ;;  %v690_v2 = vmul.f32 %v1494_v62, %v1494_v62  ;;  %v685_v62 = vmul.f32 %v1400_v44, %v1400_v44 }
 0x143   :  { %738 = vmatpush.msrb.mxu1 %v671_v3  ;;  %581 = vmatpush.msrb.mxu2 %v1519_v14  ;;  %v645_v14 = vmul.f32 %v1487_v57, %v1487_v57  ;;  %v680_v44 = vmul.f32 %v1274_v25, %v1274_v25 }
 0x144   :  { %725 = vmatpush.msra.mxu3 %v648_v48 }
 0x145   :  { %739 = vmatpush.msrb.mxu1 %v670_v31  ;;  %582 = vmatpush.msrb.mxu2 %v1503_v9  ;;  %v643_v9 = vmul.f32 %v1453_v56, %v1453_v56  ;;  %v641_v56 = vmul.f32 %v1410_v45, %v1410_v45  ;;  %v662_v45 = vmul.f32 %v1354_v37, %v1354_v37 }
 0x146   :  { %726 = vmatpush.msra.mxu3 %v647_v28  ;;  %v634_v37 = vmul.f32 %v1235_v17, %v1235_v17  ;;  %v629_v17 = vmul.f32 %v1091_v55, %v1091_v55  ;;  %v688_v55 = vmul.f32 %v1461_v61, %v1461_v61  ;;  %v683_v61 = vmul.f32 %v1356_v38, %v1356_v38 }
 0x147   :  { %740 = vmatpush.msrb.mxu1 %v669_v26  ;;  %583 = vmatpush.msrb.mxu2 %v1487_v57  ;;  %v642_v57 = vmul.f32 %v1432_v49, %v1432_v49  ;;  %v663_v49 = vmul.f32 %v1376_v40, %v1376_v40  ;;  %v687_v40 = vmul.f32 %v1440_v51, %v1440_v51 }
 0x148   :  { %727 = vmatpush.msra.mxu3 %v646_v21  ;;  %584 = vmatmul.f32.vlgmr.msrb.gmra.mxu2 %v851_v19  ;;  %v682_v51 = vmul.f32 %v1327_v34, %v1327_v34  ;;  %v678_v38 = vmul.f32 %v1218_v15, %v1218_v15  ;;  %v677_v34 = vmul.f32 %v1190_v10, %v1190_v10 }
 0x149   :  { %741 = vmatpush.msrb.mxu1 %v668_v16  ;;  %693 = vmatpush.msra.mxu2 %v644_v23 }
 0x14a   :  { %728 = vmatpush.msra.mxu3 %v645_v14 }
 0x14b   :  { %742 = vmatpush.msrb.mxu1 %v667_v11  ;;  %694 = vmatpush.msra.mxu2 %v643_v9 }
 0x14c   :  { %729 = vmatmul.f32.vlgmr.msra.gmra.mxu3 %v851_v19 }
 0x14d   :  { %743 = vmatpush.msrb.mxu1 %v666_v6  ;;  %695 = vmatpush.msra.mxu2 %v642_v57 }
 0x14f   :  { %744 = vmatpush.msrb.mxu1 %v665_v4  ;;  %696 = vmatpush.msra.mxu2 %v641_v56 }
 0x151   :  { %745 = vmatpush.msrb.mxu1 %v664_v1  ;;  %697 = vmatpush.msra.mxu2 %v640_v59 }
 0x153   :  { %746 = vmatpush.msrb.mxu1 %v663_v49  ;;  %698 = vmatpush.msra.mxu2 %v639_v46 }
 0x155   :  { %747 = vmatpush.msrb.mxu1 %v662_v45  ;;  %699 = vmatpush.msra.mxu2 %v638_v43 }
 0x157   :  { %748 = vmatpush.msrb.mxu1 %v661_v24  ;;  %700 = vmatpush.msra.mxu2 %v637_v42 }
 0x158   :  { %749 = vmatmul.f32.vlgmr.msrb.gmra.mxu1 %v851_v19 }
 0x159   :  { %701 = vmatpush.msra.mxu2 %v636_v39 }
 0x15b   :  { %702 = vmatpush.msra.mxu2 %v635_v36 }
 0x15d   :  { %703 = vmatpush.msra.mxu2 %v634_v37 }
 0x15f   :  { %704 = vmatpush.msra.mxu2 %v633_v32 }
 0x161   :  { %705 = vmatpush.msra.mxu2 %v632_v33 }
 0x163   :  { %706 = vmatpush.msra.mxu2 %v631_v27 }
 0x165   :  { %707 = vmatpush.msra.mxu2 %v630_v22 }
 0x167   :  { %708 = vmatpush.msra.mxu2 %v629_v17 }
 0x168   :  { %709 = vmatmul.f32.vlgmr.msra.gmra.mxu2 %v851_v19 }
 0x169   :  { %753 = vmatpush.msrb.mxu2 %v692_v12 }
 0x16b   :  { %754 = vmatpush.msrb.mxu2 %v691_v7 }
 0x16d   :  { %755 = vmatpush.msrb.mxu2 %v690_v2 }
 0x16e   :  { %v605_v29 = vpop.f32.mrf.mxu3 }
 0x16f   :  { %756 = vmatpush.msrb.mxu2 %v689_v60 }
 0x171   :  { %757 = vmatpush.msrb.mxu2 %v688_v55 }
 0x173   :  { %758 = vmatpush.msrb.mxu2 %v687_v40 }
 0x175   :  { %759 = vmatpush.msrb.mxu2 %v686_v13 }
 0x177   :  { %760 = vmatpush.msrb.mxu2 %v685_v62 }
 0x179   :  { %761 = vmatpush.msrb.mxu2 %v684_v8 }
 0x17b   :  { %762 = vmatpush.msrb.mxu2 %v683_v61 }
 0x17d   :  { %763 = vmatpush.msrb.mxu2 %v682_v51 }
 0x17f   :  { %764 = vmatpush.msrb.mxu2 %v681_v47 }
 0x181   :  { %765 = vmatpush.msrb.mxu2 %v680_v44 }
 0x183   :  { %766 = vmatpush.msrb.mxu2 %v679_v41 }
 0x185   :  { %767 = vmatpush.msrb.mxu2 %v678_v38 }
 0x187   :  { %768 = vmatpush.msrb.mxu2 %v677_v34 }
 0x188   :  { %769 = vmatmul.f32.vlgmr.msrb.gmra.mxu2 %v851_v19 }
 0x195   :  { %v565_v30 = vpop.f32.mrf.mxu1 }
 0x1b5   :  { %v625_v50 = vpop.f32.mrf.mxu1 }
 0x1cb   :  { %v585_v18 = vpop.f32.mrf.mxu2 }
 0x1cc   :  { %v586_v25 = vadd.f32 %v585_v18, %v565_v30 }
 0x1ce   :  { %v606_v52 = vadd.f32 %v605_v29, %v586_v25 }
 0x1cf   :  { %v730_v20 = vpop.f32.mrf.mxu3 }
 0x1d0   :  { %v626_v53 = vadd.f32 %v625_v50, %v606_v52 }
 0x1d2   :  { %628 = vst [vmem:[%s1688_s3] sm:$0x1] %v626_v53 }
 0x1d5   :  { %v750_v5 = vpop.f32.mrf.mxu1 }
 0x1eb   :  { %v710_v15 = vpop.f32.mrf.mxu2 }
 0x1ec   :  { %v731_v54 = vadd.f32 %v730_v20, %v710_v15 }
 0x1ee   :  { %v751_v10 = vadd.f32 %v750_v5, %v731_v54 }
 0x20b   :  { %v770_v58 = vpop.f32.mrf.mxu2 }
 0x20c   :  { %v771_v63 = vadd.f32 %v770_v58, %v751_v10 }
 0x20e   :  { %773 = vst [vmem:[%s1688_s3 + $0x1] sm:$0x1] %v771_v63 }

// kernel: block_forward.6
= control target key start
LH: loop header
LB: loop body
LE: loop exit
PB: predicated region body
PF: predicated region fallthrough
CT: control target
= control target key end

     0   :  { %s1884_s3 = inlined_call_operand.vmem [shape: f32[128,128], index: 3, kind: input, shape index: {}]   ;;  %s1885_s1 = inlined_call_operand.vmem [shape: f32[1,128], index: 1, kind: input, shape index: {}]   ;;  %s1886_s2 = inlined_call_operand.vmem [shape: f32[1,128], index: 2, kind: input, shape index: {}]   ;;  %s1887_s0 = inlined_call_operand.vmem [shape: f32[512,128], index: 0, kind: input, shape index: {}]   ;;  %s1888_s4 = inlined_call_operand.vmem [shape: f32[512,128], index: 4, kind: output, shape index: {0}]   ;;  %s1889_s5 = inlined_call_operand.vmem [shape: f32[1,2,128], index: 5, kind: output, shape index: {1}]  }
   0x1   :  { %v362_v0 = vld [vmem:[%s1884_s3 + $0x78] sm:$0xff]  ;;  %v361_v1 = vld [vmem:[%s1884_s3 + $0x70] sm:$0xff]  ;;  %v360_v2 = vld [vmem:[%s1884_s3 + $0x68] sm:$0xff] }
   0x2   :  { %363 = vmatpush.msra.mxu0 %v362_v0  ;;  %870 = vmatpush.msra.mxu1 %v362_v0  ;;  %v359_v3 = vld [vmem:[%s1884_s3 + $0x60] sm:$0xff]  ;;  %v358_v4 = vld [vmem:[%s1884_s3 + $0x58] sm:$0xff]  ;;  %v357_v5 = vld [vmem:[%s1884_s3 + $0x50] sm:$0xff] }
   0x3   :  { %871 = vmatpush.msra.mxu2 %v362_v0  ;;  %872 = vmatpush.msra.mxu3 %v362_v0  ;;  %v356_v6 = vld [vmem:[%s1884_s3 + $0x48] sm:$0xff]  ;;  %v355_v7 = vld [vmem:[%s1884_s3 + $0x40] sm:$0xff]  ;;  %v354_v10 = vld [vmem:[%s1884_s3 + $0x38] sm:$0xff] }
   0x4   :  { %364 = vmatpush.msra.mxu0 %v361_v1  ;;  %873 = vmatpush.msra.mxu1 %v361_v1  ;;  %v979_v8 = vld [vmem:[%s1885_s1] ss:$0 sm:$0xff]  ;;  %v41_v11 = vld [vmem:[%s1887_s0 + $0xb0] sm:$0xff]  ;;  %v54_v12 = vld [vmem:[%s1887_s0 + $0x118] sm:$0xff] }
   0x5   :  { %874 = vmatpush.msra.mxu2 %v361_v1  ;;  %875 = vmatpush.msra.mxu3 %v361_v1  ;;  %v19_v9 = vld [vmem:[%s1887_s0] sm:$0xff]  ;;  %v353_v13 = vld [vmem:[%s1884_s3 + $0x30] sm:$0xff]  ;;  %v66_v16 = vld [vmem:[%s1887_s0 + $0x178] sm:$0xff]  ;;  %v109_v17 = vmul.f32 %v979_v8, %v41_v11  ;;  %v122_v18 = vmul.f32 %v979_v8, %v54_v12 }
   0x6   :  { %365 = vmatpush.msra.mxu0 %v360_v2  ;;  %876 = vmatpush.msra.mxu1 %v360_v2  ;;  %v87_v14 = vmul.f32 %v979_v8, %v19_v9  ;;  %v1000_v15 = vld [vmem:[%s1886_s2] ss:$0 sm:$0xff]  ;;  %v352_v19 = vld [vmem:[%s1884_s3 + $0x28] sm:$0xff]  ;;  %v134_v20 = vmul.f32 %v979_v8, %v66_v16  ;;  %v350_v26 = vld [vmem:[%s1884_s3 + $0x18] sm:$0xff] }
   0x7   :  { %877 = vmatpush.msra.mxu2 %v360_v2  ;;  %878 = vmatpush.msra.mxu3 %v360_v2  ;;  %v351_v21 = vld [vmem:[%s1884_s3 + $0x20] sm:$0xff]  ;;  %v177_v23 = vadd.f32 %v1000_v15, %v109_v17  ;;  %v190_v24 = vadd.f32 %v1000_v15, %v122_v18  ;;  %v20_v25 = vld [vmem:[%s1887_s0 + $0x8] sm:$0xff]  ;;  %v42_v27 = vld [vmem:[%s1887_s0 + $0xb8] sm:$0xff] }
   0x8   :  { %366 = vmatpush.msra.mxu0 %v359_v3  ;;  %879 = vmatpush.msra.mxu1 %v359_v3  ;;  %v155_v22 = vadd.f32 %v1000_v15, %v87_v14  ;;  %v55_v28 = vld [vmem:[%s1887_s0 + $0x120] sm:$0xff]  ;;  %v202_v29 = vadd.f32 %v1000_v15, %v134_v20  ;;  %v349_v30 = vld [vmem:[%s1884_s3 + $0x10] sm:$0xff]  ;;  %v88_v32 = vmul.f32 %v979_v8, %v20_v25  ;;  %v348_v38 = vld [vmem:[%s1884_s3 + $0x8] sm:$0xff] }
   0x9   :  { %880 = vmatpush.msra.mxu2 %v359_v3  ;;  %881 = vmatpush.msra.mxu3 %v359_v3  ;;  %v67_v33 = vld [vmem:[%s1887_s0 + $0x180] sm:$0xff]  ;;  %v241_v34 = vmax.f32 %v177_v23, 0.0  ;;  %v254_v35 = vmax.f32 %v190_v24, 0.0  ;;  %v110_v36 = vmul.f32 %v979_v8, %v42_v27  ;;  %v123_v37 = vmul.f32 %v979_v8, %v55_v28  ;;  %v21_v48 = vld [vmem:[%s1887_s0 + $0x10] sm:$0xff]  ;;  %v56_v50 = vld [vmem:[%s1887_s0 + $0x128] sm:$0xff] }
   0xa   :  { %367 = vmatpush.msra.mxu0 %v358_v4  ;;  %882 = vmatpush.msra.mxu1 %v358_v4  ;;  %v219_v31 = vmax.f32 %v155_v22, 0.0  ;;  %v266_v39 = vmax.f32 %v202_v29, 0.0  ;;  %v135_v40 = vmul.f32 %v979_v8, %v67_v33  ;;  %v347_v41 = vld [vmem:[%s1884_s3] sm:$0xff]  ;;  %v156_v43 = vadd.f32 %v1000_v15, %v88_v32  ;;  %v68_v55 = vld [vmem:[%s1887_s0 + $0x188] sm:$0xff]  ;;  %v69_v12 = vld [vmem:[%s1887_s0 + $0x190] sm:$0xff] }
   0xb   :  { %883 = vmatpush.msra.mxu2 %v358_v4  ;;  %884 = vmatpush.msra.mxu3 %v358_v4  ;;  %v305_v44 = vmin.f32 %v241_v34, 6.0  ;;  %v318_v45 = vmin.f32 %v254_v35, 6.0  ;;  %v178_v46 = vadd.f32 %v1000_v15, %v110_v36  ;;  %v191_v47 = vadd.f32 %v1000_v15, %v123_v37  ;;  %v43_v49 = vld [vmem:[%s1887_s0 + $0xc0] sm:$0xff]  ;;  %v22_v4 = vld [vmem:[%s1887_s0 + $0x18] sm:$0xff]  ;;  %v45_v27 = vld [vmem:[%s1887_s0 + $0xd0] sm:$0xff] }
   0xc   :  { %368 = vmatpush.msra.mxu0 %v357_v5  ;;  %885 = vmatpush.msra.mxu1 %v357_v5  ;;  %v283_v42 = vmin.f32 %v219_v31, 6.0  ;;  %v330_v51 = vmin.f32 %v266_v39, 6.0  ;;  %v203_v52 = vadd.f32 %v1000_v15, %v135_v40  ;;  %v220_v53 = vmax.f32 %v156_v43, 0.0  ;;  %v58_v28 = vld [vmem:[%s1887_s0 + $0x138] sm:$0xff] }
   0xd   :  { %886 = vmatpush.msra.mxu2 %v357_v5  ;;  %887 = vmatpush.msra.mxu3 %v357_v5  ;;  %v89_v54 = vmul.f32 %v979_v8, %v21_v48  ;;  %v242_v56 = vmax.f32 %v178_v46, 0.0  ;;  %v255_v57 = vmax.f32 %v191_v47, 0.0  ;;  %v111_v58 = vmul.f32 %v979_v8, %v43_v49  ;;  %v44_v5 = vld [vmem:[%s1887_s0 + $0xc8] sm:$0xff]  ;;  %v70_v33 = vld [vmem:[%s1887_s0 + $0x198] sm:$0xff]  ;;  %v59_v48 = vld [vmem:[%s1887_s0 + $0x140] sm:$0xff] }
   0xe   :  { %369 = vmatpush.msra.mxu0 %v356_v6  ;;  %888 = vmatpush.msra.mxu1 %v356_v6  ;;  %v124_v59 = vmul.f32 %v979_v8, %v56_v50  ;;  %v267_v60 = vmax.f32 %v203_v52, 0.0  ;;  %v136_v61 = vmul.f32 %v979_v8, %v68_v55  ;;  %v284_v62 = vmin.f32 %v220_v53, 6.0  ;;  %v24_v46 = vld [vmem:[%s1887_s0 + $0x28] sm:$0xff]  ;;  %v46_v47 = vld [vmem:[%s1887_s0 + $0xd8] sm:$0xff]  ;;  %v71_v53 = vld [vmem:[%s1887_s0 + $0x1a0] sm:$0xff] }
   0xf   :  { %889 = vmatpush.msra.mxu2 %v356_v6  ;;  %890 = vmatpush.msra.mxu3 %v356_v6  ;;  %v157_v63 = vadd.f32 %v1000_v15, %v89_v54  ;;  %v306_v0 = vmin.f32 %v242_v56, 6.0  ;;  %v319_v1 = vmin.f32 %v255_v57, 6.0  ;;  %v179_v2 = vadd.f32 %v1000_v15, %v111_v58  ;;  %v57_v6 = vld [vmem:[%s1887_s0 + $0x130] sm:$0xff] }
  0x10   :  { %370 = vmatpush.msra.mxu0 %v355_v7  ;;  %891 = vmatpush.msra.mxu1 %v355_v7  ;;  %v192_v3 = vadd.f32 %v1000_v15, %v124_v59  ;;  %v204_v9 = vadd.f32 %v1000_v15, %v136_v61  ;;  %v90_v11 = vmul.f32 %v979_v8, %v22_v4  ;;  %v60_v4 = vld [vmem:[%s1887_s0 + $0x148] sm:$0xff] }
  0x11   :  { %892 = vmatpush.msra.mxu2 %v355_v7  ;;  %893 = vmatpush.msra.mxu3 %v355_v7  ;;  %v331_v7 = vmin.f32 %v267_v60, 6.0  ;;  %v112_v16 = vmul.f32 %v979_v8, %v44_v5  ;;  %v125_v17 = vmul.f32 %v979_v8, %v57_v6  ;;  %v113_v36 = vmul.f32 %v979_v8, %v45_v27 }
  0x12   :  { %371 = vmatpush.msra.mxu0 %v354_v10  ;;  %894 = vmatpush.msra.mxu1 %v354_v10  ;;  %v256_v14 = vmax.f32 %v192_v3, 0.0  ;;  %v268_v18 = vmax.f32 %v204_v9, 0.0  ;;  %v126_v37 = vmul.f32 %v979_v8, %v58_v28  ;;  %v138_v39 = vmul.f32 %v979_v8, %v70_v33  ;;  %v47_v3 = vld [vmem:[%s1887_s0 + $0xe0] sm:$0xff] }
  0x13   :  { %895 = vmatpush.msra.mxu2 %v354_v10  ;;  %896 = vmatpush.msra.mxu3 %v354_v10  ;;  %v221_v10 = vmax.f32 %v157_v63, 0.0  ;;  %v180_v24 = vadd.f32 %v1000_v15, %v112_v16  ;;  %v193_v25 = vadd.f32 %v1000_v15, %v125_v17  ;;  %v92_v52 = vmul.f32 %v979_v8, %v24_v46  ;;  %v62_v46 = vld [vmem:[%s1887_s0 + $0x158] sm:$0xff] }
  0x14   :  { %372 = vmatpush.msra.mxu0 %v353_v13  ;;  %897 = vmatpush.msra.mxu1 %v353_v13  ;;  %v320_v23 = vmin.f32 %v256_v14, 6.0  ;;  %v332_v29 = vmin.f32 %v268_v18, 6.0  ;;  %v206_v50 = vadd.f32 %v1000_v15, %v138_v39  ;;  %v114_v56 = vmul.f32 %v979_v8, %v46_v47 }
  0x15   :  { %898 = vmatpush.msra.mxu2 %v353_v13  ;;  %899 = vmatpush.msra.mxu3 %v353_v13  ;;  %v243_v13 = vmax.f32 %v179_v2, 0.0  ;;  %v285_v20 = vmin.f32 %v221_v10, 6.0  ;;  %v244_v34 = vmax.f32 %v180_v24, 0.0  ;;  %v257_v35 = vmax.f32 %v193_v25, 0.0  ;;  %v25_v2 = vld [vmem:[%s1887_s0 + $0x30] sm:$0xff]  ;;  %v72_v10 = vld [vmem:[%s1887_s0 + $0x1a8] sm:$0xff] }
  0x16   :  { %373 = vmatpush.msra.mxu0 %v352_v19  ;;  %900 = vmatpush.msra.mxu1 %v352_v19  ;;  %v127_v57 = vmul.f32 %v979_v8, %v59_v48  ;;  %v270_v58 = vmax.f32 %v206_v50, 0.0  ;;  %v139_v59 = vmul.f32 %v979_v8, %v71_v53  ;;  %v160_v61 = vadd.f32 %v1000_v15, %v92_v52  ;;  %v26_v24 = vld [vmem:[%s1887_s0 + $0x38] sm:$0xff]  ;;  %v48_v25 = vld [vmem:[%s1887_s0 + $0xe8] sm:$0xff] }
  0x17   :  { %901 = vmatpush.msra.mxu2 %v352_v19  ;;  %902 = vmatpush.msra.mxu3 %v352_v19  ;;  %v137_v19 = vmul.f32 %v979_v8, %v69_v12  ;;  %v307_v22 = vmin.f32 %v243_v13, 6.0  ;;  %v321_v43 = vmin.f32 %v257_v35, 6.0  ;;  %v93_v9 = vmul.f32 %v979_v8, %v25_v2  ;;  %v63_v2 = vld [vmem:[%s1887_s0 + $0x160] sm:$0xff] }
  0x18   :  { %374 = vmatpush.msra.mxu0 %v351_v21  ;;  %903 = vmatpush.msra.mxu1 %v351_v21  ;;  %v334_v5 = vmin.f32 %v270_v58, 6.0  ;;  %v207_v6 = vadd.f32 %v1000_v15, %v139_v59  ;;  %v115_v13 = vmul.f32 %v979_v8, %v47_v3  ;;  %v128_v14 = vmul.f32 %v979_v8, %v60_v4 }
  0x19   :  { %904 = vmatpush.msra.mxu2 %v351_v21  ;;  %905 = vmatpush.msra.mxu3 %v351_v21  ;;  %v158_v21 = vadd.f32 %v1000_v15, %v90_v11  ;;  %v140_v17 = vmul.f32 %v979_v8, %v72_v10 }
  0x1a   :  { %375 = vmatpush.msra.mxu0 %v350_v26  ;;  %906 = vmatpush.msra.mxu1 %v350_v26  ;;  %v271_v16 = vmax.f32 %v207_v6, 0.0 }
  0x1b   :  { %907 = vmatpush.msra.mxu2 %v350_v26  ;;  %908 = vmatpush.msra.mxu3 %v350_v26  ;;  %v23_v26 = vld [vmem:[%s1887_s0 + $0x20] sm:$0xff]  ;;  %v222_v31 = vmax.f32 %v158_v21, 0.0  ;;  %v208_v28 = vadd.f32 %v1000_v15, %v140_v17 }
  0x1c   :  { %376 = vmatpush.msra.mxu0 %v349_v30  ;;  %909 = vmatpush.msra.mxu1 %v349_v30  ;;  %v91_v32 = vmul.f32 %v979_v8, %v23_v26  ;;  %v61_v26 = vld [vmem:[%s1887_s0 + $0x150] sm:$0xff]  ;;  %v335_v27 = vmin.f32 %v271_v16, 6.0 }
  0x1d   :  { %910 = vmatpush.msra.mxu2 %v349_v30  ;;  %911 = vmatpush.msra.mxu3 %v349_v30  ;;  %v205_v30 = vadd.f32 %v1000_v15, %v137_v19  ;;  %v286_v40 = vmin.f32 %v222_v31, 6.0  ;;  %v161_v19 = vadd.f32 %v1000_v15, %v93_v9  ;;  %v73_v31 = vld [vmem:[%s1887_s0 + $0x1b0] sm:$0xff]  ;;  %v129_v35 = vmul.f32 %v979_v8, %v61_v26 }
  0x1e   :  { %377 = vmatpush.msra.mxu0 %v348_v38  ;;  %912 = vmatpush.msra.mxu1 %v348_v38 }
  0x1f   :  { %913 = vmatpush.msra.mxu2 %v348_v38  ;;  %914 = vmatpush.msra.mxu3 %v348_v38  ;;  %v269_v38 = vmax.f32 %v205_v30, 0.0  ;;  %v94_v30 = vmul.f32 %v979_v8, %v26_v24  ;;  %v51_v24 = vld [vmem:[%s1887_s0 + $0x100] sm:$0xff] }
  0x20   :  { %378 = vmatpush.msra.mxu0 %v347_v41  ;;  %915 = vmatpush.msra.mxu1 %v347_v41 }
  0x21   :  { %916 = vmatpush.msra.mxu2 %v347_v41  ;;  %379 = vmatmul.f32.vlgmr.msra.gmra.mxu0 %v283_v42  ;;  %v308_v42 = vmin.f32 %v244_v34, 6.0  ;;  %v333_v49 = vmin.f32 %v269_v38, 6.0  ;;  %v116_v34 = vmul.f32 %v979_v8, %v48_v25  ;;  %v162_v39 = vadd.f32 %v1000_v15, %v94_v30 }
  0x22   :  { %445 = vmatmul.f32.vlgmr.msra.gmra.mxu1 %v305_v44  ;;  %484 = vmatmul.f32.vlgmr.msra.gmra.mxu2 %v318_v45  ;;  %v181_v44 = vadd.f32 %v1000_v15, %v113_v36  ;;  %v194_v45 = vadd.f32 %v1000_v15, %v126_v37  ;;  %v272_v36 = vmax.f32 %v208_v28, 0.0  ;;  %v141_v37 = vmul.f32 %v979_v8, %v73_v31 }
  0x23   :  { %917 = vmatpush.msra.mxu3 %v347_v41  ;;  %v159_v41 = vadd.f32 %v1000_v15, %v91_v32 }
  0x24   :  { %520 = vmatmul.f32.vlgmr.msra.gmra.mxu3 %v330_v51  ;;  %v245_v54 = vmax.f32 %v181_v44, 0.0  ;;  %v258_v55 = vmax.f32 %v194_v45, 0.0  ;;  %v27_v44 = vld [vmem:[%s1887_s0 + $0x40] sm:$0xff]  ;;  %v49_v45 = vld [vmem:[%s1887_s0 + $0xf0] sm:$0xff]  ;;  %v336_v47 = vmin.f32 %v272_v36, 6.0  ;;  %v209_v48 = vadd.f32 %v1000_v15, %v141_v37 }
  0x25   :  { %v223_v51 = vmax.f32 %v159_v41, 0.0  ;;  %v95_v50 = vmul.f32 %v979_v8, %v27_v44  ;;  %v52_v44 = vld [vmem:[%s1887_s0 + $0x108] sm:$0xff] }
  0x26   :  { %v322_v63 = vmin.f32 %v258_v55, 6.0  ;;  %v130_v55 = vmul.f32 %v979_v8, %v62_v46 }
  0x27   :  { %v287_v60 = vmin.f32 %v223_v51, 6.0  ;;  %v74_v51 = vld [vmem:[%s1887_s0 + $0x1b8] sm:$0xff]  ;;  %v163_v59 = vadd.f32 %v1000_v15, %v95_v50 }
  0x29   :  { %382 = vmatmul.f32.gmra.mxu0 %v284_v62  ;;  %v309_v62 = vmin.f32 %v245_v54, 6.0  ;;  %v117_v54 = vmul.f32 %v979_v8, %v49_v45 }
  0x2a   :  { %448 = vmatmul.f32.gmra.mxu1 %v306_v0  ;;  %487 = vmatmul.f32.gmra.mxu2 %v319_v1  ;;  %v182_v0 = vadd.f32 %v1000_v15, %v114_v56  ;;  %v195_v1 = vadd.f32 %v1000_v15, %v127_v57  ;;  %v273_v56 = vmax.f32 %v209_v48, 0.0  ;;  %v142_v57 = vmul.f32 %v979_v8, %v74_v51 }
  0x2c   :  { %523 = vmatmul.f32.gmra.mxu3 %v331_v7  ;;  %v224_v7 = vmax.f32 %v160_v61, 0.0  ;;  %v246_v11 = vmax.f32 %v182_v0, 0.0  ;;  %v259_v12 = vmax.f32 %v195_v1, 0.0  ;;  %v28_v0 = vld [vmem:[%s1887_s0 + $0x48] sm:$0xff]  ;;  %v50_v1 = vld [vmem:[%s1887_s0 + $0xf8] sm:$0xff]  ;;  %v337_v3 = vmin.f32 %v273_v56, 6.0 }
  0x2d   :  { %v210_v4 = vadd.f32 %v1000_v15, %v142_v57  ;;  %v96_v6 = vmul.f32 %v979_v8, %v28_v0 }
  0x2e   :  { %v288_v18 = vmin.f32 %v224_v7, 6.0  ;;  %v323_v21 = vmin.f32 %v259_v12, 6.0  ;;  %v75_v7 = vld [vmem:[%s1887_s0 + $0x1c0] sm:$0xff]  ;;  %v131_v12 = vmul.f32 %v979_v8, %v63_v2 }
  0x2f   :  { %v164_v17 = vadd.f32 %v1000_v15, %v96_v6 }
  0x31   :  { %385 = vmatmul.f32.gmra.mxu0 %v285_v20  ;;  %v310_v20 = vmin.f32 %v246_v11, 6.0  ;;  %v118_v11 = vmul.f32 %v979_v8, %v50_v1 }
  0x32   :  { %451 = vmatmul.f32.gmra.mxu1 %v307_v22  ;;  %490 = vmatmul.f32.gmra.mxu2 %v320_v23  ;;  %v183_v22 = vadd.f32 %v1000_v15, %v115_v13  ;;  %v196_v23 = vadd.f32 %v1000_v15, %v128_v14  ;;  %v274_v13 = vmax.f32 %v210_v4, 0.0  ;;  %v143_v14 = vmul.f32 %v979_v8, %v75_v7  ;;  %v78_v4 = vld [vmem:[%s1887_s0 + $0x1d8] sm:$0xff] }
  0x34   :  { %526 = vmatmul.f32.gmra.mxu3 %v332_v29  ;;  %v225_v29 = vmax.f32 %v161_v19, 0.0  ;;  %v247_v32 = vmax.f32 %v183_v22, 0.0  ;;  %v260_v33 = vmax.f32 %v196_v23, 0.0  ;;  %v29_v22 = vld [vmem:[%s1887_s0 + $0x50] sm:$0xff]  ;;  %v64_v23 = vld [vmem:[%s1887_s0 + $0x168] sm:$0xff]  ;;  %v338_v25 = vmin.f32 %v274_v13, 6.0 }
  0x35   :  { %v211_v26 = vadd.f32 %v1000_v15, %v143_v14  ;;  %v97_v28 = vmul.f32 %v979_v8, %v29_v22  ;;  %v32_v14 = vld [vmem:[%s1887_s0 + $0x68] sm:$0xff]  ;;  %v79_v22 = vld [vmem:[%s1887_s0 + $0x1e0] sm:$0xff] }
  0x36   :  { %v289_v38 = vmin.f32 %v225_v29, 6.0  ;;  %v324_v41 = vmin.f32 %v260_v33, 6.0  ;;  %v76_v29 = vld [vmem:[%s1887_s0 + $0x1c8] sm:$0xff]  ;;  %v119_v33 = vmul.f32 %v979_v8, %v51_v24 }
  0x37   :  { %v165_v37 = vadd.f32 %v1000_v15, %v97_v28  ;;  %v33_v28 = vld [vmem:[%s1887_s0 + $0x70] sm:$0xff] }
  0x39   :  { %388 = vmatmul.f32.gmra.mxu0 %v286_v40  ;;  %v311_v40 = vmin.f32 %v247_v32, 6.0  ;;  %v132_v32 = vmul.f32 %v979_v8, %v64_v23 }
  0x3a   :  { %454 = vmatmul.f32.gmra.mxu1 %v308_v42  ;;  %493 = vmatmul.f32.gmra.mxu2 %v321_v43  ;;  %v184_v42 = vadd.f32 %v1000_v15, %v116_v34  ;;  %v197_v43 = vadd.f32 %v1000_v15, %v129_v35  ;;  %v275_v34 = vmax.f32 %v211_v26, 0.0  ;;  %v144_v35 = vmul.f32 %v979_v8, %v76_v29 }
  0x3c   :  { %529 = vmatmul.f32.gmra.mxu3 %v333_v49  ;;  %v226_v49 = vmax.f32 %v162_v39, 0.0  ;;  %v248_v52 = vmax.f32 %v184_v42, 0.0  ;;  %v261_v53 = vmax.f32 %v197_v43, 0.0  ;;  %v187_v42 = vadd.f32 %v1000_v15, %v119_v33  ;;  %v65_v43 = vld [vmem:[%s1887_s0 + $0x170] sm:$0xff] }
  0x3d   :  { %v339_v45 = vmin.f32 %v275_v34, 6.0  ;;  %v212_v46 = vadd.f32 %v1000_v15, %v144_v35  ;;  %v133_v51 = vmul.f32 %v979_v8, %v65_v43  ;;  %v101_v33 = vmul.f32 %v979_v8, %v33_v28  ;;  %v80_v34 = vld [vmem:[%s1887_s0 + $0x1e8] sm:$0xff] }
  0x3e   :  { %v290_v58 = vmin.f32 %v226_v49, 6.0  ;;  %v325_v61 = vmin.f32 %v261_v53, 6.0  ;;  %v77_v49 = vld [vmem:[%s1887_s0 + $0x1d0] sm:$0xff]  ;;  %v120_v53 = vmul.f32 %v979_v8, %v52_v44 }
  0x3f   :  { %v81_v44 = vld [vmem:[%s1887_s0 + $0x1f0] sm:$0xff] }
  0x41   :  { %391 = vmatmul.f32.gmra.mxu0 %v287_v60  ;;  %v312_v60 = vmin.f32 %v248_v52, 6.0  ;;  %v251_v52 = vmax.f32 %v187_v42, 0.0 }
  0x42   :  { %457 = vmatmul.f32.gmra.mxu1 %v309_v62  ;;  %496 = vmatmul.f32.gmra.mxu2 %v322_v63  ;;  %v185_v62 = vadd.f32 %v1000_v15, %v117_v54  ;;  %v198_v63 = vadd.f32 %v1000_v15, %v130_v55  ;;  %v276_v54 = vmax.f32 %v212_v46, 0.0  ;;  %v145_v55 = vmul.f32 %v979_v8, %v77_v49  ;;  %v35_v49 = vld [vmem:[%s1887_s0 + $0x80] sm:$0xff] }
  0x43   :  { %v149_v46 = vmul.f32 %v979_v8, %v81_v44 }
  0x44   :  { %532 = vmatmul.f32.gmra.mxu3 %v334_v5  ;;  %v227_v5 = vmax.f32 %v163_v59, 0.0  ;;  %v249_v9 = vmax.f32 %v185_v62, 0.0  ;;  %v262_v10 = vmax.f32 %v198_v63, 0.0  ;;  %v201_v59 = vadd.f32 %v1000_v15, %v133_v51  ;;  %v53_v63 = vld [vmem:[%s1887_s0 + $0x110] sm:$0xff] }
  0x45   :  { %v188_v62 = vadd.f32 %v1000_v15, %v120_v53  ;;  %v340_v0 = vmin.f32 %v276_v54, 6.0  ;;  %v213_v1 = vadd.f32 %v1000_v15, %v145_v55  ;;  %v121_v7 = vmul.f32 %v979_v8, %v53_v63  ;;  %v82_v54 = vld [vmem:[%s1887_s0 + $0x1f8] sm:$0xff] }
  0x46   :  { %v291_v16 = vmin.f32 %v227_v5, 6.0  ;;  %v326_v19 = vmin.f32 %v262_v10, 6.0  ;;  %v265_v5 = vmax.f32 %v201_v59, 0.0  ;;  %v146_v10 = vmul.f32 %v979_v8, %v78_v4  ;;  %v36_v59 = vld [vmem:[%s1887_s0 + $0x88] sm:$0xff]  ;;  %v37_v4 = vld [vmem:[%s1887_s0 + $0x90] sm:$0xff] }
  0x47   :  { %v252_v6 = vmax.f32 %v188_v62, 0.0  ;;  %v217_v51 = vadd.f32 %v1000_v15, %v149_v46  ;;  %v103_v53 = vmul.f32 %v979_v8, %v35_v49  ;;  %v104_v63 = vmul.f32 %v979_v8, %v36_v59 }
  0x48   :  { %v329_v13 = vmin.f32 %v265_v5, 6.0 }
  0x49   :  { %394 = vmatmul.f32.gmra.mxu0 %v288_v18  ;;  %v313_v18 = vmin.f32 %v249_v9, 6.0  ;;  %v277_v9 = vmax.f32 %v213_v1, 0.0  ;;  %v281_v55 = vmax.f32 %v217_v51, 0.0 }
  0x4a   :  { %460 = vmatmul.f32.gmra.mxu1 %v310_v20  ;;  %499 = vmatmul.f32.gmra.mxu2 %v323_v21  ;;  %v186_v20 = vadd.f32 %v1000_v15, %v118_v11  ;;  %v199_v21 = vadd.f32 %v1000_v15, %v131_v12 }
  0x4c   :  { %535 = vmatmul.f32.gmra.mxu3 %v335_v27  ;;  %v228_v27 = vmax.f32 %v164_v17, 0.0  ;;  %v250_v30 = vmax.f32 %v186_v20, 0.0  ;;  %v263_v31 = vmax.f32 %v199_v21, 0.0  ;;  %v189_v17 = vadd.f32 %v1000_v15, %v121_v7 }
  0x4d   :  { %v100_v21 = vmul.f32 %v979_v8, %v32_v14  ;;  %v38_v14 = vld [vmem:[%s1887_s0 + $0x98] sm:$0xff] }
  0x4e   :  { %v292_v36 = vmin.f32 %v228_v27, 6.0  ;;  %v327_v39 = vmin.f32 %v263_v31, 6.0  ;;  %v253_v23 = vmax.f32 %v189_v17, 0.0 }
  0x4f   :  { %v168_v27 = vadd.f32 %v1000_v15, %v100_v21 }
  0x50   :  { %v317_v29 = vmin.f32 %v253_v23, 6.0 }
  0x51   :  { %397 = vmatmul.f32.gmra.mxu0 %v289_v38  ;;  %v314_v38 = vmin.f32 %v250_v30, 6.0 }
  0x52   :  { %463 = vmatmul.f32.gmra.mxu1 %v311_v40  ;;  %502 = vmatmul.f32.gmra.mxu2 %v324_v41  ;;  %v200_v40 = vadd.f32 %v1000_v15, %v132_v32  ;;  %v30_v41 = vld [vmem:[%s1887_s0 + $0x58] sm:$0xff]  ;;  %v232_v32 = vmax.f32 %v168_v27, 0.0 }
  0x53   :  { %v98_v48 = vmul.f32 %v979_v8, %v30_v41 }
  0x54   :  { %538 = vmatmul.f32.gmra.mxu3 %v336_v47  ;;  %v229_v47 = vmax.f32 %v165_v37, 0.0  ;;  %v264_v50 = vmax.f32 %v200_v40, 0.0  ;;  %v296_v37 = vmin.f32 %v232_v32, 6.0 }
  0x55   :  { %v166_v57 = vadd.f32 %v1000_v15, %v98_v48 }
  0x56   :  { %v293_v56 = vmin.f32 %v229_v47, 6.0 }
  0x57   :  { %v230_v2 = vmax.f32 %v166_v57, 0.0 }
  0x59   :  { %400 = vmatmul.f32.gmra.mxu0 %v290_v58  ;;  %v328_v58 = vmin.f32 %v264_v50, 6.0  ;;  %v294_v11 = vmin.f32 %v230_v2, 6.0  ;;  %v172_v2 = vadd.f32 %v1000_v15, %v104_v63 }
  0x5a   :  { %466 = vmatmul.f32.gmra.mxu1 %v312_v60  ;;  %505 = vmatmul.f32.gmra.mxu2 %v325_v61  ;;  %v31_v60 = vld [vmem:[%s1887_s0 + $0x60] sm:$0xff]  ;;  %v315_v61 = vmin.f32 %v251_v52, 6.0 }
  0x5b   :  { %v236_v7 = vmax.f32 %v172_v2, 0.0 }
  0x5c   :  { %541 = vmatmul.f32.gmra.mxu3 %v337_v3  ;;  %v99_v3 = vmul.f32 %v979_v8, %v31_v60  ;;  %v345_v60 = vmin.f32 %v281_v55, 6.0 }
  0x5e   :  { %v167_v12 = vadd.f32 %v1000_v15, %v99_v3 }
  0x60   :  { %v231_v20 = vmax.f32 %v167_v12, 0.0 }
  0x61   :  { %403 = vmatmul.f32.gmra.mxu0 %v291_v16  ;;  %v316_v16 = vmin.f32 %v252_v6, 6.0 }
  0x62   :  { %469 = vmatmul.f32.gmra.mxu1 %v313_v18  ;;  %508 = vmatmul.f32.gmra.mxu2 %v326_v19  ;;  %v341_v18 = vmin.f32 %v277_v9, 6.0  ;;  %v214_v19 = vadd.f32 %v1000_v15, %v146_v10  ;;  %v295_v26 = vmin.f32 %v231_v20, 6.0  ;;  %v105_v9 = vmul.f32 %v979_v8, %v37_v4 }
  0x64   :  { %544 = vmatmul.f32.gmra.mxu3 %v338_v25  ;;  %v278_v24 = vmax.f32 %v214_v19, 0.0  ;;  %v147_v25 = vmul.f32 %v979_v8, %v79_v22  ;;  %v173_v12 = vadd.f32 %v1000_v15, %v105_v9  ;;  %v106_v19 = vmul.f32 %v979_v8, %v38_v14 }
  0x66   :  { %v342_v30 = vmin.f32 %v278_v24, 6.0  ;;  %v215_v31 = vadd.f32 %v1000_v15, %v147_v25  ;;  %v174_v22 = vadd.f32 %v1000_v15, %v106_v19  ;;  %v39_v24 = vld [vmem:[%s1887_s0 + $0xa0] sm:$0xff] }
  0x67   :  { %v107_v28 = vmul.f32 %v979_v8, %v39_v24 }
  0x68   :  { %v279_v35 = vmax.f32 %v215_v31, 0.0  ;;  %v238_v27 = vmax.f32 %v174_v22, 0.0 }
  0x69   :  { %406 = vmatmul.f32.gmra.mxu0 %v292_v36  ;;  %v148_v36 = vmul.f32 %v979_v8, %v80_v34  ;;  %v175_v31 = vadd.f32 %v1000_v15, %v107_v28 }
  0x6a   :  { %472 = vmatmul.f32.gmra.mxu1 %v314_v38  ;;  %511 = vmatmul.f32.gmra.mxu2 %v327_v39  ;;  %v169_v38 = vadd.f32 %v1000_v15, %v101_v33  ;;  %v34_v39 = vld [vmem:[%s1887_s0 + $0x78] sm:$0xff]  ;;  %v343_v40 = vmin.f32 %v279_v35, 6.0  ;;  %v40_v33 = vld [vmem:[%s1887_s0 + $0xa8] sm:$0xff] }
  0x6b   :  { %v216_v41 = vadd.f32 %v1000_v15, %v148_v36  ;;  %v102_v43 = vmul.f32 %v979_v8, %v34_v39  ;;  %v239_v36 = vmax.f32 %v175_v31, 0.0 }
  0x6c   :  { %547 = vmatmul.f32.gmra.mxu3 %v339_v45  ;;  %v233_v42 = vmax.f32 %v169_v38, 0.0 }
  0x6d   :  { %v280_v45 = vmax.f32 %v216_v41, 0.0  ;;  %v170_v48 = vadd.f32 %v1000_v15, %v102_v43  ;;  %v303_v39 = vmin.f32 %v239_v36, 6.0 }
  0x6e   :  { %v297_v47 = vmin.f32 %v233_v42, 6.0 }
  0x6f   :  { %v344_v50 = vmin.f32 %v280_v45, 6.0  ;;  %v234_v52 = vmax.f32 %v170_v48, 0.0 }
  0x71   :  { %409 = vmatmul.f32.gmra.mxu0 %v293_v56  ;;  %v150_v56 = vmul.f32 %v979_v8, %v82_v54  ;;  %v298_v57 = vmin.f32 %v234_v52, 6.0 }
  0x72   :  { %514 = vmatmul.f32.gmra.mxu2 %v328_v58  ;;  %475 = vmatmul.f32.gmra.mxu1 %v315_v61  ;;  %v171_v58 = vadd.f32 %v1000_v15, %v103_v53 }
  0x73   :  { %v218_v61 = vadd.f32 %v1000_v15, %v150_v56 }
  0x74   :  { %550 = vmatmul.f32.gmra.mxu3 %v340_v0  ;;  %v235_v62 = vmax.f32 %v171_v58, 0.0 }
  0x75   :  { %v282_v0 = vmax.f32 %v218_v61, 0.0 }
  0x76   :  { %v299_v1 = vmin.f32 %v235_v62, 6.0 }
  0x77   :  { %v346_v6 = vmin.f32 %v282_v0, 6.0 }
  0x79   :  { %412 = vmatmul.f32.gmra.mxu0 %v294_v11  ;;  %v300_v11 = vmin.f32 %v236_v7, 6.0 }
  0x7a   :  { %517 = vmatmul.f32.gmra.mxu2 %v329_v13  ;;  %478 = vmatmul.f32.gmra.mxu1 %v316_v16 }
  0x7c   :  { %553 = vmatmul.f32.gmra.mxu3 %v341_v18  ;;  %v237_v18 = vmax.f32 %v173_v12, 0.0 }
  0x7e   :  { %v301_v21 = vmin.f32 %v237_v18, 6.0 }
  0x81   :  { %415 = vmatmul.f32.gmra.mxu0 %v295_v26 }
  0x82   :  { %481 = vmatmul.f32.gmra.mxu1 %v317_v29 }
  0x84   :  { %556 = vmatmul.f32.gmra.mxu3 %v342_v30  ;;  %v302_v30 = vmin.f32 %v238_v27, 6.0 }
  0x89   :  { %418 = vmatmul.f32.gmra.mxu0 %v296_v37  ;;  %v108_v37 = vmul.f32 %v979_v8, %v40_v33 }
  0x8c   :  { %559 = vmatmul.f32.gmra.mxu3 %v343_v40  ;;  %v176_v40 = vadd.f32 %v1000_v15, %v108_v37 }
  0x8e   :  { %v240_v15 = vmax.f32 %v176_v40, 0.0 }
  0x90   :  { %v304_v44 = vmin.f32 %v240_v15, 6.0 }
  0x91   :  { %421 = vmatmul.f32.gmra.mxu0 %v297_v47 }
  0x94   :  { %562 = vmatmul.f32.gmra.mxu3 %v344_v50 }
  0x99   :  { %424 = vmatmul.f32.gmra.mxu0 %v298_v57 }
  0x9c   :  { %565 = vmatmul.f32.gmra.mxu3 %v345_v60 }
  0x9e   :  { %v1310_v3 = vpop.f32.mrf.mxu0 }
  0x9f   :  { %572 = vst [vmem:[%s1888_s4] sm:$0xff] %v1310_v3  ;;  %v1319_v5 = vpop.f32.mrf.mxu1 }
  0xa0   :  { %594 = vst [vmem:[%s1888_s4 + $0xb0] sm:$0xff] %v1319_v5 }
  0xa1   :  { %427 = vmatmul.f32.gmra.mxu0 %v299_v1 }
  0xa4   :  { %568 = vmatmul.f32.gmra.mxu3 %v346_v6 }
  0xa5   :  { %v1326_v10 = vpop.f32.mrf.mxu2 }
  0xa6   :  { %607 = vst [vmem:[%s1888_s4 + $0x118] sm:$0xff] %v1326_v10  ;;  %v1333_v13 = vpop.f32.mrf.mxu0 }
  0xa7   :  { %573 = vst [vmem:[%s1888_s4 + $0x8] sm:$0xff] %v1333_v13  ;;  %v1342_v16 = vpop.f32.mrf.mxu1  ;;  %v1344_v17 = vpop.f32.mrf.mxu3 }
  0xa8   :  { %595 = vst [vmem:[%s1888_s4 + $0xb8] sm:$0xff] %v1342_v16  ;;  %676 = vmatpush.msrb.mxu3 %v1344_v17 }
  0xa9   :  { %430 = vmatmul.f32.gmra.mxu0 %v300_v11  ;;  %619 = vst [vmem:[%s1888_s4 + $0x178] sm:$0xff] %v1344_v17 }
  0xad   :  { %v1356_v20 = vpop.f32.mrf.mxu2 }
  0xae   :  { %608 = vst [vmem:[%s1888_s4 + $0x120] sm:$0xff] %v1356_v20  ;;  %v1363_v23 = vpop.f32.mrf.mxu0 }
  0xaf   :  { %574 = vst [vmem:[%s1888_s4 + $0x10] sm:$0xff] %v1363_v23  ;;  %v1372_v25 = vpop.f32.mrf.mxu1  ;;  %v1374_v26 = vpop.f32.mrf.mxu3 }
  0xb0   :  { %596 = vst [vmem:[%s1888_s4 + $0xc0] sm:$0xff] %v1372_v25 }
  0xb1   :  { %433 = vmatmul.f32.gmra.mxu0 %v301_v21  ;;  %620 = vst [vmem:[%s1888_s4 + $0x180] sm:$0xff] %v1374_v26 }
  0xb5   :  { %v1385_v29 = vpop.f32.mrf.mxu2 }
  0xb6   :  { %609 = vst [vmem:[%s1888_s4 + $0x128] sm:$0xff] %v1385_v29  ;;  %v1392_v32 = vpop.f32.mrf.mxu0 }
  0xb7   :  { %575 = vst [vmem:[%s1888_s4 + $0x18] sm:$0xff] %v1392_v32  ;;  %v1401_v34 = vpop.f32.mrf.mxu1  ;;  %v1403_v35 = vpop.f32.mrf.mxu3 }
  0xb8   :  { %597 = vst [vmem:[%s1888_s4 + $0xc8] sm:$0xff] %v1401_v34 }
  0xb9   :  { %436 = vmatmul.f32.gmra.mxu0 %v302_v30  ;;  %621 = vst [vmem:[%s1888_s4 + $0x188] sm:$0xff] %v1403_v35 }
  0xbd   :  { %v1414_v38 = vpop.f32.mrf.mxu2 }
  0xbe   :  { %610 = vst [vmem:[%s1888_s4 + $0x130] sm:$0xff] %v1414_v38  ;;  %v1421_v41 = vpop.f32.mrf.mxu0 }
  0xbf   :  { %576 = vst [vmem:[%s1888_s4 + $0x20] sm:$0xff] %v1421_v41  ;;  %v1427_v42 = vpop.f32.mrf.mxu1  ;;  %v1429_v8 = vpop.f32.mrf.mxu3 }
  0xc0   :  { %598 = vst [vmem:[%s1888_s4 + $0xd0] sm:$0xff] %v1427_v42 }
  0xc1   :  { %439 = vmatmul.f32.gmra.mxu0 %v303_v39  ;;  %622 = vst [vmem:[%s1888_s4 + $0x190] sm:$0xff] %v1429_v8 }
  0xc5   :  { %v1439_v43 = vpop.f32.mrf.mxu2 }
  0xc6   :  { %611 = vst [vmem:[%s1888_s4 + $0x138] sm:$0xff] %v1439_v43  ;;  %v1445_v45 = vpop.f32.mrf.mxu0 }
  0xc7   :  { %577 = vst [vmem:[%s1888_s4 + $0x28] sm:$0xff] %v1445_v45  ;;  %v1451_v46 = vpop.f32.mrf.mxu1  ;;  %v1453_v47 = vpop.f32.mrf.mxu3 }
  0xc8   :  { %599 = vst [vmem:[%s1888_s4 + $0xd8] sm:$0xff] %v1451_v46  ;;  %v744_v15 = vmul.f32 %v1451_v46, %v1451_v46 }
  0xc9   :  { %442 = vmatmul.f32.gmra.mxu0 %v304_v44  ;;  %623 = vst [vmem:[%s1888_s4 + $0x198] sm:$0xff] %v1453_v47  ;;  %v743_v44 = vmul.f32 %v1427_v42, %v1427_v42 }
  0xcd   :  { %v1463_v48 = vpop.f32.mrf.mxu2 }
  0xce   :  { %612 = vst [vmem:[%s1888_s4 + $0x140] sm:$0xff] %v1463_v48  ;;  %v1469_v49 = vpop.f32.mrf.mxu0 }
  0xcf   :  { %578 = vst [vmem:[%s1888_s4 + $0x30] sm:$0xff] %v1469_v49  ;;  %v1475_v50 = vpop.f32.mrf.mxu1  ;;  %v1477_v51 = vpop.f32.mrf.mxu3 }
  0xd0   :  { %600 = vst [vmem:[%s1888_s4 + $0xe0] sm:$0xff] %v1475_v50  ;;  %v745_v39 = vmul.f32 %v1475_v50, %v1475_v50 }
  0xd1   :  { %624 = vst [vmem:[%s1888_s4 + $0x1a0] sm:$0xff] %v1477_v51 }
  0xd5   :  { %v1487_v52 = vpop.f32.mrf.mxu2 }
  0xd6   :  { %613 = vst [vmem:[%s1888_s4 + $0x148] sm:$0xff] %v1487_v52  ;;  %v1493_v53 = vpop.f32.mrf.mxu0 }
  0xd7   :  { %579 = vst [vmem:[%s1888_s4 + $0x38] sm:$0xff] %v1493_v53  ;;  %v1499_v54 = vpop.f32.mrf.mxu1  ;;  %v1501_v55 = vpop.f32.mrf.mxu3 }
  0xd8   :  { %601 = vst [vmem:[%s1888_s4 + $0xe8] sm:$0xff] %v1499_v54  ;;  %v746_v36 = vmul.f32 %v1499_v54, %v1499_v54 }
  0xd9   :  { %625 = vst [vmem:[%s1888_s4 + $0x1a8] sm:$0xff] %v1501_v55 }
  0xdd   :  { %v1511_v56 = vpop.f32.mrf.mxu2 }
  0xde   :  { %614 = vst [vmem:[%s1888_s4 + $0x150] sm:$0xff] %v1511_v56  ;;  %v1517_v57 = vpop.f32.mrf.mxu0 }
  0xdf   :  { %580 = vst [vmem:[%s1888_s4 + $0x40] sm:$0xff] %v1517_v57  ;;  %v1523_v58 = vpop.f32.mrf.mxu1  ;;  %v1525_v59 = vpop.f32.mrf.mxu3 }
  0xe0   :  { %602 = vst [vmem:[%s1888_s4 + $0xf0] sm:$0xff] %v1523_v58  ;;  %v747_v33 = vmul.f32 %v1523_v58, %v1523_v58 }
  0xe1   :  { %626 = vst [vmem:[%s1888_s4 + $0x1b0] sm:$0xff] %v1525_v59 }
  0xe5   :  { %v1535_v60 = vpop.f32.mrf.mxu2 }
  0xe6   :  { %615 = vst [vmem:[%s1888_s4 + $0x158] sm:$0xff] %v1535_v60  ;;  %v1541_v61 = vpop.f32.mrf.mxu0 }
  0xe7   :  { %581 = vst [vmem:[%s1888_s4 + $0x48] sm:$0xff] %v1541_v61  ;;  %v473_v62 = vpop.f32.mrf.mxu1  ;;  %v1547_v63 = vpop.f32.mrf.mxu3 }
  0xe8   :  { %603 = vst [vmem:[%s1888_s4 + $0xf8] sm:$0xff] %v473_v62  ;;  %656 = vmatpush.msrb.mxu2 %v473_v62  ;;  %v748_v30 = vmul.f32 %v473_v62, %v473_v62 }
  0xe9   :  { %627 = vst [vmem:[%s1888_s4 + $0x1b8] sm:$0xff] %v1547_v63 }
  0xea   :  { %657 = vmatpush.msrb.mxu2 %v1523_v58  ;;  %v741_v58 = vmul.f32 %v1372_v25, %v1372_v25 }
  0xec   :  { %658 = vmatpush.msrb.mxu2 %v1499_v54 }
  0xed   :  { %v1558_v0 = vpop.f32.mrf.mxu2 }
  0xee   :  { %616 = vst [vmem:[%s1888_s4 + $0x160] sm:$0xff] %v1558_v0  ;;  %659 = vmatpush.msrb.mxu2 %v1475_v50  ;;  %v1565_v1 = vpop.f32.mrf.mxu0  ;;  %v742_v50 = vmul.f32 %v1401_v34, %v1401_v34 }
  0xef   :  { %582 = vst [vmem:[%s1888_s4 + $0x50] sm:$0xff] %v1565_v1  ;;  %v1571_v2 = vpop.f32.mrf.mxu3  ;;  %v1573_v4 = vpop.f32.mrf.mxu1 }
  0xf0   :  { %660 = vmatpush.msrb.mxu2 %v1451_v46  ;;  %628 = vst [vmem:[%s1888_s4 + $0x1c0] sm:$0xff] %v1571_v2 }
  0xf1   :  { %604 = vst [vmem:[%s1888_s4 + $0x100] sm:$0xff] %v1573_v4 }
  0xf2   :  { %661 = vmatpush.msrb.mxu2 %v1427_v42 }
  0xf4   :  { %662 = vmatpush.msrb.mxu2 %v1401_v34  ;;  %v740_v34 = vmul.f32 %v1342_v16, %v1342_v16 }
  0xf5   :  { %v1586_v6 = vpop.f32.mrf.mxu2 }
  0xf6   :  { %617 = vst [vmem:[%s1888_s4 + $0x168] sm:$0xff] %v1586_v6  ;;  %663 = vmatpush.msrb.mxu2 %v1372_v25  ;;  %v1593_v7 = vpop.f32.mrf.mxu0  ;;  %v739_v25 = vmul.f32 %v1319_v5, %v1319_v5 }
  0xf7   :  { %583 = vst [vmem:[%s1888_s4 + $0x58] sm:$0xff] %v1593_v7  ;;  %v1599_v9 = vpop.f32.mrf.mxu3  ;;  %v1601_v11 = vpop.f32.mrf.mxu1 }
  0xf8   :  { %664 = vmatpush.msrb.mxu2 %v1342_v16  ;;  %629 = vst [vmem:[%s1888_s4 + $0x1c8] sm:$0xff] %v1599_v9 }
  0xf9   :  { %605 = vst [vmem:[%s1888_s4 + $0x108] sm:$0xff] %v1601_v11 }
  0xfa   :  { %665 = vmatpush.msrb.mxu2 %v1319_v5  ;;  %v921_v5 = vmov 1.0  }
  0xfd   :  { %v1613_v12 = vpop.f32.mrf.mxu2 }
  0xfe   :  { %618 = vst [vmem:[%s1888_s4 + $0x170] sm:$0xff] %v1613_v12  ;;  %677 = vmatpush.msrb.mxu3 %v1613_v12  ;;  %v1620_v14 = vpop.f32.mrf.mxu0 }
  0xff   :  { %584 = vst [vmem:[%s1888_s4 + $0x60] sm:$0xff] %v1620_v14  ;;  %v1626_v18 = vpop.f32.mrf.mxu3  ;;  %v1633_v19 = vpop.f32.mrf.mxu1 }
 0x100   :  { %678 = vmatpush.msrb.mxu3 %v1586_v6  ;;  %630 = vst [vmem:[%s1888_s4 + $0x1d0] sm:$0xff] %v1626_v18 }
 0x101   :  { %606 = vst [vmem:[%s1888_s4 + $0x110] sm:$0xff] %v1633_v19 }
 0x102   :  { %679 = vmatpush.msrb.mxu3 %v1558_v0 }
 0x104   :  { %680 = vmatpush.msrb.mxu3 %v1535_v60 }
 0x106   :  { %681 = vmatpush.msrb.mxu3 %v1511_v56  ;;  %v1642_v21 = vpop.f32.mrf.mxu0 }
 0x107   :  { %585 = vst [vmem:[%s1888_s4 + $0x68] sm:$0xff] %v1642_v21  ;;  %v1648_v22 = vpop.f32.mrf.mxu3 }
 0x108   :  { %682 = vmatpush.msrb.mxu3 %v1487_v52  ;;  %631 = vst [vmem:[%s1888_s4 + $0x1d8] sm:$0xff] %v1648_v22 }
 0x10a   :  { %683 = vmatpush.msrb.mxu3 %v1463_v48 }
 0x10c   :  { %684 = vmatpush.msrb.mxu3 %v1439_v43 }
 0x10e   :  { %685 = vmatpush.msrb.mxu3 %v1414_v38  ;;  %v1658_v24 = vpop.f32.mrf.mxu0 }
 0x10f   :  { %586 = vst [vmem:[%s1888_s4 + $0x70] sm:$0xff] %v1658_v24  ;;  %v1664_v27 = vpop.f32.mrf.mxu3 }
 0x110   :  { %686 = vmatpush.msrb.mxu3 %v1385_v29  ;;  %632 = vst [vmem:[%s1888_s4 + $0x1e0] sm:$0xff] %v1664_v27 }
 0x112   :  { %687 = vmatpush.msrb.mxu3 %v1356_v20 }
 0x114   :  { %688 = vmatpush.msrb.mxu3 %v1326_v10 }
 0x116   :  { %689 = vmatpush.msrb.mxu3 %v1633_v19  ;;  %v1674_v28 = vpop.f32.mrf.mxu0 }
 0x117   :  { %587 = vst [vmem:[%s1888_s4 + $0x78] sm:$0xff] %v1674_v28  ;;  %636 = vmatpush.msrb.mxu1 %v1674_v28  ;;  %v1681_v31 = vpop.f32.mrf.mxu3 }
 0x118   :  { %690 = vmatpush.msrb.mxu3 %v1601_v11  ;;  %633 = vst [vmem:[%s1888_s4 + $0x1e8] sm:$0xff] %v1681_v31 }
 0x119   :  { %637 = vmatpush.msrb.mxu1 %v1658_v24 }
 0x11a   :  { %691 = vmatpush.msrb.mxu3 %v1573_v4 }
 0x11b   :  { %638 = vmatpush.msrb.mxu1 %v1642_v21  ;;  %692 = vmatmul.f32.vlgmr.msrb.gmra.mxu3 %v921_v5 }
 0x11c   :  { %801 = vmatpush.msra.mxu3 %v748_v30 }
 0x11d   :  { %639 = vmatpush.msrb.mxu1 %v1620_v14 }
 0x11e   :  { %802 = vmatpush.msra.mxu3 %v747_v33  ;;  %v1696_v37 = vpop.f32.mrf.mxu0 }
 0x11f   :  { %588 = vst [vmem:[%s1888_s4 + $0x80] sm:$0xff] %v1696_v37  ;;  %640 = vmatpush.msrb.mxu1 %v1593_v7  ;;  %v1705_v40 = vpop.f32.mrf.mxu3 }
 0x120   :  { %803 = vmatpush.msra.mxu3 %v746_v36  ;;  %634 = vst [vmem:[%s1888_s4 + $0x1f0] sm:$0xff] %v1705_v40 }
 0x121   :  { %641 = vmatpush.msrb.mxu1 %v1565_v1 }
 0x122   :  { %804 = vmatpush.msra.mxu3 %v745_v39 }
 0x123   :  { %642 = vmatpush.msrb.mxu1 %v1541_v61 }
 0x124   :  { %805 = vmatpush.msra.mxu3 %v744_v15 }
 0x125   :  { %643 = vmatpush.msrb.mxu1 %v1517_v57 }
 0x126   :  { %806 = vmatpush.msra.mxu3 %v743_v44  ;;  %v431_v54 = vpop.f32.mrf.mxu0 }
 0x127   :  { %589 = vst [vmem:[%s1888_s4 + $0x88] sm:$0xff] %v431_v54  ;;  %644 = vmatpush.msrb.mxu1 %v1493_v53  ;;  %v1726_v42 = vpop.f32.mrf.mxu3  ;;  %v734_v44 = vmul.f32 %v431_v54, %v431_v54 }
 0x128   :  { %807 = vmatpush.msra.mxu3 %v742_v50  ;;  %635 = vst [vmem:[%s1888_s4 + $0x1f8] sm:$0xff] %v1726_v42  ;;  %v732_v50 = vmul.f32 %v1674_v28, %v1674_v28  ;;  %v730_v28 = vmul.f32 %v1642_v21, %v1642_v21  ;;  %v728_v21 = vmul.f32 %v1593_v7, %v1593_v7 }
 0x129   :  { %645 = vmatpush.msrb.mxu1 %v1469_v49  ;;  %v759_v7 = vmul.f32 %v1511_v56, %v1511_v56  ;;  %v723_v56 = vmul.f32 %v1469_v49, %v1469_v49  ;;  %v754_v49 = vmul.f32 %v1385_v29, %v1385_v29  ;;  %v718_v29 = vmul.f32 %v1333_v13, %v1333_v13 }
 0x12a   :  { %808 = vmatpush.msra.mxu3 %v741_v58  ;;  %v733_v58 = vmul.f32 %v1696_v37, %v1696_v37 }
 0x12b   :  { %646 = vmatpush.msrb.mxu1 %v1445_v45 }
 0x12c   :  { %809 = vmatpush.msra.mxu3 %v740_v34  ;;  %v731_v34 = vmul.f32 %v1658_v24, %v1658_v24  ;;  %v729_v24 = vmul.f32 %v1620_v14, %v1620_v14  ;;  %v760_v14 = vmul.f32 %v1535_v60, %v1535_v60  ;;  %v724_v60 = vmul.f32 %v1493_v53, %v1493_v53 }
 0x12d   :  { %647 = vmatpush.msrb.mxu1 %v1421_v41  ;;  %v755_v53 = vmul.f32 %v1414_v38, %v1414_v38  ;;  %v719_v38 = vmul.f32 %v1363_v23, %v1363_v23 }
 0x12e   :  { %810 = vmatpush.msra.mxu3 %v739_v25  ;;  %v434_v46 = vpop.f32.mrf.mxu0  ;;  %v727_v25 = vmul.f32 %v1565_v1, %v1565_v1  ;;  %v758_v1 = vmul.f32 %v1487_v52, %v1487_v52  ;;  %v722_v52 = vmul.f32 %v1445_v45, %v1445_v45  ;;  %v753_v45 = vmul.f32 %v1356_v20, %v1356_v20 }
 0x12f   :  { %590 = vst [vmem:[%s1888_s4 + $0x90] sm:$0xff] %v434_v46  ;;  %648 = vmatpush.msrb.mxu1 %v1392_v32  ;;  %v735_v15 = vmul.f32 %v434_v46, %v434_v46  ;;  %v717_v20 = vmul.f32 %v1310_v3, %v1310_v3 }
 0x131   :  { %649 = vmatpush.msrb.mxu1 %v1363_v23  ;;  %v750_v23 = vmul.f32 %v1601_v11, %v1601_v11  ;;  %v777_v11 = vmul.f32 %v1664_v27, %v1664_v27 }
 0x133   :  { %650 = vmatpush.msrb.mxu1 %v1333_v13  ;;  %v779_v13 = vmul.f32 %v1705_v40, %v1705_v40 }
 0x135   :  { %651 = vmatpush.msrb.mxu1 %v1310_v3  ;;  %v778_v3 = vmul.f32 %v1681_v31, %v1681_v31 }
 0x136   :  { %v437_v16 = vpop.f32.mrf.mxu0  ;;  %652 = vmatmul.f32.vlgmr.msrb.gmra.mxu1 %v921_v5 }
 0x137   :  { %696 = vmatpush.msra.mxu1 %v1726_v42  ;;  %591 = vst [vmem:[%s1888_s4 + $0x98] sm:$0xff] %v437_v16  ;;  %v736_v39 = vmul.f32 %v437_v16, %v437_v16 }
 0x139   :  { %697 = vmatpush.msra.mxu1 %v1705_v40  ;;  %v774_v40 = vmul.f32 %v1599_v9, %v1599_v9 }
 0x13b   :  { %698 = vmatpush.msra.mxu1 %v1681_v31  ;;  %v773_v31 = vmul.f32 %v1571_v2, %v1571_v2 }
 0x13d   :  { %699 = vmatpush.msra.mxu1 %v1664_v27  ;;  %v772_v27 = vmul.f32 %v1547_v63, %v1547_v63 }
 0x13e   :  { %v440_v62 = vpop.f32.mrf.mxu0 }
 0x13f   :  { %700 = vmatpush.msra.mxu1 %v1648_v22  ;;  %592 = vst [vmem:[%s1888_s4 + $0xa0] sm:$0xff] %v440_v62  ;;  %v737_v36 = vmul.f32 %v440_v62, %v440_v62 }
 0x141   :  { %701 = vmatpush.msra.mxu1 %v1626_v18 }
 0x143   :  { %702 = vmatpush.msra.mxu1 %v1599_v9  ;;  %v769_v9 = vmul.f32 %v1477_v51, %v1477_v51 }
 0x145   :  { %703 = vmatpush.msra.mxu1 %v1571_v2  ;;  %v768_v2 = vmul.f32 %v1453_v47, %v1453_v47 }
 0x146   :  { %v443_v30 = vpop.f32.mrf.mxu0 }
 0x147   :  { %704 = vmatpush.msra.mxu1 %v1547_v63  ;;  %593 = vst [vmem:[%s1888_s4 + $0xa8] sm:$0xff] %v443_v30  ;;  %v738_v33 = vmul.f32 %v443_v30, %v443_v30  ;;  %666 = vmatpush.msrb.mxu2 %v443_v30  ;;  %v767_v63 = vmul.f32 %v1429_v8, %v1429_v8 }
 0x149   :  { %705 = vmatpush.msra.mxu1 %v1525_v59  ;;  %667 = vmatpush.msrb.mxu2 %v440_v62 }
 0x14a   :  { %811 = vmatpush.msra.mxu3 %v738_v33 }
 0x14b   :  { %706 = vmatpush.msra.mxu1 %v1501_v55  ;;  %668 = vmatpush.msrb.mxu2 %v437_v16 }
 0x14c   :  { %812 = vmatpush.msra.mxu3 %v737_v36 }
 0x14d   :  { %707 = vmatpush.msra.mxu1 %v1477_v51  ;;  %669 = vmatpush.msrb.mxu2 %v434_v46  ;;  %v780_v46 = vmul.f32 %v1726_v42, %v1726_v42 }
 0x14e   :  { %813 = vmatpush.msra.mxu3 %v736_v39 }
 0x14f   :  { %708 = vmatpush.msra.mxu1 %v1453_v47  ;;  %670 = vmatpush.msrb.mxu2 %v431_v54  ;;  %v764_v54 = vmul.f32 %v1344_v17, %v1344_v17  ;;  %v762_v17 = vmul.f32 %v1586_v6, %v1586_v6  ;;  %v726_v6 = vmul.f32 %v1541_v61, %v1541_v61 }
 0x150   :  { %814 = vmatpush.msra.mxu3 %v735_v15  ;;  %v757_v61 = vmul.f32 %v1463_v48, %v1463_v48  ;;  %v721_v48 = vmul.f32 %v1421_v41, %v1421_v41  ;;  %v752_v41 = vmul.f32 %v1326_v10, %v1326_v10  ;;  %v749_v10 = vmul.f32 %v1573_v4, %v1573_v4 }
 0x151   :  { %709 = vmatpush.msra.mxu1 %v1429_v8  ;;  %671 = vmatpush.msrb.mxu2 %v1696_v37  ;;  %v763_v37 = vmul.f32 %v1613_v12, %v1613_v12  ;;  %v761_v12 = vmul.f32 %v1558_v0, %v1558_v0  ;;  %v725_v0 = vmul.f32 %v1517_v57, %v1517_v57 }
 0x152   :  { %815 = vmatpush.msra.mxu3 %v734_v44  ;;  %672 = vmatmul.f32.vlgmr.msrb.gmra.mxu2 %v921_v5  ;;  %v756_v57 = vmul.f32 %v1439_v43, %v1439_v43  ;;  %v720_v43 = vmul.f32 %v1392_v32, %v1392_v32  ;;  %v751_v32 = vmul.f32 %v1633_v19, %v1633_v19 }
 0x153   :  { %710 = vmatpush.msra.mxu1 %v1403_v35  ;;  %781 = vmatpush.msra.mxu2 %v732_v50  ;;  %v776_v4 = vmul.f32 %v1648_v22, %v1648_v22  ;;  %v775_v19 = vmul.f32 %v1626_v18, %v1626_v18  ;;  %v771_v22 = vmul.f32 %v1525_v59, %v1525_v59 }
 0x154   :  { %816 = vmatpush.msra.mxu3 %v733_v58  ;;  %v770_v18 = vmul.f32 %v1501_v55, %v1501_v55  ;;  %v766_v59 = vmul.f32 %v1403_v35, %v1403_v35  ;;  %v765_v55 = vmul.f32 %v1374_v26, %v1374_v26 }
 0x155   :  { %711 = vmatpush.msra.mxu1 %v1374_v26  ;;  %782 = vmatpush.msra.mxu2 %v731_v34 }
 0x156   :  { %817 = vmatmul.f32.vlgmr.msra.gmra.mxu3 %v921_v5  ;;  %712 = vmatmul.f32.vlgmr.msra.gmra.mxu1 %v921_v5 }
 0x157   :  { %821 = vmatpush.msrb.mxu1 %v764_v54  ;;  %783 = vmatpush.msra.mxu2 %v730_v28 }
 0x159   :  { %822 = vmatpush.msrb.mxu1 %v763_v37  ;;  %784 = vmatpush.msra.mxu2 %v729_v24 }
 0x15b   :  { %823 = vmatpush.msrb.mxu1 %v762_v17  ;;  %785 = vmatpush.msra.mxu2 %v728_v21 }
 0x15d   :  { %824 = vmatpush.msrb.mxu1 %v761_v12  ;;  %786 = vmatpush.msra.mxu2 %v727_v25 }
 0x15f   :  { %825 = vmatpush.msrb.mxu1 %v760_v14  ;;  %787 = vmatpush.msra.mxu2 %v726_v6 }
 0x161   :  { %826 = vmatpush.msrb.mxu1 %v759_v7  ;;  %788 = vmatpush.msra.mxu2 %v725_v0 }
 0x163   :  { %827 = vmatpush.msrb.mxu1 %v758_v1  ;;  %789 = vmatpush.msra.mxu2 %v724_v60 }
 0x165   :  { %828 = vmatpush.msrb.mxu1 %v757_v61  ;;  %790 = vmatpush.msra.mxu2 %v723_v56 }
 0x167   :  { %829 = vmatpush.msrb.mxu1 %v756_v57  ;;  %791 = vmatpush.msra.mxu2 %v722_v52 }
 0x169   :  { %830 = vmatpush.msrb.mxu1 %v755_v53  ;;  %792 = vmatpush.msra.mxu2 %v721_v48 }
 0x16b   :  { %831 = vmatpush.msrb.mxu1 %v754_v49  ;;  %793 = vmatpush.msra.mxu2 %v720_v43 }
 0x16d   :  { %832 = vmatpush.msrb.mxu1 %v753_v45  ;;  %794 = vmatpush.msra.mxu2 %v719_v38 }
 0x16f   :  { %833 = vmatpush.msrb.mxu1 %v752_v41  ;;  %795 = vmatpush.msra.mxu2 %v718_v29 }
 0x171   :  { %834 = vmatpush.msrb.mxu1 %v751_v32  ;;  %796 = vmatpush.msra.mxu2 %v717_v20 }
 0x172   :  { %797 = vmatmul.f32.vlgmr.msra.gmra.mxu2 %v921_v5 }
 0x173   :  { %835 = vmatpush.msrb.mxu1 %v750_v23  ;;  %841 = vmatpush.msrb.mxu2 %v780_v46 }
 0x175   :  { %836 = vmatpush.msrb.mxu1 %v749_v10  ;;  %842 = vmatpush.msrb.mxu2 %v779_v13 }
 0x176   :  { %837 = vmatmul.f32.vlgmr.msrb.gmra.mxu1 %v921_v5 }
 0x177   :  { %843 = vmatpush.msrb.mxu2 %v778_v3 }
 0x179   :  { %844 = vmatpush.msrb.mxu2 %v777_v11 }
 0x17b   :  { %845 = vmatpush.msrb.mxu2 %v776_v4 }
 0x17d   :  { %846 = vmatpush.msrb.mxu2 %v775_v19 }
 0x17f   :  { %847 = vmatpush.msrb.mxu2 %v774_v40 }
 0x181   :  { %848 = vmatpush.msrb.mxu2 %v773_v31 }
 0x183   :  { %849 = vmatpush.msrb.mxu2 %v772_v27 }
 0x185   :  { %850 = vmatpush.msrb.mxu2 %v771_v22 }
 0x187   :  { %851 = vmatpush.msrb.mxu2 %v770_v18 }
 0x189   :  { %852 = vmatpush.msrb.mxu2 %v769_v9 }
 0x18b   :  { %853 = vmatpush.msrb.mxu2 %v768_v2 }
 0x18d   :  { %854 = vmatpush.msrb.mxu2 %v767_v63 }
 0x18f   :  { %855 = vmatpush.msrb.mxu2 %v766_v59 }
 0x191   :  { %856 = vmatpush.msrb.mxu2 %v765_v55 }
 0x192   :  { %857 = vmatmul.f32.vlgmr.msrb.gmra.mxu2 %v921_v5 }
 0x19e   :  { %v693_v16 = vpop.f32.mrf.mxu3 }
 0x1b3   :  { %v653_v51 = vpop.f32.mrf.mxu1 }
 0x1d3   :  { %v713_v62 = vpop.f32.mrf.mxu1 }
 0x1d5   :  { %v673_v42 = vpop.f32.mrf.mxu2 }
 0x1d6   :  { %v674_v47 = vadd.f32 %v673_v42, %v653_v51 }
 0x1d8   :  { %v694_v30 = vadd.f32 %v693_v16, %v674_v47 }
 0x1d9   :  { %v818_v8 = vpop.f32.mrf.mxu3 }
 0x1da   :  { %v714_v33 = vadd.f32 %v713_v62, %v694_v30 }
 0x1dc   :  { %716 = vst [vmem:[%s1889_s5] sm:$0x1] %v714_v33 }
 0x1f3   :  { %v838_v39 = vpop.f32.mrf.mxu1 }
 0x1f5   :  { %v798_v35 = vpop.f32.mrf.mxu2 }
 0x1f6   :  { %v819_v36 = vadd.f32 %v818_v8, %v798_v35 }
 0x1f8   :  { %v839_v26 = vadd.f32 %v838_v39, %v819_v36 }
 0x215   :  { %v858_v15 = vpop.f32.mrf.mxu2 }
 0x216   :  { %v859_v44 = vadd.f32 %v858_v15, %v839_v26 }
 0x218   :  { %861 = vst [vmem:[%s1889_s5 + $0x1] sm:$0x1] %v859_v44 }

// kernel: block_forward.7
= control target key start
LH: loop header
LB: loop body
LE: loop exit
PB: predicated region body
PF: predicated region fallthrough
CT: control target
= control target key end

     0   :  { %vm487_vm0 = vcmask 64512   ;;  %s1511_s0 = inlined_call_operand.vmem [shape: f32[512,128], index: 0, kind: input, shape index: {}]   ;;  %s1512_s1 = inlined_call_operand.vmem [shape: f32[1,128], index: 1, kind: input, shape index: {}]   ;;  %s1513_s2 = inlined_call_operand.vmem [shape: f32[1,128], index: 2, kind: input, shape index: {}]   ;;  %s1514_s3 = inlined_call_operand.vmem [shape: f32[512,128], index: 3, kind: input, shape index: {}]   ;;  %s1515_s4 = inlined_call_operand.vmem [shape: f32[1,128], index: 4, kind: input, shape index: {}]   ;;  %s1516_s5 = inlined_call_operand.vmem [shape: f32[1,128], index: 5, kind: input, shape index: {}]   ;;  %s1517_s6 = inlined_call_operand.vmem [shape: f32[512,8], index: 6, kind: output, shape index: {}]  }
   0x1   :  { %v23_v0 = vld [vmem:[%s1511_s0] sm:$0xff]  ;;  %v24_v7 = vld [vmem:[%s1511_s0 + $0x8] sm:$0xff]  ;;  %v25_v13 = vld [vmem:[%s1511_s0 + $0x10] sm:$0xff] }
   0x2   :  { %v601_v1 = vld [vmem:[%s1512_s1] ss:$0 sm:$0xff]  ;;  %v224_v8 = vld [vmem:[%s1514_s3 + $0x8] sm:$0xff]  ;;  %v225_v14 = vld [vmem:[%s1514_s3 + $0x10] sm:$0xff] }
   0x3   :  { %v606_v2 = vld [vmem:[%s1513_s2] ss:$0 sm:$0xff]  ;;  %v91_v4 = vmul.f32 %v601_v1, %v23_v0  ;;  %v92_v11 = vmul.f32 %v601_v1, %v24_v7  ;;  %v26_v15 = vld [vmem:[%s1511_s0 + $0x18] sm:$0xff]  ;;  %v93_v16 = vmul.f32 %v601_v1, %v25_v13  ;;  %v28_v26 = vld [vmem:[%s1511_s0 + $0x28] sm:$0xff] }
   0x4   :  { %v223_v3 = vld [vmem:[%s1514_s3] sm:$0xff]  ;;  %v94_v18 = vmul.f32 %v601_v1, %v26_v15  ;;  %v226_v19 = vld [vmem:[%s1514_s3 + $0x18] sm:$0xff]  ;;  %v228_v27 = vld [vmem:[%s1514_s3 + $0x28] sm:$0xff]  ;;  %v96_v32 = vmul.f32 %v601_v1, %v28_v26 }
   0x5   :  { %v615_v5 = vld [vmem:[%s1515_s4] ss:$0 sm:$0xff]  ;;  %v159_v9 = vadd.f32 %v606_v2, %v91_v4  ;;  %v160_v23 = vadd.f32 %v606_v2, %v92_v11  ;;  %v29_v28 = vld [vmem:[%s1511_s0 + $0x30] sm:$0xff]  ;;  %v161_v29 = vadd.f32 %v606_v2, %v93_v16  ;;  %v30_v34 = vld [vmem:[%s1511_s0 + $0x38] sm:$0xff] }
   0x6   :  { %v620_v6 = vld [vmem:[%s1516_s5] ss:$0 sm:$0xff]  ;;  %v291_v10 = vmul.f32 %v615_v5, %v223_v3  ;;  %v292_v12 = vmul.f32 %v615_v5, %v224_v8  ;;  %v293_v17 = vmul.f32 %v615_v5, %v225_v14  ;;  %v294_v24 = vmul.f32 %v615_v5, %v226_v19  ;;  %v229_v33 = vld [vmem:[%s1514_s3 + $0x30] sm:$0xff]  ;;  %v230_v43 = vld [vmem:[%s1514_s3 + $0x38] sm:$0xff] }
   0x7   :  { %v27_v20 = vld [vmem:[%s1511_s0 + $0x20] sm:$0xff]  ;;  %v162_v30 = vadd.f32 %v606_v2, %v94_v18  ;;  %v296_v38 = vmul.f32 %v615_v5, %v228_v27  ;;  %v164_v41 = vadd.f32 %v606_v2, %v96_v32  ;;  %v97_v42 = vmul.f32 %v601_v1, %v29_v28  ;;  %v32_v50 = vld [vmem:[%s1511_s0 + $0x48] sm:$0xff]  ;;  %v33_v56 = vld [vmem:[%s1511_s0 + $0x50] sm:$0xff] }
   0x8   :  { %v227_v21 = vld [vmem:[%s1514_s3 + $0x20] sm:$0xff]  ;;  %v355_v22 = vadd.f32 %v291_v10, %v159_v9  ;;  %v95_v25 = vmul.f32 %v601_v1, %v27_v20  ;;  %v356_v36 = vadd.f32 %v292_v12, %v160_v23  ;;  %v357_v39 = vadd.f32 %v293_v17, %v161_v29  ;;  %v232_v55 = vld [vmem:[%s1514_s3 + $0x48] sm:$0xff]  ;;  %v233_v61 = vld [vmem:[%s1514_s3 + $0x50] sm:$0xff] }
   0x9   :  { %v295_v31 = vmul.f32 %v615_v5, %v227_v21  ;;  %v358_v40 = vadd.f32 %v294_v24, %v162_v30  ;;  %v31_v44 = vld [vmem:[%s1511_s0 + $0x40] sm:$0xff]  ;;  %v297_v47 = vmul.f32 %v615_v5, %v229_v33  ;;  %v98_v48 = vmul.f32 %v601_v1, %v30_v34  ;;  %v34_v62 = vld [vmem:[%s1511_s0 + $0x58] sm:$0xff]  ;;  %v36_v18 = vld [vmem:[%s1511_s0 + $0x68] sm:$0xff] }
   0xa   :  { %v423_v35 = vadd.f32 %v620_v6, %v355_v22  ;;  %v163_v37 = vadd.f32 %v606_v2, %v95_v25  ;;  %v424_v45 = vadd.f32 %v620_v6, %v356_v36  ;;  %v231_v49 = vld [vmem:[%s1514_s3 + $0x40] sm:$0xff]  ;;  %v425_v51 = vadd.f32 %v620_v6, %v357_v39  ;;  %v234_v7 = vld [vmem:[%s1514_s3 + $0x58] sm:$0xff]  ;;  %v236_v19 = vld [vmem:[%s1514_s3 + $0x68] sm:$0xff] }
   0xb   :  { %v426_v52 = vadd.f32 %v620_v6, %v358_v40  ;;  %v360_v53 = vadd.f32 %v296_v38, %v164_v41  ;;  %v165_v54 = vadd.f32 %v606_v2, %v97_v42  ;;  %v166_v58 = vadd.f32 %v606_v2, %v98_v48  ;;  %v35_v12 = vld [vmem:[%s1511_s0 + $0x60] sm:$0xff]  ;;  %v37_v24 = vld [vmem:[%s1511_s0 + $0x70] sm:$0xff]  ;;  %v38_v30 = vld [vmem:[%s1511_s0 + $0x78] sm:$0xff] }
   0xc   :  { %488 = vst.msk [vmem:[%s1517_s6] sm:$0xff] %vm487_vm0, %v423_v35  ;;  %v359_v46 = vadd.f32 %v295_v31, %v163_v37  ;;  %v298_v59 = vmul.f32 %v615_v5, %v230_v43  ;;  %v99_v60 = vmul.f32 %v601_v1, %v31_v44  ;;  %v299_v3 = vmul.f32 %v615_v5, %v231_v49  ;;  %v235_v13 = vld [vmem:[%s1514_s3 + $0x60] sm:$0xff]  ;;  %v237_v29 = vld [vmem:[%s1514_s3 + $0x70] sm:$0xff]  ;;  %v238_v35 = vld [vmem:[%s1514_s3 + $0x78] sm:$0xff] }
   0xd   :  { %489 = vst.msk [vmem:[%s1517_s6 + $0x8] sm:$0xff] %vm487_vm0, %v424_v45  ;;  %v428_v63 = vadd.f32 %v620_v6, %v360_v53  ;;  %v361_v0 = vadd.f32 %v297_v47, %v165_v54  ;;  %v100_v4 = vmul.f32 %v601_v1, %v32_v50  ;;  %v300_v10 = vmul.f32 %v615_v5, %v232_v55  ;;  %v39_v40 = vld [vmem:[%s1511_s0 + $0x80] sm:$0xff]  ;;  %v240_v47 = vld [vmem:[%s1514_s3 + $0x88] sm:$0xff] }
   0xe   :  { %v427_v57 = vadd.f32 %v620_v6, %v359_v46  ;;  %490 = vst.msk [vmem:[%s1517_s6 + $0x10] sm:$0xff] %vm487_vm0, %v425_v51  ;;  %v362_v8 = vadd.f32 %v298_v59, %v166_v58  ;;  %v167_v9 = vadd.f32 %v606_v2, %v99_v60  ;;  %v101_v11 = vmul.f32 %v601_v1, %v33_v56  ;;  %v239_v41 = vld [vmem:[%s1514_s3 + $0x80] sm:$0xff]  ;;  %v40_v46 = vld [vmem:[%s1511_s0 + $0x88] sm:$0xff]  ;;  %v42_v58 = vld [vmem:[%s1511_s0 + $0x98] sm:$0xff] }
   0xf   :  { %491 = vst.msk [vmem:[%s1517_s6 + $0x18] sm:$0xff] %vm487_vm0, %v426_v52  ;;  %v429_v14 = vadd.f32 %v620_v6, %v361_v0  ;;  %v168_v15 = vadd.f32 %v606_v2, %v100_v4  ;;  %v301_v16 = vmul.f32 %v615_v5, %v233_v61  ;;  %v102_v17 = vmul.f32 %v601_v1, %v34_v62  ;;  %v41_v52 = vld [vmem:[%s1511_s0 + $0x90] sm:$0xff] }
  0x10   :  { %492 = vst.msk [vmem:[%s1517_s6 + $0x20] sm:$0xff] %vm487_vm0, %v427_v57  ;;  %v430_v20 = vadd.f32 %v620_v6, %v362_v8  ;;  %v363_v21 = vadd.f32 %v299_v3, %v167_v9  ;;  %v169_v22 = vadd.f32 %v606_v2, %v101_v11  ;;  %v302_v23 = vmul.f32 %v615_v5, %v234_v7  ;;  %v241_v57 = vld [vmem:[%s1514_s3 + $0x90] sm:$0xff]  ;;  %v43_v8 = vld [vmem:[%s1511_s0 + $0xa0] sm:$0xff] }
  0x11   :  { %493 = vst.msk [vmem:[%s1517_s6 + $0x28] sm:$0xff] %vm487_vm0, %v428_v63  ;;  %v364_v25 = vadd.f32 %v300_v10, %v168_v15  ;;  %v170_v26 = vadd.f32 %v606_v2, %v102_v17  ;;  %v103_v27 = vmul.f32 %v601_v1, %v35_v12  ;;  %v303_v28 = vmul.f32 %v615_v5, %v235_v13  ;;  %v242_v63 = vld [vmem:[%s1514_s3 + $0x98] sm:$0xff]  ;;  %v243_v9 = vld [vmem:[%s1514_s3 + $0xa0] sm:$0xff]  ;;  %v244_v15 = vld [vmem:[%s1514_s3 + $0xa8] sm:$0xff] }
  0x12   :  { %494 = vst.msk [vmem:[%s1517_s6 + $0x30] sm:$0xff] %vm487_vm0, %v429_v14  ;;  %v431_v31 = vadd.f32 %v620_v6, %v363_v21  ;;  %v365_v32 = vadd.f32 %v301_v16, %v169_v22  ;;  %v104_v33 = vmul.f32 %v601_v1, %v36_v18  ;;  %v304_v34 = vmul.f32 %v615_v5, %v236_v19  ;;  %v44_v14 = vld [vmem:[%s1511_s0 + $0xa8] sm:$0xff] }
  0x13   :  { %495 = vst.msk [vmem:[%s1517_s6 + $0x38] sm:$0xff] %vm487_vm0, %v430_v20  ;;  %v432_v36 = vadd.f32 %v620_v6, %v364_v25  ;;  %v366_v37 = vadd.f32 %v302_v23, %v170_v26  ;;  %v171_v38 = vadd.f32 %v606_v2, %v103_v27  ;;  %v105_v39 = vmul.f32 %v601_v1, %v37_v24  ;;  %v45_v20 = vld [vmem:[%s1511_s0 + $0xb0] sm:$0xff]  ;;  %v46_v26 = vld [vmem:[%s1511_s0 + $0xb8] sm:$0xff] }
  0x14   :  { %496 = vst.msk [vmem:[%s1517_s6 + $0x40] sm:$0xff] %vm487_vm0, %v431_v31  ;;  %v433_v42 = vadd.f32 %v620_v6, %v365_v32  ;;  %v172_v43 = vadd.f32 %v606_v2, %v104_v33  ;;  %v305_v44 = vmul.f32 %v615_v5, %v237_v29  ;;  %v106_v45 = vmul.f32 %v601_v1, %v38_v30  ;;  %v245_v25 = vld [vmem:[%s1514_s3 + $0xb0] sm:$0xff]  ;;  %v246_v31 = vld [vmem:[%s1514_s3 + $0xb8] sm:$0xff] }
  0x15   :  { %497 = vst.msk [vmem:[%s1517_s6 + $0x48] sm:$0xff] %vm487_vm0, %v432_v36  ;;  %v434_v48 = vadd.f32 %v620_v6, %v366_v37  ;;  %v367_v49 = vadd.f32 %v303_v28, %v171_v38  ;;  %v173_v50 = vadd.f32 %v606_v2, %v105_v39  ;;  %v306_v51 = vmul.f32 %v615_v5, %v238_v35  ;;  %v47_v36 = vld [vmem:[%s1511_s0 + $0xc0] sm:$0xff] }
  0x16   :  { %498 = vst.msk [vmem:[%s1517_s6 + $0x50] sm:$0xff] %vm487_vm0, %v433_v42  ;;  %v368_v53 = vadd.f32 %v304_v34, %v172_v43  ;;  %v174_v54 = vadd.f32 %v606_v2, %v106_v45  ;;  %v107_v55 = vmul.f32 %v601_v1, %v39_v40  ;;  %v307_v56 = vmul.f32 %v615_v5, %v239_v41  ;;  %v247_v37 = vld [vmem:[%s1514_s3 + $0xc0] sm:$0xff]  ;;  %v48_v42 = vld [vmem:[%s1511_s0 + $0xc8] sm:$0xff] }
  0x17   :  { %499 = vst.msk [vmem:[%s1517_s6 + $0x58] sm:$0xff] %vm487_vm0, %v434_v48  ;;  %v435_v59 = vadd.f32 %v620_v6, %v367_v49  ;;  %v369_v60 = vadd.f32 %v305_v44, %v173_v50  ;;  %v108_v61 = vmul.f32 %v601_v1, %v40_v46  ;;  %v308_v62 = vmul.f32 %v615_v5, %v240_v47  ;;  %v248_v43 = vld [vmem:[%s1514_s3 + $0xc8] sm:$0xff]  ;;  %v49_v48 = vld [vmem:[%s1511_s0 + $0xd0] sm:$0xff] }
  0x18   :  { %v436_v0 = vadd.f32 %v620_v6, %v368_v53  ;;  %v370_v3 = vadd.f32 %v306_v51, %v174_v54  ;;  %v175_v4 = vadd.f32 %v606_v2, %v107_v55  ;;  %v109_v7 = vmul.f32 %v601_v1, %v41_v52  ;;  %v249_v53 = vld [vmem:[%s1514_s3 + $0xd0] sm:$0xff]  ;;  %v50_v54 = vld [vmem:[%s1511_s0 + $0xd8] sm:$0xff] }
  0x19   :  { %500 = vst.msk [vmem:[%s1517_s6 + $0x60] sm:$0xff] %vm487_vm0, %v435_v59  ;;  %v437_v10 = vadd.f32 %v620_v6, %v369_v60  ;;  %v176_v11 = vadd.f32 %v606_v2, %v108_v61  ;;  %v309_v12 = vmul.f32 %v615_v5, %v241_v57  ;;  %v110_v13 = vmul.f32 %v601_v1, %v42_v58  ;;  %v250_v59 = vld [vmem:[%s1514_s3 + $0xd8] sm:$0xff] }
  0x1a   :  { %501 = vst.msk [vmem:[%s1517_s6 + $0x68] sm:$0xff] %vm487_vm0, %v436_v0  ;;  %v438_v16 = vadd.f32 %v620_v6, %v370_v3  ;;  %v371_v17 = vadd.f32 %v307_v56, %v175_v4  ;;  %v177_v18 = vadd.f32 %v606_v2, %v109_v7  ;;  %v310_v19 = vmul.f32 %v615_v5, %v242_v63  ;;  %v51_v0 = vld [vmem:[%s1511_s0 + $0xe0] sm:$0xff] }
  0x1b   :  { %502 = vst.msk [vmem:[%s1517_s6 + $0x70] sm:$0xff] %vm487_vm0, %v437_v10  ;;  %v372_v21 = vadd.f32 %v308_v62, %v176_v11  ;;  %v178_v22 = vadd.f32 %v606_v2, %v110_v13  ;;  %v111_v23 = vmul.f32 %v601_v1, %v43_v8  ;;  %v311_v24 = vmul.f32 %v615_v5, %v243_v9  ;;  %v251_v3 = vld [vmem:[%s1514_s3 + $0xe0] sm:$0xff]  ;;  %v52_v10 = vld [vmem:[%s1511_s0 + $0xe8] sm:$0xff] }
  0x1c   :  { %503 = vst.msk [vmem:[%s1517_s6 + $0x78] sm:$0xff] %vm487_vm0, %v438_v16  ;;  %v439_v27 = vadd.f32 %v620_v6, %v371_v17  ;;  %v373_v28 = vadd.f32 %v309_v12, %v177_v18  ;;  %v112_v29 = vmul.f32 %v601_v1, %v44_v14  ;;  %v312_v30 = vmul.f32 %v615_v5, %v244_v15  ;;  %v252_v11 = vld [vmem:[%s1514_s3 + $0xe8] sm:$0xff]  ;;  %v53_v16 = vld [vmem:[%s1511_s0 + $0xf0] sm:$0xff] }
  0x1d   :  { %v440_v32 = vadd.f32 %v620_v6, %v372_v21  ;;  %v374_v33 = vadd.f32 %v310_v19, %v178_v22  ;;  %v179_v34 = vadd.f32 %v606_v2, %v111_v23  ;;  %v113_v35 = vmul.f32 %v601_v1, %v45_v20  ;;  %v253_v21 = vld [vmem:[%s1514_s3 + $0xf0] sm:$0xff]  ;;  %v54_v22 = vld [vmem:[%s1511_s0 + $0xf8] sm:$0xff] }
  0x1e   :  { %504 = vst.msk [vmem:[%s1517_s6 + $0x80] sm:$0xff] %vm487_vm0, %v439_v27  ;;  %v441_v38 = vadd.f32 %v620_v6, %v373_v28  ;;  %v180_v39 = vadd.f32 %v606_v2, %v112_v29  ;;  %v313_v40 = vmul.f32 %v615_v5, %v245_v25  ;;  %v114_v41 = vmul.f32 %v601_v1, %v46_v26  ;;  %v254_v27 = vld [vmem:[%s1514_s3 + $0xf8] sm:$0xff] }
  0x1f   :  { %505 = vst.msk [vmem:[%s1517_s6 + $0x88] sm:$0xff] %vm487_vm0, %v440_v32  ;;  %v442_v44 = vadd.f32 %v620_v6, %v374_v33  ;;  %v375_v45 = vadd.f32 %v311_v24, %v179_v34  ;;  %v181_v46 = vadd.f32 %v606_v2, %v113_v35  ;;  %v314_v47 = vmul.f32 %v615_v5, %v246_v31  ;;  %v55_v32 = vld [vmem:[%s1511_s0 + $0x100] sm:$0xff] }
  0x20   :  { %506 = vst.msk [vmem:[%s1517_s6 + $0x90] sm:$0xff] %vm487_vm0, %v441_v38  ;;  %v376_v49 = vadd.f32 %v312_v30, %v180_v39  ;;  %v182_v50 = vadd.f32 %v606_v2, %v114_v41  ;;  %v115_v51 = vmul.f32 %v601_v1, %v47_v36  ;;  %v315_v52 = vmul.f32 %v615_v5, %v247_v37  ;;  %v255_v33 = vld [vmem:[%s1514_s3 + $0x100] sm:$0xff]  ;;  %v56_v38 = vld [vmem:[%s1511_s0 + $0x108] sm:$0xff] }
  0x21   :  { %507 = vst.msk [vmem:[%s1517_s6 + $0x98] sm:$0xff] %vm487_vm0, %v442_v44  ;;  %v443_v55 = vadd.f32 %v620_v6, %v375_v45  ;;  %v377_v56 = vadd.f32 %v313_v40, %v181_v46  ;;  %v116_v57 = vmul.f32 %v601_v1, %v48_v42  ;;  %v316_v58 = vmul.f32 %v615_v5, %v248_v43  ;;  %v256_v39 = vld [vmem:[%s1514_s3 + $0x108] sm:$0xff]  ;;  %v57_v44 = vld [vmem:[%s1511_s0 + $0x110] sm:$0xff] }
  0x22   :  { %v444_v60 = vadd.f32 %v620_v6, %v376_v49  ;;  %v378_v61 = vadd.f32 %v314_v47, %v182_v50  ;;  %v183_v62 = vadd.f32 %v606_v2, %v115_v51  ;;  %v117_v63 = vmul.f32 %v601_v1, %v49_v48  ;;  %v257_v49 = vld [vmem:[%s1514_s3 + $0x110] sm:$0xff]  ;;  %v58_v50 = vld [vmem:[%s1511_s0 + $0x118] sm:$0xff] }
  0x23   :  { %508 = vst.msk [vmem:[%s1517_s6 + $0xa0] sm:$0xff] %vm487_vm0, %v443_v55  ;;  %v445_v4 = vadd.f32 %v620_v6, %v377_v56  ;;  %v184_v7 = vadd.f32 %v606_v2, %v116_v57  ;;  %v317_v8 = vmul.f32 %v615_v5, %v249_v53  ;;  %v118_v9 = vmul.f32 %v601_v1, %v50_v54  ;;  %v258_v55 = vld [vmem:[%s1514_s3 + $0x118] sm:$0xff] }
  0x24   :  { %509 = vst.msk [vmem:[%s1517_s6 + $0xa8] sm:$0xff] %vm487_vm0, %v444_v60  ;;  %v446_v12 = vadd.f32 %v620_v6, %v378_v61  ;;  %v379_v13 = vadd.f32 %v315_v52, %v183_v62  ;;  %v185_v14 = vadd.f32 %v606_v2, %v117_v63  ;;  %v318_v15 = vmul.f32 %v615_v5, %v250_v59  ;;  %v59_v60 = vld [vmem:[%s1511_s0 + $0x120] sm:$0xff] }
  0x25   :  { %510 = vst.msk [vmem:[%s1517_s6 + $0xb0] sm:$0xff] %vm487_vm0, %v445_v4  ;;  %v380_v17 = vadd.f32 %v316_v58, %v184_v7  ;;  %v186_v18 = vadd.f32 %v606_v2, %v118_v9  ;;  %v119_v19 = vmul.f32 %v601_v1, %v51_v0  ;;  %v319_v20 = vmul.f32 %v615_v5, %v251_v3  ;;  %v259_v61 = vld [vmem:[%s1514_s3 + $0x120] sm:$0xff]  ;;  %v60_v4 = vld [vmem:[%s1511_s0 + $0x128] sm:$0xff] }
  0x26   :  { %511 = vst.msk [vmem:[%s1517_s6 + $0xb8] sm:$0xff] %vm487_vm0, %v446_v12  ;;  %v447_v23 = vadd.f32 %v620_v6, %v379_v13  ;;  %v381_v24 = vadd.f32 %v317_v8, %v185_v14  ;;  %v120_v25 = vmul.f32 %v601_v1, %v52_v10  ;;  %v320_v26 = vmul.f32 %v615_v5, %v252_v11  ;;  %v260_v7 = vld [vmem:[%s1514_s3 + $0x128] sm:$0xff]  ;;  %v61_v12 = vld [vmem:[%s1511_s0 + $0x130] sm:$0xff] }
  0x27   :  { %v448_v28 = vadd.f32 %v620_v6, %v380_v17  ;;  %v382_v29 = vadd.f32 %v318_v15, %v186_v18  ;;  %v187_v30 = vadd.f32 %v606_v2, %v119_v19  ;;  %v121_v31 = vmul.f32 %v601_v1, %v53_v16  ;;  %v261_v17 = vld [vmem:[%s1514_s3 + $0x130] sm:$0xff]  ;;  %v62_v18 = vld [vmem:[%s1511_s0 + $0x138] sm:$0xff] }
  0x28   :  { %512 = vst.msk [vmem:[%s1517_s6 + $0xc0] sm:$0xff] %vm487_vm0, %v447_v23  ;;  %v449_v34 = vadd.f32 %v620_v6, %v381_v24  ;;  %v188_v35 = vadd.f32 %v606_v2, %v120_v25  ;;  %v321_v36 = vmul.f32 %v615_v5, %v253_v21  ;;  %v122_v37 = vmul.f32 %v601_v1, %v54_v22  ;;  %v262_v23 = vld [vmem:[%s1514_s3 + $0x138] sm:$0xff] }
  0x29   :  { %513 = vst.msk [vmem:[%s1517_s6 + $0xc8] sm:$0xff] %vm487_vm0, %v448_v28  ;;  %v450_v40 = vadd.f32 %v620_v6, %v382_v29  ;;  %v383_v41 = vadd.f32 %v319_v20, %v187_v30  ;;  %v189_v42 = vadd.f32 %v606_v2, %v121_v31  ;;  %v322_v43 = vmul.f32 %v615_v5, %v254_v27  ;;  %v63_v28 = vld [vmem:[%s1511_s0 + $0x140] sm:$0xff] }
  0x2a   :  { %514 = vst.msk [vmem:[%s1517_s6 + $0xd0] sm:$0xff] %vm487_vm0, %v449_v34  ;;  %v384_v45 = vadd.f32 %v320_v26, %v188_v35  ;;  %v190_v46 = vadd.f32 %v606_v2, %v122_v37  ;;  %v123_v47 = vmul.f32 %v601_v1, %v55_v32  ;;  %v323_v48 = vmul.f32 %v615_v5, %v255_v33  ;;  %v263_v29 = vld [vmem:[%s1514_s3 + $0x140] sm:$0xff]  ;;  %v64_v34 = vld [vmem:[%s1511_s0 + $0x148] sm:$0xff] }
  0x2b   :  { %515 = vst.msk [vmem:[%s1517_s6 + $0xd8] sm:$0xff] %vm487_vm0, %v450_v40  ;;  %v451_v51 = vadd.f32 %v620_v6, %v383_v41  ;;  %v385_v52 = vadd.f32 %v321_v36, %v189_v42  ;;  %v124_v53 = vmul.f32 %v601_v1, %v56_v38  ;;  %v324_v54 = vmul.f32 %v615_v5, %v256_v39  ;;  %v264_v35 = vld [vmem:[%s1514_s3 + $0x148] sm:$0xff]  ;;  %v65_v40 = vld [vmem:[%s1511_s0 + $0x150] sm:$0xff] }
  0x2c   :  { %v452_v56 = vadd.f32 %v620_v6, %v384_v45  ;;  %v386_v57 = vadd.f32 %v322_v43, %v190_v46  ;;  %v191_v58 = vadd.f32 %v606_v2, %v123_v47  ;;  %v125_v59 = vmul.f32 %v601_v1, %v57_v44  ;;  %v265_v45 = vld [vmem:[%s1514_s3 + $0x150] sm:$0xff]  ;;  %v66_v46 = vld [vmem:[%s1511_s0 + $0x158] sm:$0xff] }
  0x2d   :  { %516 = vst.msk [vmem:[%s1517_s6 + $0xe0] sm:$0xff] %vm487_vm0, %v451_v51  ;;  %v453_v62 = vadd.f32 %v620_v6, %v385_v52  ;;  %v192_v63 = vadd.f32 %v606_v2, %v124_v53  ;;  %v325_v0 = vmul.f32 %v615_v5, %v257_v49  ;;  %v126_v3 = vmul.f32 %v601_v1, %v58_v50  ;;  %v266_v51 = vld [vmem:[%s1514_s3 + $0x158] sm:$0xff] }
  0x2e   :  { %517 = vst.msk [vmem:[%s1517_s6 + $0xe8] sm:$0xff] %vm487_vm0, %v452_v56  ;;  %v454_v8 = vadd.f32 %v620_v6, %v386_v57  ;;  %v387_v9 = vadd.f32 %v323_v48, %v191_v58  ;;  %v193_v10 = vadd.f32 %v606_v2, %v125_v59  ;;  %v326_v11 = vmul.f32 %v615_v5, %v258_v55  ;;  %v67_v56 = vld [vmem:[%s1511_s0 + $0x160] sm:$0xff] }
  0x2f   :  { %518 = vst.msk [vmem:[%s1517_s6 + $0xf0] sm:$0xff] %vm487_vm0, %v453_v62  ;;  %v388_v13 = vadd.f32 %v324_v54, %v192_v63  ;;  %v194_v14 = vadd.f32 %v606_v2, %v126_v3  ;;  %v127_v15 = vmul.f32 %v601_v1, %v59_v60  ;;  %v327_v16 = vmul.f32 %v615_v5, %v259_v61  ;;  %v267_v57 = vld [vmem:[%s1514_s3 + $0x160] sm:$0xff]  ;;  %v68_v62 = vld [vmem:[%s1511_s0 + $0x168] sm:$0xff] }
  0x30   :  { %519 = vst.msk [vmem:[%s1517_s6 + $0xf8] sm:$0xff] %vm487_vm0, %v454_v8  ;;  %v455_v19 = vadd.f32 %v620_v6, %v387_v9  ;;  %v389_v20 = vadd.f32 %v325_v0, %v193_v10  ;;  %v128_v21 = vmul.f32 %v601_v1, %v60_v4  ;;  %v328_v22 = vmul.f32 %v615_v5, %v260_v7  ;;  %v268_v63 = vld [vmem:[%s1514_s3 + $0x168] sm:$0xff]  ;;  %v69_v8 = vld [vmem:[%s1511_s0 + $0x170] sm:$0xff] }
  0x31   :  { %v456_v24 = vadd.f32 %v620_v6, %v388_v13  ;;  %v390_v25 = vadd.f32 %v326_v11, %v194_v14  ;;  %v195_v26 = vadd.f32 %v606_v2, %v127_v15  ;;  %v129_v27 = vmul.f32 %v601_v1, %v61_v12  ;;  %v269_v13 = vld [vmem:[%s1514_s3 + $0x170] sm:$0xff]  ;;  %v70_v14 = vld [vmem:[%s1511_s0 + $0x178] sm:$0xff] }
  0x32   :  { %520 = vst.msk [vmem:[%s1517_s6 + $0x100] sm:$0xff] %vm487_vm0, %v455_v19  ;;  %v457_v30 = vadd.f32 %v620_v6, %v389_v20  ;;  %v196_v31 = vadd.f32 %v606_v2, %v128_v21  ;;  %v329_v32 = vmul.f32 %v615_v5, %v261_v17  ;;  %v130_v33 = vmul.f32 %v601_v1, %v62_v18  ;;  %v270_v19 = vld [vmem:[%s1514_s3 + $0x178] sm:$0xff] }
  0x33   :  { %521 = vst.msk [vmem:[%s1517_s6 + $0x108] sm:$0xff] %vm487_vm0, %v456_v24  ;;  %v458_v36 = vadd.f32 %v620_v6, %v390_v25  ;;  %v391_v37 = vadd.f32 %v327_v16, %v195_v26  ;;  %v197_v38 = vadd.f32 %v606_v2, %v129_v27  ;;  %v330_v39 = vmul.f32 %v615_v5, %v262_v23  ;;  %v71_v24 = vld [vmem:[%s1511_s0 + $0x180] sm:$0xff] }
  0x34   :  { %522 = vst.msk [vmem:[%s1517_s6 + $0x110] sm:$0xff] %vm487_vm0, %v457_v30  ;;  %v392_v41 = vadd.f32 %v328_v22, %v196_v31  ;;  %v198_v42 = vadd.f32 %v606_v2, %v130_v33  ;;  %v131_v43 = vmul.f32 %v601_v1, %v63_v28  ;;  %v331_v44 = vmul.f32 %v615_v5, %v263_v29  ;;  %v271_v25 = vld [vmem:[%s1514_s3 + $0x180] sm:$0xff]  ;;  %v72_v30 = vld [vmem:[%s1511_s0 + $0x188] sm:$0xff] }
  0x35   :  { %523 = vst.msk [vmem:[%s1517_s6 + $0x118] sm:$0xff] %vm487_vm0, %v458_v36  ;;  %v459_v47 = vadd.f32 %v620_v6, %v391_v37  ;;  %v393_v48 = vadd.f32 %v329_v32, %v197_v38  ;;  %v132_v49 = vmul.f32 %v601_v1, %v64_v34  ;;  %v332_v50 = vmul.f32 %v615_v5, %v264_v35  ;;  %v272_v31 = vld [vmem:[%s1514_s3 + $0x188] sm:$0xff]  ;;  %v73_v36 = vld [vmem:[%s1511_s0 + $0x190] sm:$0xff] }
  0x36   :  { %v460_v52 = vadd.f32 %v620_v6, %v392_v41  ;;  %v394_v53 = vadd.f32 %v330_v39, %v198_v42  ;;  %v199_v54 = vadd.f32 %v606_v2, %v131_v43  ;;  %v133_v55 = vmul.f32 %v601_v1, %v65_v40  ;;  %v273_v41 = vld [vmem:[%s1514_s3 + $0x190] sm:$0xff]  ;;  %v74_v42 = vld [vmem:[%s1511_s0 + $0x198] sm:$0xff] }
  0x37   :  { %524 = vst.msk [vmem:[%s1517_s6 + $0x120] sm:$0xff] %vm487_vm0, %v459_v47  ;;  %v461_v58 = vadd.f32 %v620_v6, %v393_v48  ;;  %v200_v59 = vadd.f32 %v606_v2, %v132_v49  ;;  %v333_v60 = vmul.f32 %v615_v5, %v265_v45  ;;  %v134_v61 = vmul.f32 %v601_v1, %v66_v46  ;;  %v274_v47 = vld [vmem:[%s1514_s3 + $0x198] sm:$0xff] }
  0x38   :  { %525 = vst.msk [vmem:[%s1517_s6 + $0x128] sm:$0xff] %vm487_vm0, %v460_v52  ;;  %v462_v0 = vadd.f32 %v620_v6, %v394_v53  ;;  %v395_v3 = vadd.f32 %v331_v44, %v199_v54  ;;  %v201_v4 = vadd.f32 %v606_v2, %v133_v55  ;;  %v334_v7 = vmul.f32 %v615_v5, %v266_v51  ;;  %v75_v52 = vld [vmem:[%s1511_s0 + $0x1a0] sm:$0xff] }
  0x39   :  { %526 = vst.msk [vmem:[%s1517_s6 + $0x130] sm:$0xff] %vm487_vm0, %v461_v58  ;;  %v396_v9 = vadd.f32 %v332_v50, %v200_v59  ;;  %v202_v10 = vadd.f32 %v606_v2, %v134_v61  ;;  %v135_v11 = vmul.f32 %v601_v1, %v67_v56  ;;  %v335_v12 = vmul.f32 %v615_v5, %v267_v57  ;;  %v275_v53 = vld [vmem:[%s1514_s3 + $0x1a0] sm:$0xff]  ;;  %v76_v58 = vld [vmem:[%s1511_s0 + $0x1a8] sm:$0xff] }
  0x3a   :  { %527 = vst.msk [vmem:[%s1517_s6 + $0x138] sm:$0xff] %vm487_vm0, %v462_v0  ;;  %v463_v15 = vadd.f32 %v620_v6, %v395_v3  ;;  %v397_v16 = vadd.f32 %v333_v60, %v201_v4  ;;  %v136_v17 = vmul.f32 %v601_v1, %v68_v62  ;;  %v336_v18 = vmul.f32 %v615_v5, %v268_v63  ;;  %v276_v59 = vld [vmem:[%s1514_s3 + $0x1a8] sm:$0xff]  ;;  %v77_v0 = vld [vmem:[%s1511_s0 + $0x1b0] sm:$0xff] }
  0x3b   :  { %v464_v20 = vadd.f32 %v620_v6, %v396_v9  ;;  %v398_v21 = vadd.f32 %v334_v7, %v202_v10  ;;  %v203_v22 = vadd.f32 %v606_v2, %v135_v11  ;;  %v137_v23 = vmul.f32 %v601_v1, %v69_v8  ;;  %v277_v9 = vld [vmem:[%s1514_s3 + $0x1b0] sm:$0xff]  ;;  %v78_v10 = vld [vmem:[%s1511_s0 + $0x1b8] sm:$0xff] }
  0x3c   :  { %528 = vst.msk [vmem:[%s1517_s6 + $0x140] sm:$0xff] %vm487_vm0, %v463_v15  ;;  %v465_v26 = vadd.f32 %v620_v6, %v397_v16  ;;  %v204_v27 = vadd.f32 %v606_v2, %v136_v17  ;;  %v337_v28 = vmul.f32 %v615_v5, %v269_v13  ;;  %v138_v29 = vmul.f32 %v601_v1, %v70_v14  ;;  %v278_v15 = vld [vmem:[%s1514_s3 + $0x1b8] sm:$0xff] }
  0x3d   :  { %529 = vst.msk [vmem:[%s1517_s6 + $0x148] sm:$0xff] %vm487_vm0, %v464_v20  ;;  %v466_v32 = vadd.f32 %v620_v6, %v398_v21  ;;  %v399_v33 = vadd.f32 %v335_v12, %v203_v22  ;;  %v205_v34 = vadd.f32 %v606_v2, %v137_v23  ;;  %v338_v35 = vmul.f32 %v615_v5, %v270_v19  ;;  %v79_v20 = vld [vmem:[%s1511_s0 + $0x1c0] sm:$0xff] }
  0x3e   :  { %530 = vst.msk [vmem:[%s1517_s6 + $0x150] sm:$0xff] %vm487_vm0, %v465_v26  ;;  %v400_v37 = vadd.f32 %v336_v18, %v204_v27  ;;  %v206_v38 = vadd.f32 %v606_v2, %v138_v29  ;;  %v139_v39 = vmul.f32 %v601_v1, %v71_v24  ;;  %v339_v40 = vmul.f32 %v615_v5, %v271_v25  ;;  %v279_v21 = vld [vmem:[%s1514_s3 + $0x1c0] sm:$0xff]  ;;  %v80_v26 = vld [vmem:[%s1511_s0 + $0x1c8] sm:$0xff] }
  0x3f   :  { %531 = vst.msk [vmem:[%s1517_s6 + $0x158] sm:$0xff] %vm487_vm0, %v466_v32  ;;  %v467_v43 = vadd.f32 %v620_v6, %v399_v33  ;;  %v401_v44 = vadd.f32 %v337_v28, %v205_v34  ;;  %v140_v45 = vmul.f32 %v601_v1, %v72_v30  ;;  %v340_v46 = vmul.f32 %v615_v5, %v272_v31  ;;  %v280_v27 = vld [vmem:[%s1514_s3 + $0x1c8] sm:$0xff]  ;;  %v81_v32 = vld [vmem:[%s1511_s0 + $0x1d0] sm:$0xff] }
  0x40   :  { %v468_v48 = vadd.f32 %v620_v6, %v400_v37  ;;  %v402_v49 = vadd.f32 %v338_v35, %v206_v38  ;;  %v207_v50 = vadd.f32 %v606_v2, %v139_v39  ;;  %v141_v51 = vmul.f32 %v601_v1, %v73_v36  ;;  %v281_v37 = vld [vmem:[%s1514_s3 + $0x1d0] sm:$0xff]  ;;  %v82_v38 = vld [vmem:[%s1511_s0 + $0x1d8] sm:$0xff] }
  0x41   :  { %532 = vst.msk [vmem:[%s1517_s6 + $0x160] sm:$0xff] %vm487_vm0, %v467_v43  ;;  %v469_v54 = vadd.f32 %v620_v6, %v401_v44  ;;  %v208_v55 = vadd.f32 %v606_v2, %v140_v45  ;;  %v341_v56 = vmul.f32 %v615_v5, %v273_v41  ;;  %v142_v57 = vmul.f32 %v601_v1, %v74_v42  ;;  %v282_v43 = vld [vmem:[%s1514_s3 + $0x1d8] sm:$0xff] }
  0x42   :  { %533 = vst.msk [vmem:[%s1517_s6 + $0x168] sm:$0xff] %vm487_vm0, %v468_v48  ;;  %v470_v60 = vadd.f32 %v620_v6, %v402_v49  ;;  %v403_v61 = vadd.f32 %v339_v40, %v207_v50  ;;  %v209_v62 = vadd.f32 %v606_v2, %v141_v51  ;;  %v342_v63 = vmul.f32 %v615_v5, %v274_v47  ;;  %v83_v48 = vld [vmem:[%s1511_s0 + $0x1e0] sm:$0xff] }
  0x43   :  { %534 = vst.msk [vmem:[%s1517_s6 + $0x170] sm:$0xff] %vm487_vm0, %v469_v54  ;;  %v404_v3 = vadd.f32 %v340_v46, %v208_v55  ;;  %v210_v4 = vadd.f32 %v606_v2, %v142_v57  ;;  %v143_v7 = vmul.f32 %v601_v1, %v75_v52  ;;  %v343_v8 = vmul.f32 %v615_v5, %v275_v53  ;;  %v283_v49 = vld [vmem:[%s1514_s3 + $0x1e0] sm:$0xff]  ;;  %v84_v54 = vld [vmem:[%s1511_s0 + $0x1e8] sm:$0xff] }
  0x44   :  { %535 = vst.msk [vmem:[%s1517_s6 + $0x178] sm:$0xff] %vm487_vm0, %v470_v60  ;;  %v471_v11 = vadd.f32 %v620_v6, %v403_v61  ;;  %v405_v12 = vadd.f32 %v341_v56, %v209_v62  ;;  %v144_v13 = vmul.f32 %v601_v1, %v76_v58  ;;  %v344_v14 = vmul.f32 %v615_v5, %v276_v59  ;;  %v284_v55 = vld [vmem:[%s1514_s3 + $0x1e8] sm:$0xff]  ;;  %v85_v60 = vld [vmem:[%s1511_s0 + $0x1f0] sm:$0xff] }
  0x45   :  { %v472_v16 = vadd.f32 %v620_v6, %v404_v3  ;;  %v406_v17 = vadd.f32 %v342_v63, %v210_v4  ;;  %v211_v18 = vadd.f32 %v606_v2, %v143_v7  ;;  %v145_v19 = vmul.f32 %v601_v1, %v77_v0  ;;  %v285_v3 = vld [vmem:[%s1514_s3 + $0x1f0] sm:$0xff]  ;;  %v86_v4 = vld [vmem:[%s1511_s0 + $0x1f8] sm:$0xff] }
  0x46   :  { %536 = vst.msk [vmem:[%s1517_s6 + $0x180] sm:$0xff] %vm487_vm0, %v471_v11  ;;  %v473_v22 = vadd.f32 %v620_v6, %v405_v12  ;;  %v212_v23 = vadd.f32 %v606_v2, %v144_v13  ;;  %v345_v24 = vmul.f32 %v615_v5, %v277_v9  ;;  %v146_v25 = vmul.f32 %v601_v1, %v78_v10  ;;  %v286_v11 = vld [vmem:[%s1514_s3 + $0x1f8] sm:$0xff] }
  0x47   :  { %537 = vst.msk [vmem:[%s1517_s6 + $0x188] sm:$0xff] %vm487_vm0, %v472_v16  ;;  %v474_v28 = vadd.f32 %v620_v6, %v406_v17  ;;  %v407_v29 = vadd.f32 %v343_v8, %v211_v18  ;;  %v213_v30 = vadd.f32 %v606_v2, %v145_v19  ;;  %v346_v31 = vmul.f32 %v615_v5, %v278_v15 }
  0x48   :  { %538 = vst.msk [vmem:[%s1517_s6 + $0x190] sm:$0xff] %vm487_vm0, %v473_v22  ;;  %v408_v33 = vadd.f32 %v344_v14, %v212_v23  ;;  %v214_v34 = vadd.f32 %v606_v2, %v146_v25  ;;  %v147_v35 = vmul.f32 %v601_v1, %v79_v20  ;;  %v347_v36 = vmul.f32 %v615_v5, %v279_v21 }
  0x49   :  { %539 = vst.msk [vmem:[%s1517_s6 + $0x198] sm:$0xff] %vm487_vm0, %v474_v28  ;;  %v475_v39 = vadd.f32 %v620_v6, %v407_v29  ;;  %v409_v40 = vadd.f32 %v345_v24, %v213_v30  ;;  %v148_v41 = vmul.f32 %v601_v1, %v80_v26  ;;  %v348_v42 = vmul.f32 %v615_v5, %v280_v27 }
  0x4a   :  { %v476_v44 = vadd.f32 %v620_v6, %v408_v33  ;;  %v410_v45 = vadd.f32 %v346_v31, %v214_v34  ;;  %v215_v46 = vadd.f32 %v606_v2, %v147_v35  ;;  %v149_v47 = vmul.f32 %v601_v1, %v81_v32 }
  0x4b   :  { %540 = vst.msk [vmem:[%s1517_s6 + $0x1a0] sm:$0xff] %vm487_vm0, %v475_v39  ;;  %v477_v50 = vadd.f32 %v620_v6, %v409_v40  ;;  %v216_v51 = vadd.f32 %v606_v2, %v148_v41  ;;  %v349_v52 = vmul.f32 %v615_v5, %v281_v37  ;;  %v150_v53 = vmul.f32 %v601_v1, %v82_v38 }
  0x4c   :  { %541 = vst.msk [vmem:[%s1517_s6 + $0x1a8] sm:$0xff] %vm487_vm0, %v476_v44  ;;  %v478_v56 = vadd.f32 %v620_v6, %v410_v45  ;;  %v411_v57 = vadd.f32 %v347_v36, %v215_v46  ;;  %v217_v58 = vadd.f32 %v606_v2, %v149_v47  ;;  %v350_v59 = vmul.f32 %v615_v5, %v282_v43 }
  0x4d   :  { %542 = vst.msk [vmem:[%s1517_s6 + $0x1b0] sm:$0xff] %vm487_vm0, %v477_v50  ;;  %v412_v61 = vadd.f32 %v348_v42, %v216_v51  ;;  %v218_v62 = vadd.f32 %v606_v2, %v150_v53  ;;  %v151_v63 = vmul.f32 %v601_v1, %v83_v48  ;;  %v351_v0 = vmul.f32 %v615_v5, %v283_v49 }
  0x4e   :  { %543 = vst.msk [vmem:[%s1517_s6 + $0x1b8] sm:$0xff] %vm487_vm0, %v478_v56  ;;  %v479_v7 = vadd.f32 %v620_v6, %v411_v57  ;;  %v413_v8 = vadd.f32 %v349_v52, %v217_v58  ;;  %v152_v9 = vmul.f32 %v601_v1, %v84_v54  ;;  %v352_v10 = vmul.f32 %v615_v5, %v284_v55 }
  0x4f   :  { %v480_v12 = vadd.f32 %v620_v6, %v412_v61  ;;  %v414_v13 = vadd.f32 %v350_v59, %v218_v62  ;;  %v219_v14 = vadd.f32 %v606_v2, %v151_v63  ;;  %v153_v15 = vmul.f32 %v601_v1, %v85_v60 }
  0x50   :  { %544 = vst.msk [vmem:[%s1517_s6 + $0x1c0] sm:$0xff] %vm487_vm0, %v479_v7  ;;  %v481_v16 = vadd.f32 %v620_v6, %v413_v8  ;;  %v220_v17 = vadd.f32 %v606_v2, %v152_v9  ;;  %v353_v18 = vmul.f32 %v615_v5, %v285_v3  ;;  %v154_v19 = vmul.f32 %v601_v1, %v86_v4 }
  0x51   :  { %545 = vst.msk [vmem:[%s1517_s6 + $0x1c8] sm:$0xff] %vm487_vm0, %v480_v12  ;;  %v482_v20 = vadd.f32 %v620_v6, %v414_v13  ;;  %v415_v21 = vadd.f32 %v351_v0, %v219_v14  ;;  %v221_v22 = vadd.f32 %v606_v2, %v153_v15  ;;  %v354_v23 = vmul.f32 %v615_v5, %v286_v11 }
  0x52   :  { %546 = vst.msk [vmem:[%s1517_s6 + $0x1d0] sm:$0xff] %vm487_vm0, %v481_v16  ;;  %v416_v24 = vadd.f32 %v352_v10, %v220_v17  ;;  %v222_v1 = vadd.f32 %v606_v2, %v154_v19 }
  0x53   :  { %547 = vst.msk [vmem:[%s1517_s6 + $0x1d8] sm:$0xff] %vm487_vm0, %v482_v20  ;;  %v483_v25 = vadd.f32 %v620_v6, %v415_v21  ;;  %v417_v26 = vadd.f32 %v353_v18, %v221_v22 }
  0x54   :  { %v484_v27 = vadd.f32 %v620_v6, %v416_v24  ;;  %v418_v28 = vadd.f32 %v354_v23, %v222_v1 }
  0x55   :  { %548 = vst.msk [vmem:[%s1517_s6 + $0x1e0] sm:$0xff] %vm487_vm0, %v483_v25  ;;  %v485_v5 = vadd.f32 %v620_v6, %v417_v26 }
  0x56   :  { %549 = vst.msk [vmem:[%s1517_s6 + $0x1e8] sm:$0xff] %vm487_vm0, %v484_v27  ;;  %v486_v2 = vadd.f32 %v620_v6, %v418_v28 }
  0x57   :  { %550 = vst.msk [vmem:[%s1517_s6 + $0x1f0] sm:$0xff] %vm487_vm0, %v485_v5 }
  0x58   :  { %551 = vst.msk [vmem:[%s1517_s6 + $0x1f8] sm:$0xff] %vm487_vm0, %v486_v2 }

// kernel: block_forward.5
= control target key start
LH: loop header
LB: loop body
LE: loop exit
PB: predicated region body
PF: predicated region fallthrough
CT: control target
= control target key end

     0   :  { %s1844_s18 = smov 0   ;;  %s1846_s19 = smov 0   ;;  %s2840_s0 = inlined_call_operand.vmem [shape: f32[2,16,16,128], index: 0, kind: input, shape index: {}]   ;;  %s2841_s1 = inlined_call_operand.vmem [shape: f32[1,128], index: 1, kind: input, shape index: {}]   ;;  %s2842_s2 = inlined_call_operand.vmem [shape: f32[1,128], index: 2, kind: input, shape index: {}]   ;;  %s2843_s3 = inlined_call_operand.vmem [shape: f32[9,128], index: 3, kind: input, shape index: {}]   ;;  %s2844_s4 = inlined_call_operand.vmem [shape: f32[2,16,16,128], index: 4, kind: output, shape index: {0}]   ;;  %s2845_s5 = inlined_call_operand.vmem [shape: f32[2,2,128], index: 5, kind: output, shape index: {1}]  }
   0x1   :  { %s1848_s20 = smov 0  }
   0x2 LB: > { %s28_s21 = sadd.s32 1, %s1807_s19  ;;  %p1747_p0 = scmp.ge.s32.totalorder %s1811_s20, 1  ;;  %s1811_s20 = sphi %s1848_s20, %s16_s20   ;;  %s1807_s19 = sphi %s1846_s19, %s2899_s19   ;;  %s1803_s18 = sphi %s1844_s18, %s2898_s18  }
   0x3   : > { %p30_p1 = scmp.ge.s32.totalorder %s28_s21, 2  ;;  %p236_p2 = scmp.lt.s32.totalorder %s1811_s20, 3 }
   0x5   : > { %s2901_s21 = smov (%p30_p1, %s28_s21), 0  ;;  %p237_p3 = pnand %p1747_p0, %p236_p2 }
   0x7   : > { %240 = sbr.rel (%p237_p3) target bundleno = 250 (0xfa), region = 36 }
   0xc   : > { %p287_p4 = scmp.lt.s32.totalorder %s1803_s18, 1  ;;  %v1813_v0 = vmov 0.0   ;;  %v1870_v1 = vld [vmem:[%s2841_s1] ss:$0 sm:$0xff] }
   0xd   : > { %488 = vst [vmem:[#allocation2] sm:$0xff] %v1813_v0  ;;  %v1885_v2 = vld [vmem:[%s2842_s2] ss:$0 sm:$0xff] }
   0xe   : > { %489 = vst [vmem:[#allocation2 + $0x8] sm:$0xff] %v1813_v0  ;;  %s2903_s18 = smov (!%p287_p4, %s1803_s18), 1 }
   0xf   : > { %490 = vst [vmem:[#allocation2 + $0x10] sm:$0x3] %v1813_v0  ;;  %s1755_s24 = sshll.u32 %s2903_s18, 8  ;;  %s1752_s22 = sshll.u32 %s2903_s18, 1 }
  0x10   : > { %492 = vst [vmem:[#allocation2 + $0x198] sm:$0xff] %v1813_v0  ;;  %s1880_s27 = scalar_lea.vmem %s2840_s0, %s1755_s24  ;;  %s2307_s11 = scalar_lea.vmem %s2844_s4, %s1755_s24 }
  0x11   : > { %493 = vst [vmem:[#allocation2 + $0x1a0] sm:$0xff] %v1813_v0  ;;  %v320_v3 = vld [vmem:[%s1880_s27] sm:$0xff]  ;;  %v321_v4 = vld [vmem:[%s1880_s27 + $0x8] sm:$0xff]  ;;  %v322_v5 = vld [vmem:[%s1880_s27 + $0x10] sm:$0xff]  ;;  %s319_s25 = scalar_lea.vmem %s2845_s5, %s1752_s22 }
  0x12   : > { %494 = vst [vmem:[#allocation2 + $0x1a8] sm:$0x3] %v1813_v0  ;;  %v356_v6 = vmul.f32 %v1870_v1, %v320_v3  ;;  %v357_v7 = vmul.f32 %v1870_v1, %v321_v4  ;;  %v358_v8 = vmul.f32 %v1870_v1, %v322_v5  ;;  %v323_v9 = vld [vmem:[%s1880_s27 + $0x18] sm:$0xff]  ;;  %v324_v10 = vld [vmem:[%s1880_s27 + $0x20] sm:$0xff]  ;;  %v325_v11 = vld [vmem:[%s1880_s27 + $0x28] sm:$0xff] }
  0x13   : > { %496 = vst [vmem:[#allocation2 + $0x18] sm:$0x1] %v1813_v0  ;;  %v359_v12 = vmul.f32 %v1870_v1, %v323_v9  ;;  %v360_v13 = vmul.f32 %v1870_v1, %v324_v10  ;;  %v361_v14 = vmul.f32 %v1870_v1, %v325_v11  ;;  %v326_v15 = vld [vmem:[%s1880_s27 + $0x30] sm:$0xff]  ;;  %v327_v16 = vld [vmem:[%s1880_s27 + $0x38] sm:$0xff]  ;;  %v328_v25 = vld [vmem:[%s1880_s27 + $0x40] sm:$0xff] }
  0x14   : > { %497 = vst [vmem:[#allocation2 + $0x30] sm:$0x1] %v1813_v0  ;;  %v392_v17 = vadd.f32 %v1885_v2, %v356_v6  ;;  %v393_v18 = vadd.f32 %v1885_v2, %v357_v7  ;;  %v394_v19 = vadd.f32 %v1885_v2, %v358_v8  ;;  %v362_v20 = vmul.f32 %v1870_v1, %v326_v15  ;;  %v329_v26 = vld [vmem:[%s1880_s27 + $0x48] sm:$0xff]  ;;  %v330_v27 = vld [vmem:[%s1880_s27 + $0x50] sm:$0xff]  ;;  %v331_v32 = vld [vmem:[%s1880_s27 + $0x58] sm:$0xff] }
  0x15   : > { %498 = vst [vmem:[#allocation2 + $0x48] sm:$0x1] %v1813_v0  ;;  %v395_v21 = vadd.f32 %v1885_v2, %v359_v12  ;;  %v396_v22 = vadd.f32 %v1885_v2, %v360_v13  ;;  %v397_v23 = vadd.f32 %v1885_v2, %v361_v14  ;;  %v363_v24 = vmul.f32 %v1870_v1, %v327_v16  ;;  %v332_v33 = vld [vmem:[%s1880_s27 + $0x60] sm:$0xff]  ;;  %v333_v38 = vld [vmem:[%s1880_s27 + $0x68] sm:$0xff]  ;;  %v334_v51 = vld [vmem:[%s1880_s27 + $0x70] sm:$0xff] }
  0x16   : > { %499 = vst [vmem:[#allocation2 + $0x60] sm:$0x1] %v1813_v0  ;;  %v424_v28 = vmax.f32 %v392_v17, 0.0  ;;  %v425_v29 = vmax.f32 %v393_v18, 0.0  ;;  %v426_v30 = vmax.f32 %v394_v19, 0.0  ;;  %v398_v31 = vadd.f32 %v1885_v2, %v362_v20  ;;  %v335_v52 = vld [vmem:[%s1880_s27 + $0x78] sm:$0xff] }
  0x17   : > { %500 = vst [vmem:[#allocation2 + $0x78] sm:$0x1] %v1813_v0  ;;  %v427_v34 = vmax.f32 %v395_v21, 0.0  ;;  %v428_v35 = vmax.f32 %v396_v22, 0.0  ;;  %v429_v36 = vmax.f32 %v397_v23, 0.0  ;;  %v399_v37 = vadd.f32 %v1885_v2, %v363_v24  ;;  %v336_v4 = vld [vmem:[%s1880_s27 + $0x80] sm:$0xff] }
  0x18   : > { %501 = vst [vmem:[#allocation2 + $0x90] sm:$0x1] %v1813_v0  ;;  %v1925_v39 = vmin.f32 %v424_v28, 6.0  ;;  %v1927_v40 = vmin.f32 %v425_v29, 6.0  ;;  %v1929_v41 = vmin.f32 %v426_v30, 6.0  ;;  %v430_v42 = vmax.f32 %v398_v31, 0.0 }
  0x19   : > { %502 = vst [vmem:[#allocation2 + $0xa8] sm:$0x1] %v1813_v0  ;;  %v1932_v43 = vmin.f32 %v427_v34, 6.0  ;;  %v1934_v44 = vmin.f32 %v428_v35, 6.0  ;;  %v1936_v45 = vmin.f32 %v429_v36, 6.0  ;;  %v431_v46 = vmax.f32 %v399_v37, 0.0 }
  0x1a   : > { %503 = vst [vmem:[#allocation2 + $0xc0] sm:$0x1] %v1813_v0  ;;  %v1939_v47 = vmin.f32 %v430_v42, 6.0  ;;  %v364_v48 = vmul.f32 %v1870_v1, %v328_v25  ;;  %v365_v49 = vmul.f32 %v1870_v1, %v329_v26  ;;  %v366_v50 = vmul.f32 %v1870_v1, %v330_v27  ;;  %v337_v5 = vld [vmem:[%s1880_s27 + $0x88] sm:$0xff]  ;;  %v338_v6 = vld [vmem:[%s1880_s27 + $0x90] sm:$0xff]  ;;  %v339_v11 = vld [vmem:[%s1880_s27 + $0x98] sm:$0xff] }
  0x1b   : > { %504 = vst [vmem:[#allocation2 + $0xd8] sm:$0x1] %v1813_v0  ;;  %v1947_v53 = vmin.f32 %v431_v46, 6.0  ;;  %v367_v54 = vmul.f32 %v1870_v1, %v331_v32  ;;  %v368_v55 = vmul.f32 %v1870_v1, %v332_v33  ;;  %v369_v56 = vmul.f32 %v1870_v1, %v333_v38  ;;  %v340_v12 = vld [vmem:[%s1880_s27 + $0xa0] sm:$0xff]  ;;  %v341_v17 = vld [vmem:[%s1880_s27 + $0xa8] sm:$0xff]  ;;  %v342_v30 = vld [vmem:[%s1880_s27 + $0xb0] sm:$0xff] }
  0x1c   : > { %505 = vst [vmem:[#allocation2 + $0xf0] sm:$0x1] %v1813_v0  ;;  %v400_v57 = vadd.f32 %v1885_v2, %v364_v48  ;;  %v401_v58 = vadd.f32 %v1885_v2, %v365_v49  ;;  %v402_v59 = vadd.f32 %v1885_v2, %v366_v50  ;;  %v370_v60 = vmul.f32 %v1870_v1, %v334_v51  ;;  %v343_v31 = vld [vmem:[%s1880_s27 + $0xb8] sm:$0xff]  ;;  %v344_v51 = vld [vmem:[%s1880_s27 + $0xc0] sm:$0xff] }
  0x1d   : > { %2862 = vst [vmem:[#allocation3_spill] sm:$0xff] %v1947_v53  ;;  %v403_v61 = vadd.f32 %v1885_v2, %v367_v54  ;;  %v404_v62 = vadd.f32 %v1885_v2, %v368_v55  ;;  %v405_v63 = vadd.f32 %v1885_v2, %v369_v56  ;;  %v371_v3 = vmul.f32 %v1870_v1, %v335_v52 }
  0x1e   : > { %506 = vst [vmem:[#allocation2 + $0x108] sm:$0x1] %v1813_v0  ;;  %v432_v7 = vmax.f32 %v400_v57, 0.0  ;;  %v433_v8 = vmax.f32 %v401_v58, 0.0  ;;  %v434_v9 = vmax.f32 %v402_v59, 0.0  ;;  %v406_v10 = vadd.f32 %v1885_v2, %v370_v60  ;;  %v345_v57 = vld [vmem:[%s1880_s27 + $0xc8] sm:$0xff] }
  0x1f   : > { %507 = vst [vmem:[#allocation2 + $0x120] sm:$0x1] %v1813_v0  ;;  %v435_v13 = vmax.f32 %v403_v61, 0.0  ;;  %v436_v14 = vmax.f32 %v404_v62, 0.0  ;;  %v437_v15 = vmax.f32 %v405_v63, 0.0  ;;  %v407_v16 = vadd.f32 %v1885_v2, %v371_v3  ;;  %v346_v62 = vld [vmem:[%s1880_s27 + $0xd0] sm:$0xff] }
  0x20   : > { %508 = vst [vmem:[#allocation2 + $0x138] sm:$0x1] %v1813_v0  ;;  %v1973_v18 = vmin.f32 %v432_v7, 6.0  ;;  %v1975_v19 = vmin.f32 %v433_v8, 6.0  ;;  %v1977_v20 = vmin.f32 %v434_v9, 6.0  ;;  %v438_v21 = vmax.f32 %v406_v10, 0.0 }
  0x21   : > { %509 = vst [vmem:[#allocation2 + $0x150] sm:$0x1] %v1813_v0  ;;  %v1980_v22 = vmin.f32 %v435_v13, 6.0  ;;  %v1982_v23 = vmin.f32 %v436_v14, 6.0  ;;  %v1984_v24 = vmin.f32 %v437_v15, 6.0  ;;  %v439_v25 = vmax.f32 %v407_v16, 0.0 }
  0x22   : > { %510 = vst [vmem:[#allocation2 + $0x168] sm:$0x1] %v1813_v0  ;;  %v1987_v26 = vmin.f32 %v438_v21, 6.0  ;;  %v372_v27 = vmul.f32 %v1870_v1, %v336_v4  ;;  %v373_v28 = vmul.f32 %v1870_v1, %v337_v5  ;;  %v374_v29 = vmul.f32 %v1870_v1, %v338_v6  ;;  %v2020_v63 = vld [vmem:[%s2843_s3] sm:$0xff]  ;;  %v347_v6 = vld [vmem:[%s1880_s27 + $0xd8] sm:$0xff]  ;;  %v349_v16 = vld [vmem:[%s1880_s27 + $0xe8] sm:$0xff] }
  0x23   : > { %2863 = vst [vmem:[#allocation4_spill] sm:$0xff] %v1973_v18  ;;  %v1995_v32 = vmin.f32 %v439_v25, 6.0  ;;  %v375_v33 = vmul.f32 %v1870_v1, %v339_v11  ;;  %v376_v34 = vmul.f32 %v1870_v1, %v340_v12  ;;  %v377_v35 = vmul.f32 %v1870_v1, %v341_v17  ;;  %v348_v15 = vld [vmem:[%s1880_s27 + $0xe0] sm:$0xff] }
  0x24   : > { %2864 = vst [vmem:[#allocation5_spill] sm:$0xff] %v1975_v19  ;;  %v408_v36 = vadd.f32 %v1885_v2, %v372_v27  ;;  %v409_v37 = vadd.f32 %v1885_v2, %v373_v28  ;;  %v410_v38 = vadd.f32 %v1885_v2, %v374_v29  ;;  %v378_v42 = vmul.f32 %v1870_v1, %v342_v30 }
  0x25   : > { %511 = vst [vmem:[#allocation2 + $0x180] sm:$0x1] %v1813_v0  ;;  %v411_v46 = vadd.f32 %v1885_v2, %v375_v33  ;;  %v412_v48 = vadd.f32 %v1885_v2, %v376_v34  ;;  %v413_v49 = vadd.f32 %v1885_v2, %v377_v35  ;;  %v379_v50 = vmul.f32 %v1870_v1, %v343_v31  ;;  %v659_v33 = vld [vmem:[#allocation2 + $0x1] sm:$0xff] }
  0x26   : > { %2865 = vst [vmem:[#allocation6_spill] sm:$0xff] %v1980_v22  ;;  %v440_v52 = vmax.f32 %v408_v36, 0.0  ;;  %v441_v54 = vmax.f32 %v409_v37, 0.0  ;;  %v442_v55 = vmax.f32 %v410_v38, 0.0  ;;  %v414_v56 = vadd.f32 %v1885_v2, %v378_v42  ;;  %v756_v37 = vld [vmem:[#allocation2 + $0x2] sm:$0xff] }
  0x27   : > { %2866 = vst [vmem:[#allocation7_spill] sm:$0xff] %v1982_v23  ;;  %v443_v58 = vmax.f32 %v411_v46, 0.0  ;;  %v444_v59 = vmax.f32 %v412_v48, 0.0  ;;  %v445_v60 = vmax.f32 %v413_v49, 0.0  ;;  %v415_v61 = vadd.f32 %v1885_v2, %v379_v50  ;;  %v660_v49 = vld [vmem:[#allocation2 + $0x9] sm:$0xff] }
  0x28   : > { %2867 = vst [vmem:[#allocation8_spill] sm:$0xff] %v1984_v24  ;;  %v2023_v3 = vmin.f32 %v440_v52, 6.0  ;;  %v2025_v4 = vmin.f32 %v441_v54, 6.0  ;;  %v446_v5 = vmax.f32 %v414_v56, 0.0  ;;  %v2029_v7 = vmin.f32 %v442_v55, 6.0 }
  0x29   : > { %512 = vst [vmem:[#allocation2 + $0x29] sm:$0x1] %v1813_v0  ;;  %v2031_v8 = vmin.f32 %v443_v58, 6.0  ;;  %v2033_v9 = vmin.f32 %v444_v59, 6.0  ;;  %v2035_v10 = vmin.f32 %v445_v60, 6.0  ;;  %v447_v11 = vmax.f32 %v415_v61, 0.0 }
  0x2a   : > { %513 = vst [vmem:[#allocation2 + $0x41] sm:$0x1] %v1813_v0  ;;  %v380_v12 = vmul.f32 %v1870_v1, %v344_v51  ;;  %v381_v13 = vmul.f32 %v1870_v1, %v345_v57  ;;  %v382_v14 = vmul.f32 %v1870_v1, %v346_v62  ;;  %v2044_v17 = vmin.f32 %v446_v5, 6.0 }
  0x2b   : > { %514 = vst [vmem:[#allocation2 + $0x59] sm:$0x1] %v1813_v0  ;;  %v383_v21 = vmul.f32 %v1870_v1, %v347_v6  ;;  %v384_v25 = vmul.f32 %v1870_v1, %v348_v15  ;;  %v385_v27 = vmul.f32 %v1870_v1, %v349_v16  ;;  %v2054_v31 = vperm.slane %v2020_v63, 0 }
  0x2c   : > { %515 = vst [vmem:[#allocation2 + $0x71] sm:$0x1] %v1813_v0  ;;  %v416_v28 = vadd.f32 %v1885_v2, %v380_v12  ;;  %v417_v29 = vadd.f32 %v1885_v2, %v381_v13  ;;  %v418_v30 = vadd.f32 %v1885_v2, %v382_v14  ;;  %v2061_v36 = vperm.slane %v2020_v63, 1 }
  0x2d   : > { %516 = vst [vmem:[#allocation2 + $0x89] sm:$0x1] %v1813_v0  ;;  %v419_v34 = vadd.f32 %v1885_v2, %v383_v21  ;;  %v420_v35 = vadd.f32 %v1885_v2, %v384_v25  ;;  %v421_v1 = vadd.f32 %v1885_v2, %v385_v27  ;;  %v595_v48 = vmul.f32 0.0, %v2054_v31  ;;  %v757_v2 = vld [vmem:[#allocation2 + $0xa] sm:$0xff] }
  0x2e   : > { %517 = vst [vmem:[#allocation2 + $0xa1] sm:$0x1] %v1813_v0  ;;  %v448_v38 = vmax.f32 %v416_v28, 0.0  ;;  %v449_v42 = vmax.f32 %v417_v29, 0.0  ;;  %v450_v46 = vmax.f32 %v418_v30, 0.0  ;;  %v692_v54 = vmul.f32 %v2061_v36, %v659_v33 }
  0x2f   : > { %518 = vst [vmem:[#allocation2 + $0xb9] sm:$0x1] %v1813_v0  ;;  %v451_v50 = vmax.f32 %v419_v34, 0.0  ;;  %v452_v51 = vmax.f32 %v420_v35, 0.0  ;;  %v453_v52 = vmax.f32 %v421_v1, 0.0  ;;  %v2068_v55 = vmin.f32 %v447_v11, 6.0 }
  0x30   : > { %519 = vst [vmem:[#allocation2 + $0xd1] sm:$0x1] %v1813_v0  ;;  %v2070_v56 = vmin.f32 %v448_v38, 6.0  ;;  %v2072_v57 = vmin.f32 %v449_v42, 6.0  ;;  %v2075_v58 = vperm.slane %v2020_v63, 2  ;;  %v2078_v59 = vmin.f32 %v450_v46, 6.0 }
  0x31   : > { %520 = vst [vmem:[#allocation2 + $0xe9] sm:$0x1] %v1813_v0  ;;  %v2080_v60 = vmin.f32 %v451_v50, 6.0  ;;  %v2082_v61 = vmin.f32 %v452_v51, 6.0  ;;  %v724_v62 = vadd.f32 %v692_v54, %v595_v48  ;;  %v2085_v5 = vmin.f32 %v453_v52, 6.0 }
  0x32   : > { %521 = vst [vmem:[#allocation2 + $0x101] sm:$0x1] %v1813_v0  ;;  %v789_v6 = vmul.f32 %v2075_v58, %v756_v37  ;;  %v2089_v11 = vperm.slane %v2020_v63, 3  ;;  %v2092_v12 = vperm.slane %v2020_v63, 4  ;;  %v2099_v13 = vperm.slane %v2020_v63, 7 }
  0x33   : > { %522 = vst [vmem:[#allocation2 + $0x119] sm:$0x1] %v1813_v0  ;;  %v693_v14 = vmul.f32 %v2061_v36, %v660_v49  ;;  %v790_v15 = vmul.f32 %v2075_v58, %v757_v2  ;;  %v2107_v25 = vperm.slane %v2020_v63, 6  ;;  %v694_v33 = vmul.f32 %v2061_v36, %v1925_v39  ;;  %v2175_v50 = vld [vmem:[%s2843_s3 + $0x8] ss:$0 sm:$0xff] }
  0x34   : > { %523 = vst [vmem:[#allocation2 + $0x131] sm:$0x1] %v1813_v0  ;;  %v821_v16 = vadd.f32 %v789_v6, %v724_v62  ;;  %v983_v21 = vmul.f32 %v2092_v12, %v1925_v39  ;;  %v2111_v27 = vmul.f32 %v2092_v12, %v1927_v40  ;;  %v2116_v28 = vmul.f32 %v2099_v13, %v1929_v41 }
  0x35   : > { %2868 = vst [vmem:[#allocation9_spill] sm:$0xff] %v2061_v36  ;;  %v725_v29 = vadd.f32 %v693_v14, %v595_v48  ;;  %v2120_v30 = vmul.f32 %v2099_v13, %v1932_v43  ;;  %v2131_v34 = vmul.f32 %v2099_v13, %v1934_v44  ;;  %v2135_v35 = vmul.f32 %v2061_v36, %v1927_v40 }
  0x36   : > { %524 = vst [vmem:[#allocation2 + $0x149] sm:$0x1] %v1813_v0  ;;  %v2139_v1 = vmul.f32 %v2092_v12, %v1932_v43  ;;  %v2144_v37 = vmul.f32 %v2099_v13, %v1936_v45  ;;  %v2148_v38 = vmul.f32 %v2061_v36, %v1929_v41  ;;  %v2152_v42 = vmul.f32 %v2092_v12, %v1934_v44 }
  0x37   : > { %525 = vst [vmem:[#allocation2 + $0x161] sm:$0x1] %v1813_v0  ;;  %v2161_v46 = vmul.f32 %v2061_v36, %v1932_v43  ;;  %v2165_v48 = vmul.f32 %v2092_v12, %v1936_v45  ;;  %v2183_v51 = vmul.f32 %v2092_v12, %v1939_v47  ;;  %v2187_v52 = vmul.f32 %v2099_v13, %v1973_v18 }
  0x38   : > { %526 = vst [vmem:[#allocation2 + $0x179] sm:$0x1] %v1813_v0  ;;  %v2191_v54 = vmul.f32 %v2061_v36, %v1936_v45 }
  0x39   : > { %527 = vst [vmem:[#allocation2 + $0x191] sm:$0x1] %v1813_v0  ;;  %v2096_v0 = vperm.slane %v2020_v63, 5  ;;  %v2127_v63 = vmul.f32 %v2092_v12, %v1929_v41 }
  0x3a   : > { %528 = vst [vmem:[#allocation2 + $0x19] sm:$0xff] %v1925_v39  ;;  %v822_v39 = vadd.f32 %v790_v15, %v725_v29  ;;  %v2198_v15 = vmul.f32 %v2092_v12, %v1947_v53  ;;  %v2202_v29 = vmul.f32 %v2061_v36, %v1939_v47 }
  0x3b   : > { %2869 = vst [vmem:[#allocation10_spill] sm:$0xff] %v2085_v5 }
  0x3c   : > { %2870 = vst [vmem:[#allocation11_spill] sm:$0xff] %v2092_v12 }
  0x3d   : > { %529 = vst [vmem:[#allocation2 + $0x21] sm:$0xff] %v1927_v40  ;;  %v2157_v40 = vmul.f32 %v2099_v13, %v1939_v47 }
  0x3e   : > { %2871 = vst [vmem:[#allocation12_spill] sm:$0xff] %v2099_v13 }
  0x3f   : > { %530 = vst [vmem:[#allocation2 + $0x31] sm:$0xff] %v1929_v41  ;;  %v2169_v41 = vmul.f32 %v2099_v13, %v1947_v53 }
  0x40   : > { %531 = vst [vmem:[#allocation2 + $0x39] sm:$0xff] %v1932_v43  ;;  %v2179_v43 = vmul.f32 %v2061_v36, %v1934_v44 }
  0x41   : > { %532 = vst [vmem:[#allocation2 + $0x49] sm:$0xff] %v1934_v44  ;;  %v853_v49 = vld [vmem:[#allocation2 + $0x18] sm:$0xff] }
  0x42   : > { %533 = vst [vmem:[#allocation2 + $0x51] sm:$0xff] %v1936_v45  ;;  %v886_v2 = vmul.f32 %v2089_v11, %v853_v49  ;;  %v597_v14 = vmul.f32 %v853_v49, %v2054_v31  ;;  %v2210_v49 = vmul.f32 %v2092_v12, %v1973_v18 }
  0x43   : > { %534 = vst [vmem:[#allocation2 + $0x61] sm:$0xff] %v1939_v47 }
  0x44   : > { %2872 = vst [vmem:[#allocation13_spill] sm:$0xff] %v2157_v40  ;;  %v1047_v62 = vld [vmem:[#allocation2 + $0x1a] sm:$0xff]  ;;  %v1048_v44 = vld [vmem:[#allocation2 + $0x22] sm:$0xff] }
  0x45   : > { %2873 = vst [vmem:[#allocation14_spill] sm:$0xff] %v2169_v41  ;;  %v854_v6 = vld [vmem:[#allocation2 + $0x20] sm:$0xff]  ;;  %v1080_v45 = vmul.f32 %v2096_v0, %v1047_v62  ;;  %v1081_v41 = vmul.f32 %v2096_v0, %v1048_v44 }
  0x46   : > { %535 = vst [vmem:[#allocation2 + $0x69] sm:$0xff] %v1947_v53  ;;  %v887_v13 = vmul.f32 %v2089_v11, %v854_v6  ;;  %v918_v53 = vadd.f32 %v886_v2, %v821_v16 }
  0x47   : > { %2874 = vst [vmem:[#allocation15_spill] sm:$0xff] %v2183_v51  ;;  %v1339_v47 = vld [vmem:[#allocation2 + $0x32] sm:$0xff]  ;;  %v791_v51 = vmul.f32 %v1047_v62, %v2075_v58 }
  0x48   : > { %2875 = vst [vmem:[#allocation16_spill] sm:$0xff] %v2187_v52  ;;  %v1145_v52 = vld [vmem:[#allocation2 + $0x30] sm:$0xff]  ;;  %v1146_v36 = vld [vmem:[#allocation2 + $0x38] sm:$0xff]  ;;  %v919_v40 = vadd.f32 %v887_v13, %v822_v39  ;;  %v1015_v16 = vadd.f32 %v983_v21, %v918_v53  ;;  %v1082_v12 = vmul.f32 %v1339_v47, %v2096_v0  ;;  %v598_v53 = vmul.f32 %v854_v6, %v2054_v31 }
  0x49   : > { %2876 = vst [vmem:[#allocation17_spill] sm:$0xff] %v2191_v54  ;;  %v1372_v54 = vmul.f32 %v2175_v50, %v1339_v47  ;;  %v1179_v5 = vmul.f32 %v2107_v25, %v1146_v36  ;;  %v2224_v62 = vld [vmem:[#allocation2 + $0x4a] sm:$0xff] }
  0x4a   : > { %536 = vst [vmem:[#allocation2 + $0x79] sm:$0xff] %v1973_v18  ;;  %v888_v18 = vmul.f32 %v1145_v52, %v2089_v11  ;;  %v1016_v13 = vadd.f32 %v2111_v27, %v919_v40  ;;  %v727_v40 = vadd.f32 %v2135_v35, %v598_v53 }
  0x4b   : > { %2877 = vst [vmem:[#allocation18_spill] sm:$0xff] %v2198_v15  ;;  %v1178_v15 = vmul.f32 %v2107_v25, %v1145_v52 }
  0x4c   : > { %2878 = vst [vmem:[#allocation19_spill] sm:$0xff] %v2202_v29  ;;  %v1340_v29 = vld [vmem:[#allocation2 + $0x3a] sm:$0xff]  ;;  %v1113_v27 = vadd.f32 %v1081_v41, %v1016_v13 }
  0x4d   : > { %537 = vst [vmem:[#allocation2 + $0x81] sm:$0xff] %v1975_v19  ;;  %v726_v19 = vadd.f32 %v694_v33, %v597_v14  ;;  %v1373_v2 = vmul.f32 %v2175_v50, %v1340_v29  ;;  %v2222_v33 = vld [vmem:[#allocation2 + $0x48] sm:$0xff]  ;;  %v1374_v14 = vmul.f32 %v2175_v50, %v2224_v62 }
  0x4e   : > { %2879 = vst [vmem:[#allocation20_spill] sm:$0xff] %v2210_v49  ;;  %v1180_v39 = vmul.f32 %v2107_v25, %v2222_v33  ;;  %v1211_v41 = vadd.f32 %v1179_v5, %v1113_v27  ;;  %v2272_v27 = vld [vmem:[#allocation2 + $0x62] sm:$0xff] }
  0x4f   : > { %538 = vst [vmem:[#allocation2 + $0x91] sm:$0xff] %v1977_v20  ;;  %v823_v49 = vadd.f32 %v791_v51, %v726_v19  ;;  %v1112_v19 = vadd.f32 %v1080_v45, %v1015_v16  ;;  %v792_v51 = vmul.f32 %v1048_v44, %v2075_v58  ;;  %v2245_v44 = vld [vmem:[#allocation2 + $0x52] sm:$0xff]  ;;  %v793_v16 = vmul.f32 %v1339_v47, %v2075_v58 }
  0x50   : > { %539 = vst [vmem:[#allocation2 + $0x99] sm:$0xff] %v1980_v22  ;;  %v2236_v22 = vld [vmem:[#allocation2 + $0x50] sm:$0xff]  ;;  %v2252_v13 = vmul.f32 %v2175_v50, %v2245_v44  ;;  %v1084_v47 = vmul.f32 %v2224_v62, %v2096_v0  ;;  %v1308_v5 = vadd.f32 %v2120_v30, %v1211_v41 }
  0x51   : > { %540 = vst [vmem:[#allocation2 + $0xa9] sm:$0xff] %v1982_v23  ;;  %v920_v21 = vadd.f32 %v888_v18, %v823_v49  ;;  %v889_v23 = vmul.f32 %v1146_v36, %v2089_v11  ;;  %v1181_v6 = vmul.f32 %v2107_v25, %v2236_v22  ;;  %v1210_v45 = vadd.f32 %v1178_v15, %v1112_v19 }
  0x52   : > { %541 = vst [vmem:[#allocation2 + $0xb1] sm:$0xff] %v1984_v24  ;;  %v1083_v24 = vmul.f32 %v1340_v29, %v2096_v0  ;;  %v599_v49 = vmul.f32 %v1145_v52, %v2054_v31  ;;  %v824_v35 = vadd.f32 %v792_v51, %v727_v40  ;;  %v1405_v51 = vadd.f32 %v1373_v2, %v1308_v5 }
  0x53   : > { %542 = vst [vmem:[#allocation2 + $0xc1] sm:$0xff] %v1987_v26  ;;  %v1017_v18 = vadd.f32 %v2127_v63, %v920_v21  ;;  %v1307_v63 = vadd.f32 %v2116_v28, %v1210_v45  ;;  %v794_v21 = vmul.f32 %v1340_v29, %v2075_v58  ;;  %v891_v30 = vmul.f32 %v2236_v22, %v2089_v11 }
  0x54   : > { %543 = vst [vmem:[#allocation2 + $0xc9] sm:$0xff] %v1995_v32  ;;  %v728_v52 = vadd.f32 %v2148_v38, %v599_v49  ;;  %v921_v53 = vadd.f32 %v889_v23, %v824_v35  ;;  %v1376_v29 = vmul.f32 %v2175_v50, %v2272_v27 }
  0x55   : > { %544 = vst [vmem:[#allocation2 + $0xd9] sm:$0xff] %v2023_v3  ;;  %v890_v3 = vmul.f32 %v2222_v33, %v2089_v11  ;;  %v1114_v15 = vadd.f32 %v1082_v12, %v1017_v18  ;;  %v1404_v12 = vadd.f32 %v1372_v54, %v1307_v63  ;;  %v795_v18 = vmul.f32 %v2224_v62, %v2075_v58 }
  0x56   : > { %545 = vst [vmem:[#allocation2 + $0xe1] sm:$0xff] %v2025_v4  ;;  %v2261_v4 = vld [vmem:[#allocation2 + $0x60] sm:$0xff]  ;;  %v825_v38 = vadd.f32 %v793_v16, %v728_v52  ;;  %v2298_v16 = vld [vmem:[#allocation2 + $0x6a] sm:$0xff]  ;;  %v1086_v62 = vmul.f32 %v2272_v27, %v2096_v0  ;;  %v602_v52 = vmul.f32 %v2236_v22, %v2054_v31 }
  0x57   : > { %546 = vst [vmem:[#allocation2 + $0xf1] sm:$0xff] %v2029_v7  ;;  %v1182_v19 = vmul.f32 %v2107_v25, %v2261_v4  ;;  %v600_v7 = vmul.f32 %v1146_v36, %v2054_v31  ;;  %v1212_v28 = vadd.f32 %v1180_v39, %v1114_v15  ;;  %v2284_v39 = vld [vmem:[#allocation2 + $0x68] sm:$0xff]  ;;  %v2322_v15 = vld [vmem:[#allocation2 + $0x7a] sm:$0xff] }
  0x58   : > { %547 = vst [vmem:[#allocation2 + $0xf9] sm:$0xff] %v2031_v8  ;;  %v1018_v8 = vadd.f32 %v2139_v1, %v921_v53  ;;  %v922_v54 = vadd.f32 %v890_v3, %v825_v38  ;;  %v1183_v40 = vmul.f32 %v2107_v25, %v2284_v39  ;;  %v2880_v3 = vld [vmem:[#allocation10_spill] sm:$0xff]  ;;  %v2882_v22 = vld [vmem:[#allocation17_spill] sm:$0xff] }
  0x59   : > { %548 = vst [vmem:[#allocation2 + $0x109] sm:$0xff] %v2033_v9  ;;  %v729_v23 = vadd.f32 %v2161_v46, %v600_v7  ;;  %v1506_v9 = vmul.f32 %v1404_v12, %v1404_v12  ;;  %v1309_v36 = vadd.f32 %v2131_v34, %v1212_v28  ;;  %v1085_v46 = vmul.f32 %v2245_v44, %v2096_v0 }
  0x5a   : > { %549 = vst [vmem:[#allocation2 + $0x111] sm:$0xff] %v2035_v10  ;;  %v1507_v10 = vmul.f32 %v1405_v51, %v1405_v51  ;;  %v1115_v1 = vadd.f32 %v1083_v24, %v1018_v8  ;;  %v1019_v34 = vadd.f32 %v2152_v42, %v922_v54  ;;  %v2336_v8 = vld [vmem:[#allocation2 + $0x80] sm:$0xff]  ;;  %v2884_v54 = vld [vmem:[#allocation14_spill] sm:$0xff] }
  0x5b   : > { %550 = vst [vmem:[#allocation2 + $0x121] sm:$0xff] %v2044_v17  ;;  %v826_v2 = vadd.f32 %v794_v21, %v729_v23  ;;  %v1406_v17 = vadd.f32 %v1374_v14, %v1309_v36  ;;  %v731_v21 = vadd.f32 %v2882_v22, %v602_v52  ;;  %v798_v22 = vmul.f32 %v2298_v16, %v2075_v58 }
  0x5c   : > { %551 = vst [vmem:[#allocation2 + $0x129] sm:$0xff] %v2068_v55  ;;  %v601_v55 = vmul.f32 %v2222_v33, %v2054_v31  ;;  %v1213_v24 = vadd.f32 %v1181_v6, %v1115_v1  ;;  %v1116_v49 = vadd.f32 %v1084_v47, %v1019_v34  ;;  %v1377_v33 = vmul.f32 %v2175_v50, %v2298_v16  ;;  %v2881_v47 = vld [vmem:[#allocation13_spill] sm:$0xff] }
  0x5d   : > { %552 = vst [vmem:[#allocation2 + $0x139] sm:$0xff] %v2070_v56  ;;  %v923_v45 = vadd.f32 %v891_v30, %v826_v2  ;;  %v892_v56 = vmul.f32 %v2261_v4, %v2089_v11  ;;  %v1468_v14 = vadd.f32 %v1406_v17, %v1404_v12  ;;  %v1508_v42 = vmul.f32 %v1406_v17, %v1406_v17  ;;  %v2885_v2 = vld [vmem:[#allocation5_spill] sm:$0xff] }
  0x5e   : > { %553 = vst [vmem:[#allocation2 + $0x141] sm:$0xff] %v2072_v57  ;;  %v730_v41 = vadd.f32 %v2179_v43, %v601_v55  ;;  %v1310_v57 = vadd.f32 %v2144_v37, %v1213_v24  ;;  %v2315_v43 = vld [vmem:[#allocation2 + $0x78] sm:$0xff]  ;;  %v1214_v6 = vadd.f32 %v1182_v19, %v1116_v49  ;;  %v1378_v19 = vmul.f32 %v2175_v50, %v2322_v15  ;;  %v2349_v55 = vld [vmem:[#allocation2 + $0x82] sm:$0xff] }
  0x5f   : > { %554 = vst [vmem:[#allocation2 + $0x151] sm:$0xff] %v2078_v59  ;;  %v1020_v59 = vadd.f32 %v2165_v48, %v923_v45  ;;  %v1184_v37 = vmul.f32 %v2107_v25, %v2315_v43  ;;  %v1087_v30 = vmul.f32 %v2298_v16, %v2096_v0  ;;  %v603_v24 = vmul.f32 %v2261_v4, %v2054_v31 }
  0x60   : > { %555 = vst [vmem:[#allocation2 + $0x159] sm:$0xff] %v2080_v60  ;;  %v1538_v60 = vadd.f32 %v1508_v42, %v1506_v9  ;;  %v827_v35 = vadd.f32 %v795_v18, %v730_v41  ;;  %v1407_v48 = vadd.f32 %v2252_v13, %v1310_v57  ;;  %v1311_v5 = vadd.f32 %v2881_v47, %v1214_v6  ;;  %v2887_v41 = vld [vmem:[#allocation19_spill] sm:$0xff]  ;;  %v2888_v6 = vld [vmem:[#allocation18_spill] sm:$0xff] }
  0x61   : > { %556 = vst [vmem:[#allocation2 + $0x169] sm:$0xff] %v2082_v61  ;;  %v1117_v63 = vadd.f32 %v1085_v46, %v1020_v59  ;;  %v796_v61 = vmul.f32 %v2245_v44, %v2075_v58  ;;  %v893_v13 = vmul.f32 %v2284_v39, %v2089_v11  ;;  %v1185_v9 = vmul.f32 %v2107_v25, %v2336_v8  ;;  %v2886_v46 = vld [vmem:[#allocation12_spill] sm:$0xff] }
  0x62   : > { %557 = vst [vmem:[#allocation2 + $0x171] sm:$0xff] %v2880_v3  ;;  %v924_v53 = vadd.f32 %v892_v56, %v827_v35  ;;  %v1483_v7 = vadd.f32 %v1407_v48, %v1405_v51  ;;  %v1509_v28 = vmul.f32 %v1407_v48, %v1407_v48  ;;  %v1408_v44 = vadd.f32 %v1376_v29, %v1311_v5  ;;  %v2364_v35 = vld [vmem:[#allocation2 + $0x90] sm:$0xff]  ;;  %v2889_v3 = vld [vmem:[#allocation16_spill] sm:$0xff] }
  0x63   : > { %1436 = vst [vmem:[%s2307_s11] sm:$0xff] %v1404_v12  ;;  %v1215_v38 = vadd.f32 %v1183_v40, %v1117_v63  ;;  %v2883_v12 = vld [vmem:[#allocation15_spill] sm:$0xff]  ;;  %v828_v1 = vadd.f32 %v796_v61, %v731_v21  ;;  %v1282_v34 = vmul.f32 %v2886_v46, %v2885_v2  ;;  %v797_v56 = vmul.f32 %v2272_v27, %v2075_v58 }
  0x64   : > { %1437 = vst [vmem:[%s2307_s11 + $0x8] sm:$0xff] %v1405_v51  ;;  %v1021_v23 = vadd.f32 %v2883_v12, %v924_v53  ;;  %v1553_v36 = vadd.f32 %v1509_v28, %v1507_v10  ;;  %v1510_v29 = vmul.f32 %v1408_v44, %v1408_v44  ;;  %v1379_v10 = vmul.f32 %v2175_v50, %v2349_v55  ;;  %v2371_v61 = vld [vmem:[#allocation2 + $0x92] sm:$0xff]  ;;  %v2891_v53 = vld [vmem:[#allocation9_spill] sm:$0xff] }
  0x65   : > { %1438 = vst [vmem:[%s2307_s11 + $0x10] sm:$0xff] %v1406_v17  ;;  %v1312_v51 = vadd.f32 %v2884_v54, %v1215_v38  ;;  %v1469_v17 = vadd.f32 %v1468_v14, %v1408_v44  ;;  %v925_v18 = vadd.f32 %v893_v13, %v828_v1  ;;  %v732_v57 = vadd.f32 %v2887_v41, %v603_v24  ;;  %v2890_v5 = vld [vmem:[#allocation3_spill] sm:$0xff]  ;;  %v2893_v54 = vld [vmem:[#allocation20_spill] sm:$0xff] }
  0x66   : > { %1439 = vst [vmem:[%s2307_s11 + $0x18] sm:$0xff] %v1407_v48  ;;  %v1118_v40 = vadd.f32 %v1086_v62, %v1021_v23  ;;  %v1539_v42 = vadd.f32 %v1538_v60, %v1510_v29  ;;  %v894_v14 = vmul.f32 %v2315_v43, %v2089_v11  ;;  %v1186_v60 = vmul.f32 %v2107_v25, %v2364_v35  ;;  %v2892_v23 = vld [vmem:[#allocation11_spill] sm:$0xff]  ;;  %v2389_v1 = vld [vmem:[#allocation2 + $0x98] sm:$0xff] }
  0x67   : > { %1440 = vst [vmem:[%s2307_s11 + $0x20] sm:$0xff] %v1408_v44  ;;  %v1409_v45 = vadd.f32 %v1377_v33, %v1312_v51  ;;  %v1022_v4 = vadd.f32 %v2888_v6, %v925_v18  ;;  %v1088_v33 = vmul.f32 %v2322_v15, %v2096_v0  ;;  %v829_v27 = vadd.f32 %v797_v56, %v732_v57 }
  0x68   : > { %v1216_v49 = vadd.f32 %v1184_v37, %v1118_v40  ;;  %v1283_v37 = vmul.f32 %v2886_v46, %v1977_v20  ;;  %v604_v47 = vmul.f32 %v2284_v39, %v2054_v31  ;;  %v701_v13 = vmul.f32 %v2891_v53, %v2890_v5  ;;  %v2894_v40 = vld [vmem:[#allocation6_spill] sm:$0xff] }
  0x69   : > { %1441 = vst [vmem:[%s2307_s11 + $0x28] sm:$0xff] %v1409_v45  ;;  %v1484_v59 = vadd.f32 %v1483_v7, %v1409_v45  ;;  %v1511_v62 = vmul.f32 %v1409_v45, %v1409_v45  ;;  %v1119_v52 = vadd.f32 %v1087_v30, %v1022_v4  ;;  %v926_v28 = vadd.f32 %v894_v14, %v829_v27  ;;  %v2412_v27 = vld [vmem:[#allocation2 + $0xa8] sm:$0xff] }
  0x6a   : > { %v1313_v48 = vadd.f32 %v2889_v3, %v1216_v49  ;;  %v1380_v38 = vmul.f32 %v2175_v50, %v2371_v61  ;;  %v733_v44 = vadd.f32 %v701_v13, %v604_v47  ;;  %v895_v12 = vmul.f32 %v2336_v8, %v2089_v11  ;;  %v2895_v49 = vld [vmem:[#allocation4_spill] sm:$0xff] }
  0x6b   : > { %v1554_v63 = vadd.f32 %v1553_v36, %v1511_v62  ;;  %v1217_v21 = vadd.f32 %v1185_v9, %v1119_v52  ;;  %v992_v30 = vmul.f32 %v2892_v23, %v2885_v2  ;;  %v1089_v51 = vmul.f32 %v2349_v55, %v2096_v0 }
  0x6c   : > { %v1410_v7 = vadd.f32 %v1378_v19, %v1313_v48  ;;  %v1023_v19 = vadd.f32 %v2893_v54, %v926_v28  ;;  %v830_v16 = vadd.f32 %v798_v22, %v733_v44  ;;  %v1187_v9 = vmul.f32 %v2107_v25, %v2389_v1  ;;  %v2418_v28 = vld [vmem:[#allocation2 + $0xaa] sm:$0xff] }
  0x6d   : > { %v1314_v29 = vadd.f32 %v1282_v34, %v1217_v21  ;;  %v1284_v24 = vmul.f32 %v2886_v46, %v2894_v40  ;;  %v605_v56 = vmul.f32 %v2315_v43, %v2054_v31  ;;  %v702_v41 = vmul.f32 %v2891_v53, %v2895_v49 }
  0x6e   : > { %1442 = vst [vmem:[%s2307_s11 + $0x30] sm:$0xff] %v1410_v7  ;;  %v1470_v39 = vadd.f32 %v1469_v17, %v1410_v7  ;;  %v1512_v36 = vmul.f32 %v1410_v7, %v1410_v7  ;;  %v1120_v18 = vadd.f32 %v1088_v33, %v1023_v19  ;;  %v2395_v17 = vld [vmem:[#allocation2 + $0x9a] sm:$0xff]  ;;  %v927_v34 = vadd.f32 %v895_v12, %v830_v16 }
  0x6f   : > { %v1411_v57 = vadd.f32 %v1379_v10, %v1314_v29  ;;  %v1381_v14 = vmul.f32 %v2175_v50, %v2395_v17  ;;  %v799_v62 = vmul.f32 %v2322_v15, %v2075_v58  ;;  %v734_v4 = vadd.f32 %v702_v41, %v605_v56  ;;  %v2441_v41 = vld [vmem:[#allocation2 + $0xb2] sm:$0xff] }
  0x70   : > { %v1540_v45 = vadd.f32 %v1539_v42, %v1512_v36  ;;  %v1218_v6 = vadd.f32 %v1186_v60, %v1120_v18  ;;  %v896_v42 = vmul.f32 %v2364_v35, %v2089_v11  ;;  %v993_v33 = vmul.f32 %v2892_v23, %v1977_v20  ;;  %v2896_v60 = vld [vmem:[#allocation7_spill] sm:$0xff] }
  0x71   : > { %1443 = vst [vmem:[%s2307_s11 + $0x38] sm:$0xff] %v1411_v57  ;;  %v1485_v43 = vadd.f32 %v1484_v59, %v1411_v57  ;;  %v1513_v3 = vmul.f32 %v1411_v57, %v1411_v57  ;;  %v1024_v48 = vadd.f32 %v992_v30, %v927_v34  ;;  %v1090_v10 = vmul.f32 %v2371_v61, %v2096_v0 }
  0x72   : > { %v1315_v52 = vadd.f32 %v1283_v37, %v1218_v6  ;;  %v831_v47 = vadd.f32 %v799_v62, %v734_v4  ;;  %v1188_v15 = vmul.f32 %v2107_v25, %v2412_v27  ;;  %v1285_v5 = vmul.f32 %v2886_v46, %v2896_v60 }
  0x73   : > { %v1555_v13 = vadd.f32 %v1554_v63, %v1513_v3  ;;  %v1121_v7 = vadd.f32 %v1089_v51, %v1024_v48  ;;  %v606_v59 = vmul.f32 %v2336_v8, %v2054_v31  ;;  %v703_v22 = vmul.f32 %v2891_v53, %v2885_v2  ;;  %v2435_v51 = vld [vmem:[#allocation2 + $0xb0] sm:$0xff]  ;;  %v2458_v48 = vld [vmem:[#allocation2 + $0xc0] sm:$0xff] }
  0x74   : > { %v1412_v21 = vadd.f32 %v1380_v38, %v1315_v52  ;;  %v928_v37 = vadd.f32 %v896_v42, %v831_v47  ;;  %v1382_v44 = vmul.f32 %v2175_v50, %v2418_v28  ;;  %v800_v12 = vmul.f32 %v2349_v55, %v2075_v58 }
  0x75   : > { %v1219_v30 = vadd.f32 %v1187_v9, %v1121_v7  ;;  %v735_v36 = vadd.f32 %v703_v22, %v606_v59  ;;  %v897_v63 = vmul.f32 %v2389_v1, %v2089_v11  ;;  %v994_v54 = vmul.f32 %v2892_v23, %v2894_v40  ;;  %v2897_v9 = vld [vmem:[#allocation8_spill] sm:$0xff] }
  0x76   : > { %1444 = vst [vmem:[%s2307_s11 + $0x40] sm:$0xff] %v1412_v21  ;;  %v1471_v8 = vadd.f32 %v1470_v39, %v1412_v21  ;;  %v1514_v19 = vmul.f32 %v1412_v21, %v1412_v21  ;;  %v1025_v2 = vadd.f32 %v993_v33, %v928_v37  ;;  %v1091_v38 = vmul.f32 %v2395_v17, %v2096_v0 }
  0x77   : > { %v1316_v29 = vadd.f32 %v1284_v24, %v1219_v30  ;;  %v832_v16 = vadd.f32 %v800_v12, %v735_v36  ;;  %v1189_v55 = vmul.f32 %v2107_v25, %v2435_v51  ;;  %v1286_v18 = vmul.f32 %v2886_v46, %v2897_v9  ;;  %v351_v36 = vld [vmem:[%s1880_s27 + $0xf8] sm:$0xff] }
  0x78   : > { %v1541_v56 = vadd.f32 %v1540_v45, %v1514_v19  ;;  %v1122_v49 = vadd.f32 %v1090_v10, %v1025_v2  ;;  %v607_v39 = vmul.f32 %v2364_v35, %v2054_v31  ;;  %v704_v57 = vmul.f32 %v2891_v53, %v1977_v20  ;;  %v2483_v19 = vld [vmem:[#allocation2 + $0xc8] sm:$0xff] }
  0x79   : > { %v1413_v34 = vadd.f32 %v1381_v14, %v1316_v29  ;;  %v929_v24 = vadd.f32 %v897_v63, %v832_v16  ;;  %v1383_v62 = vmul.f32 %v2175_v50, %v2441_v41  ;;  %v801_v6 = vmul.f32 %v2371_v61, %v2075_v58 }
  0x7a   : > { %v1220_v4 = vadd.f32 %v1188_v15, %v1122_v49  ;;  %v736_v42 = vadd.f32 %v704_v57, %v607_v39  ;;  %v898_v45 = vmul.f32 %v2412_v27, %v2089_v11  ;;  %v995_v33 = vmul.f32 %v2892_v23, %v2896_v60  ;;  %v2464_v60 = vld [vmem:[#allocation2 + $0xc2] sm:$0xff] }
  0x7b   : > { %1445 = vst [vmem:[%s2307_s11 + $0x48] sm:$0xff] %v1413_v34  ;;  %v1486_v35 = vadd.f32 %v1485_v43, %v1413_v34  ;;  %v1515_v3 = vmul.f32 %v1413_v34, %v1413_v34  ;;  %v1026_v20 = vadd.f32 %v994_v54, %v929_v24  ;;  %v1092_v14 = vmul.f32 %v2418_v28, %v2096_v0 }
  0x7c   : > { %v1317_v10 = vadd.f32 %v1285_v5, %v1220_v4  ;;  %v833_v52 = vadd.f32 %v801_v6, %v736_v42  ;;  %v1190_v61 = vmul.f32 %v2107_v25, %v2458_v48  ;;  %v1287_v47 = vmul.f32 %v2886_v46, %v1987_v26 }
  0x7d   : > { %v1556_v15 = vadd.f32 %v1555_v13, %v1515_v3  ;;  %v1123_v43 = vadd.f32 %v1091_v38, %v1026_v20  ;;  %v608_v7 = vmul.f32 %v2389_v1, %v2054_v31  ;;  %v705_v5 = vmul.f32 %v2891_v53, %v2894_v40  ;;  %v350_v1 = vld [vmem:[%s1880_s27 + $0xf0] sm:$0xff] }
  0x7e   : > { %v1414_v59 = vadd.f32 %v1382_v44, %v1317_v10  ;;  %v930_v22 = vadd.f32 %v898_v45, %v833_v52  ;;  %v1384_v21 = vmul.f32 %v2175_v50, %v2464_v60  ;;  %v802_v37 = vmul.f32 %v2395_v17, %v2075_v58  ;;  %v673_v17 = vld [vmem:[#allocation2 + $0xa9] sm:$0xff]  ;;  %v964_v52 = vld [vmem:[#allocation2 + $0xc1] sm:$0xff] }
  0x7f   : > { %v1221_v26 = vadd.f32 %v1189_v55, %v1123_v43  ;;  %v737_v12 = vadd.f32 %v705_v5, %v608_v7  ;;  %v899_v13 = vmul.f32 %v2435_v51, %v2089_v11  ;;  %v996_v30 = vmul.f32 %v2892_v23, %v2897_v9 }
  0x80   : > { %1446 = vst [vmem:[%s2307_s11 + $0x50] sm:$0xff] %v1414_v59  ;;  %v1472_v40 = vadd.f32 %v1471_v8, %v1414_v59  ;;  %v1516_v44 = vmul.f32 %v1414_v59, %v1414_v59  ;;  %v1027_v63 = vadd.f32 %v995_v33, %v930_v22  ;;  %v1093_v54 = vmul.f32 %v2441_v41, %v2096_v0  ;;  %v1785_v8 = vld [vmem:[%s2841_s1] ss:$0 sm:$0xff] }
  0x81   : > { %v1318_v2 = vadd.f32 %v1286_v18, %v1221_v26  ;;  %v834_v38 = vadd.f32 %v802_v37, %v737_v12  ;;  %v1191_v29 = vmul.f32 %v2107_v25, %v2483_v19  ;;  %v1288_v16 = vmul.f32 %v2886_v46, %v1995_v32  ;;  %v1786_v32 = vld [vmem:[%s2842_s2] ss:$0 sm:$0xff]  ;;  %v674_v37 = vld [vmem:[#allocation2 + $0xb1] sm:$0xff] }
  0x82   : > { %v1542_v55 = vadd.f32 %v1541_v56, %v1516_v44  ;;  %v1124_v9 = vadd.f32 %v1092_v14, %v1027_v63  ;;  %v386_v49 = vmul.f32 %v1785_v8, %v350_v1  ;;  %v387_v39 = vmul.f32 %v1785_v8, %v351_v36  ;;  %v1353_v8 = vld [vmem:[#allocation2 + $0xda] sm:$0xff] }
  0x83   : > { %v1415_v57 = vadd.f32 %v1383_v62, %v1318_v2  ;;  %v931_v34 = vadd.f32 %v899_v13, %v834_v38  ;;  %v609_v18 = vmul.f32 %v2412_v27, %v2054_v31  ;;  %v706_v24 = vmul.f32 %v2891_v53, %v673_v17 }
  0x84   : > { %v1222_v6 = vadd.f32 %v1190_v61, %v1124_v9  ;;  %v422_v56 = vadd.f32 %v1786_v32, %v386_v49  ;;  %v423_v4 = vadd.f32 %v1786_v32, %v387_v39  ;;  %v803_v42 = vmul.f32 %v2418_v28, %v2075_v58  ;;  %v1352_v28 = vld [vmem:[#allocation2 + $0xca] sm:$0xff] }
  0x85   : > { %1447 = vst [vmem:[%s2307_s11 + $0x58] sm:$0xff] %v1415_v57  ;;  %v1487_v45 = vadd.f32 %v1486_v35, %v1415_v57  ;;  %v1517_v33 = vmul.f32 %v1415_v57, %v1415_v57  ;;  %v1028_v62 = vadd.f32 %v996_v30, %v931_v34  ;;  %v738_v3 = vadd.f32 %v706_v24, %v609_v18  ;;  %v2511_v30 = vld [vmem:[#allocation2 + $0xd8] sm:$0xff]  ;;  %v965_v49 = vld [vmem:[#allocation2 + $0xc9] sm:$0xff] }
  0x86   : > { %v1319_v20 = vadd.f32 %v1287_v47, %v1222_v6  ;;  %v454_v14 = vmax.f32 %v422_v56, 0.0  ;;  %v455_v27 = vmax.f32 %v423_v4, 0.0  ;;  %v900_v10 = vmul.f32 %v2458_v48, %v2089_v11 }
  0x87   : > { %v1557_v61 = vadd.f32 %v1556_v15, %v1517_v33  ;;  %v1125_v43 = vadd.f32 %v1093_v54, %v1028_v62  ;;  %v835_v7 = vadd.f32 %v803_v42, %v738_v3  ;;  %v997_v5 = vmul.f32 %v2892_v23, %v964_v52  ;;  %v1256_v54 = vld [vmem:[#allocation2 + $0xd9] sm:$0xff] }
  0x88   : > { %v1416_v59 = vadd.f32 %v1384_v21, %v1319_v20  ;;  %v2504_v22 = vmin.f32 %v454_v14, 6.0  ;;  %v2506_v35 = vmin.f32 %v455_v27, 6.0  ;;  %v1385_v26 = vmul.f32 %v2175_v50, %v1352_v28  ;;  %v1160_v3 = vld [vmem:[#allocation2 + $0xe0] sm:$0xff] }
  0x89   : > { %v1223_v47 = vadd.f32 %v1191_v29, %v1125_v43  ;;  %v932_v12 = vadd.f32 %v900_v10, %v835_v7  ;;  %v1094_v13 = vmul.f32 %v2464_v60, %v2096_v0  ;;  %v1192_v21 = vmul.f32 %v2107_v25, %v2511_v30 }
  0x8a   : > { %1448 = vst [vmem:[%s2307_s11 + $0x60] sm:$0xff] %v1416_v59  ;;  %v1473_v15 = vadd.f32 %v1472_v40, %v1416_v59  ;;  %v1518_v1 = vmul.f32 %v1416_v59, %v1416_v59  ;;  %v610_v36 = vmul.f32 %v2435_v51, %v2054_v31  ;;  %v707_v17 = vmul.f32 %v2891_v53, %v674_v37 }
  0x8b   : > { %v1320_v44 = vadd.f32 %v1288_v16, %v1223_v47  ;;  %558 = vst [vmem:[#allocation2 + $0x181] sm:$0xff] %v2504_v22  ;;  %v1029_v63 = vadd.f32 %v997_v5, %v932_v12  ;;  %v804_v2 = vmul.f32 %v2441_v41, %v2075_v58  ;;  %v1289_v40 = vmul.f32 %v2886_v46, %v1256_v54 }
  0x8c   : > { %v1543_v38 = vadd.f32 %v1542_v55, %v1518_v1  ;;  %559 = vst [vmem:[#allocation2 + $0x189] sm:$0xff] %v2506_v35  ;;  %v739_v51 = vadd.f32 %v707_v17, %v610_v36  ;;  %v901_v16 = vmul.f32 %v2483_v19, %v2089_v11  ;;  %v1386_v39 = vmul.f32 %v2175_v50, %v1353_v8  ;;  %v1161_v1 = vld [vmem:[#allocation2 + $0xf0] sm:$0xff] }
  0x8d   : > { %v1417_v29 = vadd.f32 %v1385_v26, %v1320_v44  ;;  %v1126_v9 = vadd.f32 %v1094_v13, %v1029_v63  ;;  %v998_v57 = vmul.f32 %v2892_v23, %v965_v49  ;;  %v611_v41 = vmul.f32 %v2458_v48, %v2054_v31  ;;  %v1354_v13 = vld [vmem:[#allocation2 + $0xe2] sm:$0xff] }
  0x8e   : > { %v708_v55 = vmul.f32 %v964_v52, %v2891_v53  ;;  %v836_v6 = vadd.f32 %v804_v2, %v739_v51  ;;  %v805_v56 = vmul.f32 %v2464_v60, %v2075_v58  ;;  %v902_v4 = vmul.f32 %v2511_v30, %v2089_v11 }
  0x8f   : > { %1449 = vst [vmem:[%s2307_s11 + $0x68] sm:$0xff] %v1417_v29  ;;  %v2532_v34 = vadd.f32 %v1487_v45, %v1417_v29  ;;  %v1519_v18 = vmul.f32 %v1417_v29, %v1417_v29  ;;  %v1224_v24 = vadd.f32 %v1192_v21, %v1126_v9  ;;  %v1095_v48 = vmul.f32 %v1352_v28, %v2096_v0  ;;  %v1257_v45 = vld [vmem:[#allocation2 + $0xe1] sm:$0xff]  ;;  %v1258_v21 = vld [vmem:[#allocation2 + $0xf1] sm:$0xff] }
  0x90   : > { %v740_v32 = vadd.f32 %v708_v55, %v611_v41  ;;  %v933_v62 = vadd.f32 %v901_v16, %v836_v6  ;;  %v1193_v20 = vmul.f32 %v2107_v25, %v1160_v3  ;;  %v1290_v14 = vmul.f32 %v2886_v46, %v1257_v45 }
  0x91   : > { %v2538_v42 = vadd.f32 %v1557_v61, %v1519_v18  ;;  %v1321_v33 = vadd.f32 %v1289_v40, %v1224_v24  ;;  %v999_v10 = vmul.f32 %v1256_v54, %v2892_v23  ;;  %v612_v61 = vmul.f32 %v2483_v19, %v2054_v31  ;;  %v1162_v18 = vld [vmem:[#allocation2 + $0xf8] sm:$0xff] }
  0x92   : > { %v837_v27 = vadd.f32 %v805_v56, %v740_v32  ;;  %v1030_v52 = vadd.f32 %v998_v57, %v933_v62  ;;  %v709_v43 = vmul.f32 %v965_v49, %v2891_v53  ;;  %v1096_v5 = vmul.f32 %v1353_v8, %v2096_v0 }
  0x93   : > { %v1418_v60 = vadd.f32 %v1386_v39, %v1321_v33  ;;  %v806_v59 = vmul.f32 %v1352_v28, %v2075_v58  ;;  %v903_v37 = vmul.f32 %v1160_v3, %v2089_v11  ;;  %v1387_v19 = vmul.f32 %v2175_v50, %v1354_v13  ;;  %v1355_v39 = vld [vmem:[#allocation2 + $0xf2] sm:$0xff] }
  0x94   : > { %v934_v7 = vadd.f32 %v902_v4, %v837_v27  ;;  %v1127_v12 = vadd.f32 %v1095_v48, %v1030_v52  ;;  %v741_v36 = vadd.f32 %v709_v43, %v612_v61  ;;  %v1194_v63 = vmul.f32 %v2107_v25, %v1161_v1  ;;  %v1259_v4 = vld [vmem:[#allocation2 + $0xf9] sm:$0xff] }
  0x95   : > { %1450 = vst [vmem:[%s2307_s11 + $0x70] sm:$0xff] %v1418_v60  ;;  %v2551_v47 = vadd.f32 %v1473_v15, %v1418_v60  ;;  %v1520_v26 = vmul.f32 %v1418_v60, %v1418_v60  ;;  %v1291_v17 = vmul.f32 %v2886_v46, %v1258_v21  ;;  %v1000_v15 = vmul.f32 %v1257_v45, %v2892_v23  ;;  %v1356_v52 = vld [vmem:[#allocation2 + $0xfa] sm:$0xff] }
  0x96   : > { %v1031_v44 = vadd.f32 %v999_v10, %v934_v7  ;;  %v1225_v28 = vadd.f32 %v1193_v20, %v1127_v12  ;;  %v838_v40 = vadd.f32 %v806_v59, %v741_v36  ;;  %v613_v9 = vmul.f32 %v2511_v30, %v2054_v31 }
  0x97   : > { %v2556_v2 = vadd.f32 %v1543_v38, %v1520_v26  ;;  %v710_v51 = vmul.f32 %v1256_v54, %v2891_v53  ;;  %v807_v16 = vmul.f32 %v1353_v8, %v2075_v58  ;;  %v1097_v41 = vmul.f32 %v1354_v13, %v2096_v0  ;;  %v1260_v26 = vld [vmem:[#allocation2 + $0x109] sm:$0xff] }
  0x98   : > { %v1128_v29 = vadd.f32 %v1096_v5, %v1031_v44  ;;  %v1322_v49 = vadd.f32 %v1290_v14, %v1225_v28  ;;  %v935_v57 = vadd.f32 %v903_v37, %v838_v40  ;;  %v1388_v55 = vmul.f32 %v2175_v50, %v1355_v39 }
  0x99   : > { %v742_v24 = vadd.f32 %v710_v51, %v613_v9  ;;  %v904_v6 = vmul.f32 %v1161_v1, %v2089_v11  ;;  %v1195_v54 = vmul.f32 %v2107_v25, %v1162_v18  ;;  %v1001_v8 = vmul.f32 %v1258_v21, %v2892_v23 }
  0x9a   : > { %v1226_v38 = vadd.f32 %v1194_v63, %v1128_v29  ;;  %v2566_v32 = vadd.f32 %v1387_v19, %v1322_v49  ;;  %v1032_v30 = vadd.f32 %v1000_v15, %v935_v57  ;;  %v614_v62 = vmul.f32 %v1160_v3, %v2054_v31  ;;  %v1357_v15 = vld [vmem:[#allocation2 + $0x10a] sm:$0xff] }
  0x9b   : > { %v839_v33 = vadd.f32 %v807_v16, %v742_v24  ;;  %v711_v48 = vmul.f32 %v1257_v45, %v2891_v53  ;;  %v1292_v14 = vmul.f32 %v2886_v46, %v1259_v4  ;;  %v1098_v27 = vmul.f32 %v1355_v39, %v2096_v0  ;;  %v1163_v45 = vld [vmem:[#allocation2 + $0x108] sm:$0xff]  ;;  %v1164_v29 = vld [vmem:[#allocation2 + $0x110] sm:$0xff] }
  0x9c   : > { %v1323_v56 = vadd.f32 %v1291_v17, %v1226_v38  ;;  %1451 = vst [vmem:[%s2307_s11 + $0x78] sm:$0xff] %v2566_v32  ;;  %v1129_v20 = vadd.f32 %v1097_v41, %v1032_v30  ;;  %v808_v10 = vmul.f32 %v1354_v13, %v2075_v58  ;;  %v905_v7 = vmul.f32 %v1162_v18, %v2089_v11  ;;  %v1261_v38 = vld [vmem:[#allocation2 + $0x111] sm:$0xff] }
  0x9d   : > { %v936_v61 = vadd.f32 %v904_v6, %v839_v33  ;;  %v743_v43 = vadd.f32 %v711_v48, %v614_v62  ;;  %v1389_v3 = vmul.f32 %v2175_v50, %v1356_v52  ;;  %v1196_v37 = vmul.f32 %v2107_v25, %v1163_v45 }
  0x9e   : > { %v2577_v60 = vadd.f32 %v1388_v55, %v1323_v56  ;;  %v1227_v5 = vadd.f32 %v1195_v54, %v1129_v20  ;;  %v1002_v13 = vmul.f32 %v1259_v4, %v2892_v23  ;;  %v1293_v19 = vmul.f32 %v2886_v46, %v1260_v26 }
  0x9f   : > { %v1033_v59 = vadd.f32 %v1001_v8, %v936_v61  ;;  %v840_v12 = vadd.f32 %v808_v10, %v743_v43  ;;  %v1099_v17 = vmul.f32 %v1356_v52, %v2096_v0  ;;  %v615_v28 = vmul.f32 %v1161_v1, %v2054_v31 }
  0xa0   : > { %1452 = vst [vmem:[%s2307_s11 + $0x80] sm:$0xff] %v2577_v60  ;;  %v1324_v36 = vadd.f32 %v1292_v14, %v1227_v5  ;;  %v712_v9 = vmul.f32 %v1258_v21, %v2891_v53  ;;  %v809_v51 = vmul.f32 %v1355_v39, %v2075_v58  ;;  %v1390_v49 = vmul.f32 %v2175_v50, %v1357_v15  ;;  %v1358_v21 = vld [vmem:[#allocation2 + $0x112] sm:$0xff]  ;;  %v1262_v5 = vld [vmem:[#allocation2 + $0x121] sm:$0xff] }
  0xa1   : > { %v1130_v44 = vadd.f32 %v1098_v27, %v1033_v59  ;;  %v937_v63 = vadd.f32 %v905_v7, %v840_v12  ;;  %v1197_v41 = vmul.f32 %v2107_v25, %v1164_v29  ;;  %v906_v1 = vmul.f32 %v1163_v45, %v2089_v11 }
  0xa2   : > { %v2588_v40 = vadd.f32 %v1389_v3, %v1324_v36  ;;  %v744_v55 = vadd.f32 %v712_v9, %v615_v28  ;;  %v1294_v30 = vmul.f32 %v2886_v46, %v1261_v38  ;;  %v1003_v39 = vmul.f32 %v1260_v26, %v2892_v23  ;;  %v1359_v28 = vld [vmem:[#allocation2 + $0x122] sm:$0xff] }
  0xa3   : > { %v1228_v16 = vadd.f32 %v1196_v37, %v1130_v44  ;;  %v1034_v57 = vadd.f32 %v1002_v13, %v937_v63  ;;  %v616_v8 = vmul.f32 %v1162_v18, %v2054_v31  ;;  %v713_v56 = vmul.f32 %v1259_v4, %v2891_v53  ;;  %v1165_v18 = vld [vmem:[#allocation2 + $0x120] sm:$0xff]  ;;  %v2622_v9 = vld [vmem:[#allocation2 + $0x128] sm:$0xff] }
  0xa4   : > { %1453 = vst [vmem:[%s2307_s11 + $0x88] sm:$0xff] %v2588_v40  ;;  %v841_v54 = vadd.f32 %v809_v51, %v744_v55  ;;  %v1391_v48 = vmul.f32 %v2175_v50, %v1358_v21  ;;  %v810_v20 = vmul.f32 %v1356_v52, %v2075_v58  ;;  %v1100_v27 = vmul.f32 %v1357_v15, %v2096_v0 }
  0xa5   : > { %v1325_v24 = vadd.f32 %v1293_v19, %v1228_v16  ;;  %v1131_v6 = vadd.f32 %v1099_v17, %v1034_v57  ;;  %v745_v10 = vadd.f32 %v713_v56, %v616_v8  ;;  %v907_v61 = vmul.f32 %v1164_v29, %v2089_v11 }
  0xa6   : > { %v938_v14 = vadd.f32 %v906_v1, %v841_v54  ;;  %v1198_v4 = vmul.f32 %v2107_v25, %v1165_v18  ;;  %v1004_v59 = vmul.f32 %v1261_v38, %v2892_v23  ;;  %v1295_v52 = vmul.f32 %v2886_v46, %v1262_v5 }
  0xa7   : > { %v2601_v33 = vadd.f32 %v1390_v49, %v1325_v24  ;;  %v1229_v62 = vadd.f32 %v1197_v41, %v1131_v6  ;;  %v842_v3 = vadd.f32 %v810_v20, %v745_v10  ;;  %v617_v12 = vmul.f32 %v1163_v45, %v2054_v31  ;;  %v1263_v41 = vld [vmem:[#allocation2 + $0x129] sm:$0xff] }
  0xa8   : > { %v1035_v7 = vadd.f32 %v1003_v39, %v938_v14  ;;  %v714_v13 = vmul.f32 %v1260_v26, %v2891_v53  ;;  %v1101_v44 = vmul.f32 %v1358_v21, %v2096_v0  ;;  %v811_v63 = vmul.f32 %v1357_v15, %v2075_v58  ;;  %v2639_v14 = vld [vmem:[#allocation2 + $0x138] sm:$0xff] }
  0xa9   : > { %1454 = vst [vmem:[%s2307_s11 + $0x90] sm:$0xff] %v2601_v33  ;;  %v1326_v43 = vadd.f32 %v1294_v30, %v1229_v62  ;;  %v939_v19 = vadd.f32 %v907_v61, %v842_v3  ;;  %v1489_v17 = vadd.f32 %v2532_v34, %v2566_v32  ;;  %v908_v16 = vmul.f32 %v1165_v18, %v2089_v11  ;;  %v1360_v30 = vld [vmem:[#allocation2 + $0x12a] sm:$0xff] }
  0xaa   : > { %v1132_v36 = vadd.f32 %v1100_v27, %v1035_v7  ;;  %v746_v51 = vadd.f32 %v714_v13, %v617_v12  ;;  %v1392_v26 = vmul.f32 %v2175_v50, %v1359_v28  ;;  %v1199_v57 = vmul.f32 %v2107_v25, %v2622_v9 }
  0xab   : > { %v2611_v37 = vadd.f32 %v1391_v48, %v1326_v43  ;;  %v1036_v49 = vadd.f32 %v1004_v59, %v939_v19  ;;  %v1521_v15 = vmul.f32 %v2566_v32, %v2566_v32  ;;  %v1296_v34 = vmul.f32 %v2886_v46, %v1263_v41  ;;  %v1264_v43 = vld [vmem:[#allocation2 + $0x139] sm:$0xff] }
  0xac   : > { %v1230_v45 = vadd.f32 %v1198_v4, %v1132_v36  ;;  %v843_v55 = vadd.f32 %v811_v63, %v746_v51  ;;  %v1005_v1 = vmul.f32 %v1262_v5, %v2892_v23  ;;  %v618_v54 = vmul.f32 %v1164_v29, %v2054_v31  ;;  %v1361_v36 = vld [vmem:[#allocation2 + $0x13a] sm:$0xff]  ;;  %v2663_v51 = vld [vmem:[%s2843_s3 + $0x8] ss:$0 sm:$0xff] }
  0xad   : > { %1455 = vst [vmem:[%s2307_s11 + $0x98] sm:$0xff] %v2611_v37  ;;  %v1133_v6 = vadd.f32 %v1101_v44, %v1036_v49  ;;  %v715_v39 = vmul.f32 %v1261_v38, %v2891_v53  ;;  %v1393_v8 = vmul.f32 %v2175_v50, %v1360_v30  ;;  %v1102_v62 = vmul.f32 %v1359_v28, %v2096_v0 }
  0xae   : > { %v1327_v24 = vadd.f32 %v1295_v52, %v1230_v45  ;;  %v940_v56 = vadd.f32 %v908_v16, %v843_v55  ;;  %v812_v32 = vmul.f32 %v1358_v21, %v2075_v58  ;;  %v909_v10 = vmul.f32 %v2622_v9, %v2089_v11 }
  0xaf   : > { %v1231_v20 = vadd.f32 %v1199_v57, %v1133_v6  ;;  %v747_v27 = vadd.f32 %v715_v39, %v618_v54  ;;  %v1559_v29 = vadd.f32 %v2538_v42, %v1521_v15  ;;  %v1475_v38 = vadd.f32 %v2551_v47, %v2577_v60  ;;  %v1362_v39 = vld [vmem:[#allocation2 + $0x142] sm:$0xff] }
  0xb0   : > { %v2637_v48 = vadd.f32 %v1392_v26, %v1327_v24  ;;  %v1037_v50 = vadd.f32 %v1005_v1, %v940_v56  ;;  %v1200_v61 = vmul.f32 %v2107_v25, %v2639_v14  ;;  %v1297_v7 = vmul.f32 %v2886_v46, %v1264_v43 }
  0xb1   : > { %v1328_v21 = vadd.f32 %v1296_v34, %v1231_v20  ;;  %v844_v4 = vadd.f32 %v812_v32, %v747_v27  ;;  %v1006_v3 = vmul.f32 %v1263_v41, %v2892_v23  ;;  %v619_v52 = vmul.f32 %v1165_v18, %v2054_v31  ;;  %v1265_v34 = vld [vmem:[#allocation2 + $0x141] sm:$0xff]  ;;  %v2688_v20 = vld [vmem:[#allocation2 + $0x150] sm:$0xff] }
  0xb2   : > { %1456 = vst [vmem:[%s2307_s11 + $0xa0] sm:$0xff] %v2637_v48  ;;  %v1134_v59 = vadd.f32 %v1102_v62, %v1037_v50  ;;  %v716_v42 = vmul.f32 %v1262_v5, %v2891_v53  ;;  %v813_v47 = vmul.f32 %v1359_v28, %v2075_v58  ;;  %v1522_v12 = vmul.f32 %v2577_v60, %v2577_v60  ;;  %v2666_v5 = vld [vmem:[#allocation2 + $0x140] sm:$0xff] }
  0xb3   : > { %v2657_v13 = vadd.f32 %v1393_v8, %v1328_v21  ;;  %v941_v19 = vadd.f32 %v909_v10, %v844_v4  ;;  %v1103_v44 = vmul.f32 %v1360_v30, %v2096_v0  ;;  %v1394_v18 = vmul.f32 %v2663_v51, %v1361_v36 }
  0xb4   : > { %v1232_v63 = vadd.f32 %v1200_v61, %v1134_v59  ;;  %v748_v28 = vadd.f32 %v716_v42, %v619_v52  ;;  %v910_v60 = vmul.f32 %v2639_v14, %v2089_v11  ;;  %v1545_v16 = vadd.f32 %v2556_v2, %v1522_v12 }
  0xb5   : > { %v1490_v45 = vadd.f32 %v1489_v17, %v2588_v40  ;;  %1457 = vst [vmem:[%s2307_s11 + $0xa8] sm:$0xff] %v2657_v13  ;;  %v1038_v26 = vadd.f32 %v1006_v3, %v941_v19  ;;  %v1201_v49 = vmul.f32 %v2107_v25, %v2666_v5  ;;  %v1523_v57 = vmul.f32 %v2588_v40, %v2588_v40 }
  0xb6   : > { %v1329_v15 = vadd.f32 %v1297_v7, %v1232_v63  ;;  %v845_v55 = vadd.f32 %v813_v47, %v748_v28  ;;  %v1007_v1 = vmul.f32 %v1264_v43, %v2892_v23  ;;  %v1298_v2 = vmul.f32 %v2886_v46, %v1265_v34  ;;  %v1266_v7 = vld [vmem:[#allocation2 + $0x151] sm:$0xff] }
  0xb7   : > { %v1135_v24 = vadd.f32 %v1103_v44, %v1038_v26  ;;  %v620_v17 = vmul.f32 %v2622_v9, %v2054_v31  ;;  %v717_v6 = vmul.f32 %v1263_v41, %v2891_v53  ;;  %v1104_v40 = vmul.f32 %v1361_v36, %v2096_v0  ;;  %v1363_v47 = vld [vmem:[#allocation2 + $0x152] sm:$0xff] }
  0xb8   : > { %v2683_v54 = vadd.f32 %v1394_v18, %v1329_v15  ;;  %v942_v8 = vadd.f32 %v910_v60, %v845_v55  ;;  %v814_v56 = vmul.f32 %v1360_v30, %v2075_v58  ;;  %v1395_v32 = vmul.f32 %v2663_v51, %v1362_v39  ;;  %v2709_v18 = vld [vmem:[#allocation2 + $0x158] sm:$0xff] }
  0xb9   : > { %v1233_v62 = vadd.f32 %v1201_v49, %v1135_v24  ;;  %v749_v27 = vadd.f32 %v717_v6, %v620_v17  ;;  %v911_v10 = vmul.f32 %v2666_v5, %v2089_v11  ;;  %v1560_v9 = vadd.f32 %v1559_v29, %v1523_v57  ;;  %v1267_v15 = vld [vmem:[#allocation2 + $0x159] sm:$0xff] }
  0xba   : > { %v1476_v41 = vadd.f32 %v1475_v38, %v2601_v33  ;;  %1458 = vst [vmem:[%s2307_s11 + $0xb0] sm:$0xff] %v2683_v54  ;;  %v1039_v50 = vadd.f32 %v1007_v1, %v942_v8  ;;  %v1202_v61 = vmul.f32 %v2107_v25, %v2688_v20  ;;  %v1524_v30 = vmul.f32 %v2601_v33, %v2601_v33  ;;  %v1364_v6 = vld [vmem:[#allocation2 + $0x15a] sm:$0xff] }
  0xbb   : > { %v1330_v21 = vadd.f32 %v1298_v2, %v1233_v62  ;;  %v846_v4 = vadd.f32 %v814_v56, %v749_v27  ;;  %v1008_v3 = vmul.f32 %v1265_v34, %v2892_v23  ;;  %v1299_v29 = vmul.f32 %v2886_v46, %v1266_v7 }
  0xbc   : > { %v1136_v59 = vadd.f32 %v1104_v40, %v1039_v50  ;;  %v621_v38 = vmul.f32 %v2639_v14, %v2054_v31  ;;  %v718_v52 = vmul.f32 %v1264_v43, %v2891_v53  ;;  %v1105_v33 = vmul.f32 %v1362_v39, %v2096_v0 }
  0xbd   : > { %v2704_v42 = vadd.f32 %v1395_v32, %v1330_v21  ;;  %v943_v12 = vadd.f32 %v911_v10, %v846_v4  ;;  %v815_v19 = vmul.f32 %v1361_v36, %v2075_v58  ;;  %v1396_v63 = vmul.f32 %v2663_v51, %v1363_v47  ;;  %v2730_v32 = vld [vmem:[#allocation2 + $0x168] sm:$0xff] }
  0xbe   : > { %v1234_v44 = vadd.f32 %v1202_v61, %v1136_v59  ;;  %v750_v28 = vadd.f32 %v718_v52, %v621_v38  ;;  %v912_v60 = vmul.f32 %v2688_v20, %v2089_v11  ;;  %v1546_v14 = vadd.f32 %v1545_v16, %v1524_v30  ;;  %v1268_v21 = vld [vmem:[#allocation2 + $0x169] sm:$0xff] }
  0xbf   : > { %v1491_v43 = vadd.f32 %v1490_v45, %v2611_v37  ;;  %1459 = vst [vmem:[%s2307_s11 + $0xb8] sm:$0xff] %v2704_v42  ;;  %v1040_v26 = vadd.f32 %v1008_v3, %v943_v12  ;;  %v1203_v49 = vmul.f32 %v2107_v25, %v2709_v18  ;;  %v1525_v36 = vmul.f32 %v2611_v37, %v2611_v37  ;;  %v1365_v52 = vld [vmem:[#allocation2 + $0x16a] sm:$0xff] }
  0xc0   : > { %v1331_v57 = vadd.f32 %v1299_v29, %v1234_v44  ;;  %v847_v55 = vadd.f32 %v815_v19, %v750_v28  ;;  %v1009_v1 = vmul.f32 %v1266_v7, %v2892_v23  ;;  %v1300_v16 = vmul.f32 %v2886_v46, %v1267_v15 }
  0xc1   : > { %v1137_v24 = vadd.f32 %v1105_v33, %v1040_v26  ;;  %v622_v45 = vmul.f32 %v2666_v5, %v2054_v31  ;;  %v719_v2 = vmul.f32 %v1265_v34, %v2891_v53  ;;  %v1106_v37 = vmul.f32 %v1363_v47, %v2096_v0 }
  0xc2   : > { %v2725_v17 = vadd.f32 %v1396_v63, %v1331_v57  ;;  %v944_v8 = vadd.f32 %v912_v60, %v847_v55  ;;  %v816_v40 = vmul.f32 %v1362_v39, %v2075_v58  ;;  %v1397_v62 = vmul.f32 %v2663_v51, %v1364_v6  ;;  %v1172_v63 = vld [vmem:[#allocation2 + $0x170] sm:$0xff] }
  0xc3   : > { %v1235_v56 = vadd.f32 %v1203_v49, %v1137_v24  ;;  %v751_v27 = vadd.f32 %v719_v2, %v622_v45  ;;  %v913_v10 = vmul.f32 %v2709_v18, %v2089_v11  ;;  %v1561_v5 = vadd.f32 %v1560_v9, %v1525_v36  ;;  %v1269_v57 = vld [vmem:[#allocation2 + $0x171] sm:$0xff] }
  0xc4   : > { %v1477_v34 = vadd.f32 %v1476_v41, %v2637_v48  ;;  %1460 = vst [vmem:[%s2307_s11 + $0xc0] sm:$0xff] %v2725_v17  ;;  %v1041_v50 = vadd.f32 %v1009_v1, %v944_v8  ;;  %v1204_v61 = vmul.f32 %v2107_v25, %v2730_v32  ;;  %v1526_v39 = vmul.f32 %v2637_v48, %v2637_v48  ;;  %v1366_v8 = vld [vmem:[#allocation2 + $0x172] sm:$0xff] }
  0xc5   : > { %v1332_v30 = vadd.f32 %v1300_v16, %v1235_v56  ;;  %v848_v4 = vadd.f32 %v816_v40, %v751_v27  ;;  %v1010_v3 = vmul.f32 %v1267_v15, %v2892_v23  ;;  %v1301_v9 = vmul.f32 %v2886_v46, %v1268_v21 }
  0xc6   : > { %v1138_v59 = vadd.f32 %v1106_v37, %v1041_v50  ;;  %v623_v41 = vmul.f32 %v2688_v20, %v2054_v31  ;;  %v720_v29 = vmul.f32 %v1266_v7, %v2891_v53  ;;  %v1107_v48 = vmul.f32 %v1364_v6, %v2096_v0 }
  0xc7   : > { %v2746_v38 = vadd.f32 %v1397_v62, %v1332_v30  ;;  %v945_v12 = vadd.f32 %v913_v10, %v848_v4  ;;  %v817_v33 = vmul.f32 %v1363_v47, %v2075_v58  ;;  %v1398_v44 = vmul.f32 %v2663_v51, %v1365_v52  ;;  %v1367_v4 = vld [vmem:[#allocation2 + $0x182] sm:$0xff] }
  0xc8   : > { %v1236_v19 = vadd.f32 %v1204_v61, %v1138_v59  ;;  %v752_v28 = vadd.f32 %v720_v29, %v623_v41  ;;  %v914_v60 = vmul.f32 %v2730_v32, %v2089_v11  ;;  %v1547_v26 = vadd.f32 %v1546_v14, %v1526_v39  ;;  %v1173_v14 = vld [vmem:[#allocation2 + $0x180] sm:$0xff] }
  0xc9   : > { %v1492_v20 = vadd.f32 %v1491_v43, %v2657_v13  ;;  %1461 = vst [vmem:[%s2307_s11 + $0xc8] sm:$0xff] %v2746_v38  ;;  %v1042_v7 = vadd.f32 %v1010_v3, %v945_v12  ;;  %v1205_v49 = vmul.f32 %v2107_v25, %v1172_v63  ;;  %v1527_v36 = vmul.f32 %v2657_v13, %v2657_v13 }
  0xca   : > { %v1333_v47 = vadd.f32 %v1301_v9, %v1236_v19  ;;  %v849_v55 = vadd.f32 %v817_v33, %v752_v28  ;;  %v1011_v1 = vmul.f32 %v1268_v21, %v2892_v23  ;;  %v1302_v16 = vmul.f32 %v2886_v46, %v1269_v57  ;;  %v1174_v9 = vld [vmem:[#allocation2 + $0x188] sm:$0xff] }
  0xcb   : > { %v1139_v24 = vadd.f32 %v1107_v48, %v1042_v7  ;;  %v624_v43 = vmul.f32 %v2709_v18, %v2054_v31  ;;  %v721_v45 = vmul.f32 %v1267_v15, %v2891_v53  ;;  %v1108_v13 = vmul.f32 %v1365_v52, %v2096_v0 }
  0xcc   : > { %v2764_v2 = vadd.f32 %v1398_v44, %v1333_v47  ;;  %v946_v37 = vadd.f32 %v914_v60, %v849_v55  ;;  %v818_v40 = vmul.f32 %v1364_v6, %v2075_v58  ;;  %v1399_v62 = vmul.f32 %v2663_v51, %v1366_v8  ;;  %v1368_v47 = vld [vmem:[#allocation2 + $0x18a] sm:$0xff] }
  0xcd   : > { %v1237_v56 = vadd.f32 %v1205_v49, %v1139_v24  ;;  %v753_v27 = vadd.f32 %v721_v45, %v624_v43  ;;  %v915_v10 = vmul.f32 %v1172_v63, %v2089_v11  ;;  %v1562_v50 = vadd.f32 %v1561_v5, %v1527_v36  ;;  %v981_v45 = vld [vmem:[#allocation2 + $0x189] sm:$0xff] }
  0xce   : > { %v1478_v61 = vadd.f32 %v1477_v34, %v2683_v54  ;;  %1462 = vst [vmem:[%s2307_s11 + $0xd0] sm:$0xff] %v2764_v2  ;;  %v1043_v18 = vadd.f32 %v1011_v1, %v946_v37  ;;  %v1206_v15 = vmul.f32 %v2107_v25, %v1173_v14  ;;  %v1528_v39 = vmul.f32 %v2683_v54, %v2683_v54 }
  0xcf   : > { %v1334_v30 = vadd.f32 %v1302_v16, %v1237_v56  ;;  %v850_v6 = vadd.f32 %v818_v40, %v753_v27  ;;  %v1012_v3 = vmul.f32 %v1269_v57, %v2892_v23  ;;  %v1303_v5 = vmul.f32 %v2886_v46, %v2504_v22 }
  0xd0   : > { %v1140_v59 = vadd.f32 %v1108_v13, %v1043_v18  ;;  %v625_v34 = vmul.f32 %v2730_v32, %v2054_v31  ;;  %v722_v41 = vmul.f32 %v1268_v21, %v2891_v53  ;;  %v1109_v54 = vmul.f32 %v1366_v8, %v2096_v0 }
  0xd1   : > { %v2782_v29 = vadd.f32 %v1399_v62, %v1334_v30  ;;  %v947_v12 = vadd.f32 %v915_v10, %v850_v6  ;;  %v819_v48 = vmul.f32 %v1365_v52, %v2075_v58  ;;  %v1400_v19 = vmul.f32 %v2663_v51, %v1367_v4 }
  0xd2   : > { %v1238_v33 = vadd.f32 %v1206_v15, %v1140_v59  ;;  %v754_v44 = vadd.f32 %v722_v41, %v625_v34  ;;  %v916_v28 = vmul.f32 %v1173_v14, %v2089_v11  ;;  %v1548_v60 = vadd.f32 %v1547_v26, %v1528_v39  ;;  %v1370_v34 = vld [vmem:[#allocation2 + $0x1a2] sm:$0xff] }
  0xd3   : > { %v1493_v7 = vadd.f32 %v1492_v20, %v2704_v42  ;;  %1463 = vst [vmem:[%s2307_s11 + $0xd8] sm:$0xff] %v2782_v29  ;;  %v1044_v32 = vadd.f32 %v1012_v3, %v947_v12  ;;  %v1207_v21 = vmul.f32 %v2107_v25, %v1174_v9  ;;  %v1529_v49 = vmul.f32 %v2704_v42, %v2704_v42  ;;  %v1273_v3 = vld [vmem:[#allocation2 + $0x1a1] sm:$0xff] }
  0xd4   : > { %v1335_v36 = vadd.f32 %v1303_v5, %v1238_v33  ;;  %v851_v52 = vadd.f32 %v819_v48, %v754_v44  ;;  %v1013_v55 = vmul.f32 %v2892_v23, %v2504_v22  ;;  %v1304_v26 = vmul.f32 %v2886_v46, %v2506_v35  ;;  %v1272_v22 = vld [vmem:[#allocation2 + $0x199] sm:$0xff] }
  0xd5   : > { %v1141_v1 = vadd.f32 %v1109_v54, %v1044_v32  ;;  %v626_v20 = vmul.f32 %v1172_v63, %v2054_v31  ;;  %v723_v24 = vmul.f32 %v1269_v57, %v2891_v53  ;;  %v1110_v43 = vmul.f32 %v1367_v4, %v2096_v0  ;;  %v1788_v35 = vld [vmem:[#allocation2] sm:$0xff] }
  0xd6   : > { %v1432_v16 = vadd.f32 %v1400_v19, %v1335_v36  ;;  %v948_v14 = vadd.f32 %v916_v28, %v851_v52  ;;  %v820_v42 = vmul.f32 %v1366_v8, %v2075_v58  ;;  %v1401_v13 = vmul.f32 %v2663_v51, %v1368_v47  ;;  %v1369_v8 = vld [vmem:[#allocation2 + $0x19a] sm:$0xff] }
  0xd7   : > { %v1239_v37 = vadd.f32 %v1207_v21, %v1141_v1  ;;  %v755_v40 = vadd.f32 %v723_v24, %v626_v20  ;;  %v917_v56 = vmul.f32 %v1174_v9, %v2089_v11  ;;  %v1563_v62 = vadd.f32 %v1562_v50, %v1529_v49 }
  0xd8   : > { %v1530_v31 = vmul.f32 %v2725_v17, %v2725_v17  ;;  %1464 = vst [vmem:[%s2307_s11 + $0xe0] sm:$0xff] %v1432_v16  ;;  %v1045_v53 = vadd.f32 %v1013_v55, %v948_v14  ;;  %v1208_v63 = vmul.f32 %v1788_v35, %v2107_v25  ;;  %v1479_v57 = vadd.f32 %v1478_v61, %v2725_v17 }
  0xd9   : > { %v1336_v58 = vadd.f32 %v1304_v26, %v1239_v37  ;;  %v852_v27 = vadd.f32 %v820_v42, %v755_v40  ;;  %v1014_v10 = vmul.f32 %v2892_v23, %v981_v45  ;;  %v1531_v11 = vmul.f32 %v2746_v38, %v2746_v38 }
  0xda   : > { %v1549_v18 = vadd.f32 %v1548_v60, %v1530_v31  ;;  %v1142_v50 = vadd.f32 %v1110_v43, %v1045_v53  ;;  %v1305_v15 = vmul.f32 %v2886_v46, %v1272_v22  ;;  %v1494_v39 = vadd.f32 %v1493_v7, %v2746_v38 }
  0xdb   : > { %v1433_v30 = vadd.f32 %v1401_v13, %v1336_v58  ;;  %v949_v4 = vadd.f32 %v917_v56, %v852_v27  ;;  %v1111_v25 = vmul.f32 %v1368_v47, %v2096_v0  ;;  %v1564_v17 = vadd.f32 %v1563_v62, %v1531_v11 }
  0xdc   : > { %v1240_v61 = vadd.f32 %v1208_v63, %v1142_v50  ;;  %v1402_v6 = vmul.f32 %v2663_v51, %v1369_v8  ;;  %v1480_v23 = vadd.f32 %v1479_v57, %v2764_v2  ;;  %v1532_v59 = vmul.f32 %v2764_v2, %v2764_v2 }
  0xdd   : > { %1465 = vst [vmem:[%s2307_s11 + $0xe8] sm:$0xff] %v1433_v30  ;;  %v1046_v5 = vadd.f32 %v1014_v10, %v949_v4  ;;  %v1533_v38 = vmul.f32 %v2782_v29, %v2782_v29  ;;  %v1495_v0 = vadd.f32 %v1494_v39, %v2782_v29  ;;  %v1306_v54 = vmul.f32 %v2886_v46, %v1273_v3 }
  0xde   : > { %v1337_v9 = vadd.f32 %v1305_v15, %v1240_v61  ;;  %v1550_v41 = vadd.f32 %v1549_v18, %v1532_v59  ;;  %v1481_v19 = vadd.f32 %v1480_v23, %v1432_v16  ;;  %v1534_v44 = vmul.f32 %v1432_v16, %v1432_v16 }
  0xdf   : > { %v1143_v12 = vadd.f32 %v1111_v25, %v1046_v5  ;;  %v1565_v48 = vadd.f32 %v1564_v17, %v1533_v38  ;;  %v1403_v28 = vmul.f32 %v2663_v51, %v1370_v34  ;;  %v1496_v7 = vadd.f32 %v1495_v0, %v1433_v30 }
  0xe0   : > { %v1434_v33 = vadd.f32 %v1402_v6, %v1337_v9  ;;  %v1551_v60 = vadd.f32 %v1550_v41, %v1534_v44  ;;  %v1535_v32 = vmul.f32 %v1433_v30, %v1433_v30 }
  0xe1   : > { %v1241_v2 = vadd.f32 %v1208_v63, %v1143_v12 }
  0xe2   : > { %1466 = vst [vmem:[%s2307_s11 + $0xf0] sm:$0xff] %v1434_v33  ;;  %v1566_v49 = vadd.f32 %v1565_v48, %v1535_v32  ;;  %v1482_v36 = vadd.f32 %v1481_v19, %v1434_v33  ;;  %v1536_v29 = vmul.f32 %v1434_v33, %v1434_v33 }
  0xe3   : > { %v1338_v21 = vadd.f32 %v1306_v54, %v1241_v2 }
  0xe4   : > { %v1552_v55 = vadd.f32 %v1551_v60, %v1536_v29 }
  0xe5   : > { %v1435_v47 = vadd.f32 %v1403_v28, %v1338_v21 }
  0xe7   : > { %1467 = vst [vmem:[%s2307_s11 + $0xf8] sm:$0xff] %v1435_v47  ;;  %v1497_v46 = vadd.f32 %v1496_v7, %v1435_v47  ;;  %v1537_v52 = vmul.f32 %v1435_v47, %v1435_v47 }
  0xe9   : > { %v1498_v1 = vadd.f32 %v1497_v46, %v1482_v36  ;;  %v1567_v26 = vadd.f32 %v1566_v49, %v1537_v52 }
  0xeb   : > { %v1499_v20 = vrot.slane %v1498_v1, 4  ;;  %v1568_v24 = vadd.f32 %v1567_v26, %v1552_v55 }
  0xed   : > { %v1500_v16 = vadd.f32 %v1499_v20, %v1498_v1  ;;  %v1569_v51 = vrot.slane %v1568_v24, 4 }
  0xef   : > { %v1501_v14 = vrot.slane %v1500_v16, 2  ;;  %v1570_v43 = vadd.f32 %v1569_v51, %v1568_v24 }
  0xf1   : > { %v1502_v42 = vadd.f32 %v1501_v14, %v1500_v16  ;;  %v1571_v45 = vrot.slane %v1570_v43, 2 }
  0xf3   : > { %v1503_v37 = vrot.slane %v1502_v42, 1  ;;  %v1572_v13 = vadd.f32 %v1571_v45, %v1570_v43 }
  0xf5   : > { %v1504_v22 = vadd.f32 %v1503_v37, %v1502_v42  ;;  %v1573_v40 = vrot.slane %v1572_v13, 1 }
  0xf7   : > { %1505 = vst [vmem:[%s319_s25] sm:$0x1] %v1504_v22  ;;  %v1574_v56 = vadd.f32 %v1573_v40, %v1572_v13 }
  0xf9   : > { %1575 = vst [vmem:[%s319_s25 + $0x1] sm:$0x1] %v1574_v56 }
  0xfa PF: > { %s16_s20 = sadd.s32 1, %s1811_s20   ;;  %s2898_s18 = smov %s1807_s19 }
  0xfb   : > { %p13_p5 = scmp.ge.s32.totalorder %s16_s20, 4   ;;  %s2899_s19 = smov %s2901_s21 }
  0xfd   :  { %15 = sbr.rel (!%p13_p5) target bundleno = 2 (0x2), region = 90 }

</bundles_post_ra>
